<compile_context>
chip_gen: v5e
topology: v5e:2x2
jax: 0.10.0
libtpu: 0.0.40
codegen_flags: <defaults>
</compile_context>

<pallas_src>
import jax
import jax.numpy as jnp
from jax.experimental import pallas as pl
from jax.experimental.pallas import tpu as pltpu


def _round_up(n, m):
    return ((n + m - 1) // m) * m


# ---------------------------------------------------------------------------
# Kernel: for one batch tile, run all C deepset critics and write the
# ensemble-mean Q value.
#   x_ref  : (G, TILE, in_pad)     per-goal inputs (goal-major), compute dtype
#   w1_ref : (in_pad, C*net_pad)   layer-1 weights of all critics, packed wide
#   b1_ref : (1, C*net_pad)        f32
#   w2_ref : (C, net_pad, net_pad) per-critic net_in layer-2 weights
#   b2_ref : (C, 1, net_pad)       f32
#   w3_ref : (C, net_pad, net_pad) per-critic net_out layer-1 weights
#   b3_ref : (C, 1, net_pad)       f32
#   w4_ref : (C, 1, net_pad)       final Linear(net_dim, 1) weights, transposed
#   b4_ref : (C,)                  f32 scalars in SMEM
#   out_ref: (TILE, 1)             ensemble-mean Q (f32)
# ---------------------------------------------------------------------------
def redq_deepset_kernel(x_ref, w1_ref, b1_ref, w2_ref, b2_ref,
                        w3_ref, b3_ref, w4_ref, b4_ref, out_ref):
    G = x_ref.shape[0]
    C = w2_ref.shape[0]
    net_pad = w2_ref.shape[2]
    cdt = w1_ref.dtype                       # MXU operand dtype (f32 or bf16)

    w1 = w1_ref[...]
    b1 = b1_ref[...]

    # net_in layer 1: one wide MXU matmul per goal covering all critics.
    h1s = []
    for g in range(G):
        h1 = jnp.dot(x_ref[g], w1, preferred_element_type=jnp.float32)
        h1s.append(jnp.maximum(h1 + b1, 0.0))            # (TILE, C*net_pad) f32

    inv_g = 1.0 / G
    inv_c = 1.0 / C
    q_acc = None
    for c in range(C):
        w2c = w2_ref[c]
        b2c = b2_ref[c]
        # net_in layer 2 + mean over goals (sum, then scale by 1/G)
        h2_sum = None
        for g in range(G):
            h1c = h1s[g][:, c * net_pad:(c + 1) * net_pad].astype(cdt)
            h2 = jnp.dot(h1c, w2c, preferred_element_type=jnp.float32)
            h2 = jnp.maximum(h2 + b2c, 0.0)              # (TILE, net_pad)
            h2_sum = h2 if g == 0 else h2_sum + h2
        pooled = (h2_sum * inv_g).astype(cdt)            # mean over goals

        # net_out layer 1
        h3 = jnp.dot(pooled, w3_ref[c], preferred_element_type=jnp.float32)
        h3 = jnp.maximum(h3 + b3_ref[c], 0.0)            # (TILE, net_pad)

        # net_out layer 2 (Linear(net_dim, 1)): VPU multiply + lane reduction,
        # scalar bias from SMEM -- keeps the MXU free and avoids an N=1 matmul.
        qc = jnp.sum(h3 * w4_ref[c], axis=-1, keepdims=True) + b4_ref[c]
        q_acc = qc if c == 0 else q_acc + qc             # (TILE, 1)

    out_ref[...] = (q_acc * inv_c).astype(out_ref.dtype)  # REDq ensemble mean


# ---------------------------------------------------------------------------
# Wrapper: pure-JAX slicing / packing / padding + one pallas_call.
# ---------------------------------------------------------------------------
def critic_redq_forward(state, action, params_list, cfg, *,
                        compute_dtype=jnp.float32, tile_b=256):
    """CriticREDq.forward(state, action) with net_type='deepset'."""
    shared = cfg["shared_dim"]
    sep = cfg["seperate_dim"]
    goal = cfg["goal_dim"]
    ng = cfg["num_goals"]
    adim = cfg["action_dim"]
    net_dim = cfg["net_dim"]
    ssep = sep // ng
    sgoal = goal // ng
    C = len(params_list)

    # CriticREDq.get_q_values: concat(state, action); each deepset critic then
    # re-extracts the action from the last `adim` columns of the concat.
    sa = jnp.concatenate([state, action], axis=-1).astype(jnp.float32)
    B = sa.shape[0]
    act = sa[..., -adim:]
    obj = sa[..., shared:shared + sep].reshape(B, ng, ssep)
    gl = sa[..., shared + sep:shared + sep + goal].reshape(B, ng, sgoal)
    grip = jnp.broadcast_to(sa[..., :shared][:, None, :], (B, ng, shared))
    actb = jnp.broadcast_to(act[:, None, :], (B, ng, adim))
    x = jnp.concatenate((grip, obj, gl, actb), axis=-1)      # (B, G, in_dim)
    in_dim = x.shape[-1]
    x = jnp.transpose(x, (1, 0, 2))                          # (G, B, in_dim)

    # lane/sublane padding & batch tiling
    in_pad = _round_up(in_dim, 128)
    net_pad = _round_up(net_dim, 128)
    b8 = _round_up(B, 8)
    tile = min(_round_up(tile_b, 8), b8)
    b_pad = _round_up(b8, tile)
    x = jnp.pad(x, ((0, 0), (0, b_pad - B), (0, in_pad - in_dim)))
    x = x.astype(compute_dtype)

    # pack + zero-pad per-critic parameters (padding is exact: padded hidden
    # units get zero weight and zero bias, so ReLU keeps them at 0).
    dn, di = net_pad - net_dim, in_pad - in_dim
    w1s, b1s, w2s, b2s, w3s, b3s, w4s, b4s = ([] for _ in range(8))
    for (w1, b1, w2, b2, w3, b3, w4, b4) in params_list:
        assert w1.shape == (in_dim, net_dim) and w4.shape == (net_dim, 1)
        w1s.append(jnp.pad(w1, ((0, di), (0, dn))))
        b1s.append(jnp.pad(b1, (0, dn)))
        w2s.append(jnp.pad(w2, ((0, dn), (0, dn))))
        b2s.append(jnp.pad(b2, (0, dn)))
        w3s.append(jnp.pad(w3, ((0, dn), (0, dn))))
        b3s.append(jnp.pad(b3, (0, dn)))
        w4s.append(jnp.pad(w4[:, 0], (0, dn)))
        b4s.append(b4.reshape(1))
    W1 = jnp.concatenate(w1s, axis=1).astype(compute_dtype)     # (in_pad, C*np)
    B1 = jnp.concatenate(b1s)[None, :].astype(jnp.float32)      # (1, C*np)
    W2 = jnp.stack(w2s).astype(compute_dtype)                   # (C, np, np)
    B2 = jnp.stack(b2s)[:, None, :].astype(jnp.float32)         # (C, 1, np)
    W3 = jnp.stack(w3s).astype(compute_dtype)
    B3 = jnp.stack(b3s)[:, None, :].astype(jnp.float32)
    W4 = jnp.stack(w4s)[:, None, :].astype(compute_dtype)       # (C, 1, np)
    B4 = jnp.concatenate(b4s).astype(jnp.float32)               # (C,)

    n_tiles = b_pad // tile
    cn = C * net_pad

    out = pl.pallas_call(
        redq_deepset_kernel,
        out_shape=jax.ShapeDtypeStruct((b_pad, 1), jnp.float32),
        grid=(n_tiles,),
        in_specs=[
            # activation tile: pipelined / double-buffered over the batch grid
            pl.BlockSpec((ng, tile, in_pad), lambda i: (0, i, 0)),
            # weights & biases: constant index_map -> fetched once, resident
            pl.BlockSpec((in_pad, cn), lambda i: (0, 0)),
            pl.BlockSpec((1, cn), lambda i: (0, 0)),
            pl.BlockSpec((C, net_pad, net_pad), lambda i: (0, 0, 0)),
            pl.BlockSpec((C, 1, net_pad), lambda i: (0, 0, 0)),
            pl.BlockSpec((C, net_pad, net_pad), lambda i: (0, 0, 0)),
            pl.BlockSpec((C, 1, net_pad), lambda i: (0, 0, 0)),
            pl.BlockSpec((C, 1, net_pad), lambda i: (0, 0, 0)),
            # final-layer scalar biases live in SMEM
            pl.BlockSpec(memory_space=pltpu.MemorySpace.SMEM),
        ],
        out_specs=pl.BlockSpec((tile, 1), lambda i: (i, 0)),
        compiler_params=pltpu.CompilerParams(
            dimension_semantics=("parallel",)),
    )(x, W1, B1, W2, B2, W3, B3, W4, B4)

    return out[:B]


# ---------------------------------------------------------------------------
# Deterministic parameter init (PyTorch-Linear-style uniform, synthetic)
# ---------------------------------------------------------------------------
def init_params(key, in_dim, net_dim):
    def linear(k, fan_in, fan_out):
        kw, kb = jax.random.split(k)
        lim = 1.0 / jnp.sqrt(fan_in)
        w = jax.random.uniform(kw, (fan_in, fan_out), jnp.float32, -lim, lim)
        b = jax.random.uniform(kb, (fan_out,), jnp.float32, -lim, lim)
        return w, b

    k1, k2, k3, k4 = jax.random.split(key, 4)
    w1, b1 = linear(k1, in_dim, net_dim)
    w2, b2 = linear(k2, net_dim, net_dim)
    w3, b3 = linear(k3, net_dim, net_dim)
    w4, b4 = linear(k4, net_dim, 1)
    return (w1, b1, w2, b2, w3, b3, w4, b4)


# ---------------------------------------------------------------------------
# Pure-JAX reference mirroring the PyTorch forward exactly
# ---------------------------------------------------------------------------
def _reference_deepset(sa, params, cfg):
    shared = cfg["shared_dim"]; sep = cfg["seperate_dim"]; goal = cfg["goal_dim"]
    ng = cfg["num_goals"]; adim = cfg["action_dim"]
    ssep = sep // ng; sgoal = goal // ng
    action = sa[..., -adim:]
    B = sa.shape[0]
    obj = sa[..., shared:shared + sep].reshape(B, ng, ssep)
    gl = sa[..., shared + sep:shared + sep + goal].reshape(B, ng, sgoal)
    grip = jnp.broadcast_to(sa[..., :shared][:, None, :], (B, ng, shared))
    act = jnp.broadcast_to(action[:, None, :], (B, ng, adim))
    x = jnp.concatenate((grip, obj, gl, act), axis=-1).astype(jnp.float32)
    w1, b1, w2, b2, w3, b3, w4, b4 = params
    h = jax.nn.relu(x @ w1 + b1)
    h = jax.nn.relu(h @ w2 + b2)
    h = h.mean(axis=1)
    y = jax.nn.relu(h @ w3 + b3)
    return y @ w4 + b4


def reference_redq_forward(state, action, params_list, cfg):
    with jax.default_matmul_precision("highest"):
        sa = jnp.concatenate([state, action], axis=-1).astype(jnp.float32)
        qs = jnp.concatenate(
            [_reference_deepset(sa, p, cfg) for p in params_list], axis=1)
        return qs.mean(axis=1, keepdims=True)


if __name__ == "__main__":
    cfg = dict(shared_dim=8, seperate_dim=8, goal_dim=4, num_goals=2,
               action_dim=4, net_dim=32)
    in_dim = (cfg["shared_dim"] + cfg["seperate_dim"] // cfg["num_goals"]
              + cfg["goal_dim"] // cfg["num_goals"] + cfg["action_dim"])
    state_dim = cfg["shared_dim"] + cfg["seperate_dim"] + cfg["goal_dim"]
    critic_num = 8

    key = jax.random.PRNGKey(0)
    kp, ks, ka = jax.random.split(key, 3)
    params_list = [init_params(k, in_dim, cfg["net_dim"])
                   for k in jax.random.split(kp, critic_num)]

    B = 20
    state = jax.random.normal(ks, (B, state_dim), jnp.float32)
    action = jax.random.normal(ka, (B, cfg["action_dim"]), jnp.float32)

    ref = jax.block_until_ready(
        reference_redq_forward(state, action, params_list, cfg))

    # f32 MXU operands, single batch tile
    out = jax.block_until_ready(
        critic_redq_forward(state, action, params_list, cfg))
    assert out.shape == (B, 1), out.shape
    assert jnp.allclose(out, ref, atol=1e-3, rtol=1e-3), (out, ref)

    # multi-tile batch grid (exercises pipelining + padded-batch path)
    out_tiled = jax.block_until_ready(
        critic_redq_forward(state, action, params_list, cfg, tile_b=8))
    assert jnp.allclose(out_tiled, ref, atol=1e-3, rtol=1e-3), (out_tiled, ref)

    # bf16 MXU operands with f32 accumulation (perf path for v6e / v7x)
    out_bf16 = jax.block_until_ready(
        critic_redq_forward(state, action, params_list, cfg,
                            compute_dtype=jnp.bfloat16))
    assert jnp.allclose(out_bf16, ref, atol=5e-2, rtol=5e-2), (out_bf16, ref)

    print("KERNEL_OK")
</pallas_src>

<mosaic_0001>
module attributes {stable_mosaic.version = 11 : i64} {
  func.func @redq_deepset_kernel(%arg0: i32, %arg1: memref<2x24x128xf32, #tpu.memory_space<vmem>>, %arg2: memref<128x1024xf32, #tpu.memory_space<vmem>>, %arg3: memref<1x1024xf32, #tpu.memory_space<vmem>>, %arg4: memref<8x128x128xf32, #tpu.memory_space<vmem>>, %arg5: memref<8x1x128xf32, #tpu.memory_space<vmem>>, %arg6: memref<8x128x128xf32, #tpu.memory_space<vmem>>, %arg7: memref<8x1x128xf32, #tpu.memory_space<vmem>>, %arg8: memref<8x1x128xf32, #tpu.memory_space<vmem>>, %arg9: memref<8xf32, #tpu.memory_space<smem>>, %arg10: memref<24x1xf32, #tpu.memory_space<vmem>>) attributes {dimension_semantics = [#tpu.dimension_semantics<parallel>], iteration_bounds = array<i64: 1>, scalar_prefetch = 0 : i64, scratch_operands = 0 : i64, tpu.core_type = #tpu.core_type<tc>, window_params = [{transform_indices = @transform_0, window_bounds = array<i64: 2, 24, 128>}, {pipeline_mode = #tpu.pipeline_mode<synchronous>, transform_indices = @transform_1, window_bounds = array<i64: 128, 1024>}, {pipeline_mode = #tpu.pipeline_mode<synchronous>, transform_indices = @transform_2, window_bounds = array<i64: 1, 1024>}, {pipeline_mode = #tpu.pipeline_mode<synchronous>, transform_indices = @transform_3, window_bounds = array<i64: 8, 128, 128>}, {pipeline_mode = #tpu.pipeline_mode<synchronous>, transform_indices = @transform_4, window_bounds = array<i64: 8, 1, 128>}, {pipeline_mode = #tpu.pipeline_mode<synchronous>, transform_indices = @transform_5, window_bounds = array<i64: 8, 128, 128>}, {pipeline_mode = #tpu.pipeline_mode<synchronous>, transform_indices = @transform_6, window_bounds = array<i64: 8, 1, 128>}, {pipeline_mode = #tpu.pipeline_mode<synchronous>, transform_indices = @transform_7, window_bounds = array<i64: 8, 1, 128>}, {transform_indices = @transform_8, window_bounds = array<i64: 8>}, {transform_indices = @transform_9, window_bounds = array<i64: 24, 1>}]} {
    %c0 = arith.constant 0 : index
    %c0_0 = arith.constant 0 : index
    %0 = vector.load %arg2[%c0, %c0_0] : memref<128x1024xf32, #tpu.memory_space<vmem>>, vector<128x1024xf32>
    %c0_1 = arith.constant 0 : index
    %c0_2 = arith.constant 0 : index
    %1 = vector.load %arg3[%c0_1, %c0_2] : memref<1x1024xf32, #tpu.memory_space<vmem>>, vector<1x1024xf32>
    %c0_3 = arith.constant 0 : index
    %c0_4 = arith.constant 0 : index
    %c0_5 = arith.constant 0 : index
    %2 = vector.load %arg1[%c0_3, %c0_4, %c0_5] : memref<2x24x128xf32, #tpu.memory_space<vmem>>, vector<1x24x128xf32>
    %3 = vector.shape_cast %2 : vector<1x24x128xf32> to vector<24x128xf32>
    %cst = arith.constant dense<0.000000e+00> : vector<24x1024xf32>
    %4 = tpu.matmul %3, %0, %cst {dimension_numbers = #tpu.dot_dimension_numbers<[1], [0], [0], [1], [0, 0, 1, 1], [], []>} : vector<24x128xf32>, vector<128x1024xf32>, vector<24x1024xf32> -> vector<24x1024xf32>
    %5 = vector.broadcast %1 : vector<1x1024xf32> to vector<24x1024xf32>
    %6 = arith.addf %4, %5 : vector<24x1024xf32>
    %cst_6 = arith.constant 0.000000e+00 : f32
    %7 = vector.broadcast %cst_6 : f32 to vector<24x1024xf32>
    %8 = arith.maximumf %6, %7 : vector<24x1024xf32>
    %c1 = arith.constant 1 : index
    %c0_7 = arith.constant 0 : index
    %c0_8 = arith.constant 0 : index
    %9 = vector.load %arg1[%c1, %c0_7, %c0_8] : memref<2x24x128xf32, #tpu.memory_space<vmem>>, vector<1x24x128xf32>
    %10 = vector.shape_cast %9 : vector<1x24x128xf32> to vector<24x128xf32>
    %cst_9 = arith.constant dense<0.000000e+00> : vector<24x1024xf32>
    %11 = tpu.matmul %10, %0, %cst_9 {dimension_numbers = #tpu.dot_dimension_numbers<[1], [0], [0], [1], [0, 0, 1, 1], [], []>} : vector<24x128xf32>, vector<128x1024xf32>, vector<24x1024xf32> -> vector<24x1024xf32>
    %12 = vector.broadcast %1 : vector<1x1024xf32> to vector<24x1024xf32>
    %13 = arith.addf %11, %12 : vector<24x1024xf32>
    %cst_10 = arith.constant 0.000000e+00 : f32
    %14 = vector.broadcast %cst_10 : f32 to vector<24x1024xf32>
    %15 = arith.maximumf %13, %14 : vector<24x1024xf32>
    %c0_11 = arith.constant 0 : index
    %c0_12 = arith.constant 0 : index
    %c0_13 = arith.constant 0 : index
    %16 = vector.load %arg4[%c0_11, %c0_12, %c0_13] : memref<8x128x128xf32, #tpu.memory_space<vmem>>, vector<1x128x128xf32>
    %17 = vector.shape_cast %16 : vector<1x128x128xf32> to vector<128x128xf32>
    %c0_14 = arith.constant 0 : index
    %c0_15 = arith.constant 0 : index
    %c0_16 = arith.constant 0 : index
    %18 = vector.load %arg5[%c0_14, %c0_15, %c0_16] : memref<8x1x128xf32, #tpu.memory_space<vmem>>, vector<1x1x128xf32>
    %19 = vector.shape_cast %18 : vector<1x1x128xf32> to vector<1x128xf32>
    %20 = vector.extract_strided_slice %8 {offsets = [0, 0], sizes = [24, 128], strides = [1, 1]} : vector<24x1024xf32> to vector<24x128xf32>
    %cst_17 = arith.constant dense<0.000000e+00> : vector<24x128xf32>
    %21 = tpu.matmul %20, %17, %cst_17 {dimension_numbers = #tpu.dot_dimension_numbers<[1], [0], [0], [1], [0, 0, 1, 1], [], []>} : vector<24x128xf32>, vector<128x128xf32>, vector<24x128xf32> -> vector<24x128xf32>
    %22 = vector.broadcast %19 : vector<1x128xf32> to vector<24x128xf32>
    %23 = arith.addf %21, %22 : vector<24x128xf32>
    %cst_18 = arith.constant 0.000000e+00 : f32
    %24 = vector.broadcast %cst_18 : f32 to vector<24x128xf32>
    %25 = arith.maximumf %23, %24 : vector<24x128xf32>
    %26 = vector.extract_strided_slice %15 {offsets = [0, 0], sizes = [24, 128], strides = [1, 1]} : vector<24x1024xf32> to vector<24x128xf32>
    %cst_19 = arith.constant dense<0.000000e+00> : vector<24x128xf32>
    %27 = tpu.matmul %26, %17, %cst_19 {dimension_numbers = #tpu.dot_dimension_numbers<[1], [0], [0], [1], [0, 0, 1, 1], [], []>} : vector<24x128xf32>, vector<128x128xf32>, vector<24x128xf32> -> vector<24x128xf32>
    %28 = vector.broadcast %19 : vector<1x128xf32> to vector<24x128xf32>
    %29 = arith.addf %27, %28 : vector<24x128xf32>
    %cst_20 = arith.constant 0.000000e+00 : f32
    %30 = vector.broadcast %cst_20 : f32 to vector<24x128xf32>
    %31 = arith.maximumf %29, %30 : vector<24x128xf32>
    %32 = arith.addf %25, %31 : vector<24x128xf32>
    %cst_21 = arith.constant 5.000000e-01 : f32
    %33 = vector.broadcast %cst_21 : f32 to vector<24x128xf32>
    %34 = arith.mulf %32, %33 : vector<24x128xf32>
    %c0_22 = arith.constant 0 : index
    %c0_23 = arith.constant 0 : index
    %c0_24 = arith.constant 0 : index
    %35 = vector.load %arg6[%c0_22, %c0_23, %c0_24] : memref<8x128x128xf32, #tpu.memory_space<vmem>>, vector<1x128x128xf32>
    %36 = vector.shape_cast %35 : vector<1x128x128xf32> to vector<128x128xf32>
    %cst_25 = arith.constant dense<0.000000e+00> : vector<24x128xf32>
    %37 = tpu.matmul %34, %36, %cst_25 {dimension_numbers = #tpu.dot_dimension_numbers<[1], [0], [0], [1], [0, 0, 1, 1], [], []>} : vector<24x128xf32>, vector<128x128xf32>, vector<24x128xf32> -> vector<24x128xf32>
    %c0_26 = arith.constant 0 : index
    %c0_27 = arith.constant 0 : index
    %c0_28 = arith.constant 0 : index
    %38 = vector.load %arg7[%c0_26, %c0_27, %c0_28] : memref<8x1x128xf32, #tpu.memory_space<vmem>>, vector<1x1x128xf32>
    %39 = vector.shape_cast %38 : vector<1x1x128xf32> to vector<1x128xf32>
    %40 = vector.broadcast %39 : vector<1x128xf32> to vector<24x128xf32>
    %41 = arith.addf %37, %40 : vector<24x128xf32>
    %cst_29 = arith.constant 0.000000e+00 : f32
    %42 = vector.broadcast %cst_29 : f32 to vector<24x128xf32>
    %43 = arith.maximumf %41, %42 : vector<24x128xf32>
    %c0_30 = arith.constant 0 : index
    %c0_31 = arith.constant 0 : index
    %c0_32 = arith.constant 0 : index
    %44 = vector.load %arg8[%c0_30, %c0_31, %c0_32] : memref<8x1x128xf32, #tpu.memory_space<vmem>>, vector<1x1x128xf32>
    %45 = vector.shape_cast %44 : vector<1x1x128xf32> to vector<1x128xf32>
    %46 = vector.broadcast %45 : vector<1x128xf32> to vector<24x128xf32>
    %47 = arith.mulf %43, %46 : vector<24x128xf32>
    %cst_33 = arith.constant dense<0.000000e+00> : vector<24xf32>
    %48 = vector.multi_reduction <add>, %47, %cst_33 [1] : vector<24x128xf32> to vector<24xf32>
    %49 = vector.shape_cast %48 : vector<24xf32> to vector<24x1xf32>
    %c0_34 = arith.constant 0 : index
    %50 = memref.load %arg9[%c0_34] : memref<8xf32, #tpu.memory_space<smem>>
    %51 = vector.broadcast %50 : f32 to vector<24x1xf32>
    %52 = arith.addf %49, %51 : vector<24x1xf32>
    %c1_35 = arith.constant 1 : index
    %c0_36 = arith.constant 0 : index
    %c0_37 = arith.constant 0 : index
    %53 = vector.load %arg4[%c1_35, %c0_36, %c0_37] : memref<8x128x128xf32, #tpu.memory_space<vmem>>, vector<1x128x128xf32>
    %54 = vector.shape_cast %53 : vector<1x128x128xf32> to vector<128x128xf32>
    %c1_38 = arith.constant 1 : index
    %c0_39 = arith.constant 0 : index
    %c0_40 = arith.constant 0 : index
    %55 = vector.load %arg5[%c1_38, %c0_39, %c0_40] : memref<8x1x128xf32, #tpu.memory_space<vmem>>, vector<1x1x128xf32>
    %56 = vector.shape_cast %55 : vector<1x1x128xf32> to vector<1x128xf32>
    %57 = vector.extract_strided_slice %8 {offsets = [0, 128], sizes = [24, 128], strides = [1, 1]} : vector<24x1024xf32> to vector<24x128xf32>
    %cst_41 = arith.constant dense<0.000000e+00> : vector<24x128xf32>
    %58 = tpu.matmul %57, %54, %cst_41 {dimension_numbers = #tpu.dot_dimension_numbers<[1], [0], [0], [1], [0, 0, 1, 1], [], []>} : vector<24x128xf32>, vector<128x128xf32>, vector<24x128xf32> -> vector<24x128xf32>
    %59 = vector.broadcast %56 : vector<1x128xf32> to vector<24x128xf32>
    %60 = arith.addf %58, %59 : vector<24x128xf32>
    %cst_42 = arith.constant 0.000000e+00 : f32
    %61 = vector.broadcast %cst_42 : f32 to vector<24x128xf32>
    %62 = arith.maximumf %60, %61 : vector<24x128xf32>
    %63 = vector.extract_strided_slice %15 {offsets = [0, 128], sizes = [24, 128], strides = [1, 1]} : vector<24x1024xf32> to vector<24x128xf32>
    %cst_43 = arith.constant dense<0.000000e+00> : vector<24x128xf32>
    %64 = tpu.matmul %63, %54, %cst_43 {dimension_numbers = #tpu.dot_dimension_numbers<[1], [0], [0], [1], [0, 0, 1, 1], [], []>} : vector<24x128xf32>, vector<128x128xf32>, vector<24x128xf32> -> vector<24x128xf32>
    %65 = vector.broadcast %56 : vector<1x128xf32> to vector<24x128xf32>
    %66 = arith.addf %64, %65 : vector<24x128xf32>
    %cst_44 = arith.constant 0.000000e+00 : f32
    %67 = vector.broadcast %cst_44 : f32 to vector<24x128xf32>
    %68 = arith.maximumf %66, %67 : vector<24x128xf32>
    %69 = arith.addf %62, %68 : vector<24x128xf32>
    %cst_45 = arith.constant 5.000000e-01 : f32
    %70 = vector.broadcast %cst_45 : f32 to vector<24x128xf32>
    %71 = arith.mulf %69, %70 : vector<24x128xf32>
    %c1_46 = arith.constant 1 : index
    %c0_47 = arith.constant 0 : index
    %c0_48 = arith.constant 0 : index
    %72 = vector.load %arg6[%c1_46, %c0_47, %c0_48] : memref<8x128x128xf32, #tpu.memory_space<vmem>>, vector<1x128x128xf32>
    %73 = vector.shape_cast %72 : vector<1x128x128xf32> to vector<128x128xf32>
    %cst_49 = arith.constant dense<0.000000e+00> : vector<24x128xf32>
    %74 = tpu.matmul %71, %73, %cst_49 {dimension_numbers = #tpu.dot_dimension_numbers<[1], [0], [0], [1], [0, 0, 1, 1], [], []>} : vector<24x128xf32>, vector<128x128xf32>, vector<24x128xf32> -> vector<24x128xf32>
    %c1_50 = arith.constant 1 : index
    %c0_51 = arith.constant 0 : index
    %c0_52 = arith.constant 0 : index
    %75 = vector.load %arg7[%c1_50, %c0_51, %c0_52] : memref<8x1x128xf32, #tpu.memory_space<vmem>>, vector<1x1x128xf32>
    %76 = vector.shape_cast %75 : vector<1x1x128xf32> to vector<1x128xf32>
    %77 = vector.broadcast %76 : vector<1x128xf32> to vector<24x128xf32>
    %78 = arith.addf %74, %77 : vector<24x128xf32>
    %cst_53 = arith.constant 0.000000e+00 : f32
    %79 = vector.broadcast %cst_53 : f32 to vector<24x128xf32>
    %80 = arith.maximumf %78, %79 : vector<24x128xf32>
    %c1_54 = arith.constant 1 : index
    %c0_55 = arith.constant 0 : index
    %c0_56 = arith.constant 0 : index
    %81 = vector.load %arg8[%c1_54, %c0_55, %c0_56] : memref<8x1x128xf32, #tpu.memory_space<vmem>>, vector<1x1x128xf32>
    %82 = vector.shape_cast %81 : vector<1x1x128xf32> to vector<1x128xf32>
    %83 = vector.broadcast %82 : vector<1x128xf32> to vector<24x128xf32>
    %84 = arith.mulf %80, %83 : vector<24x128xf32>
    %cst_57 = arith.constant dense<0.000000e+00> : vector<24xf32>
    %85 = vector.multi_reduction <add>, %84, %cst_57 [1] : vector<24x128xf32> to vector<24xf32>
    %86 = vector.shape_cast %85 : vector<24xf32> to vector<24x1xf32>
    %c1_58 = arith.constant 1 : index
    %87 = memref.load %arg9[%c1_58] : memref<8xf32, #tpu.memory_space<smem>>
    %88 = vector.broadcast %87 : f32 to vector<24x1xf32>
    %89 = arith.addf %86, %88 : vector<24x1xf32>
    %90 = arith.addf %52, %89 : vector<24x1xf32>
    %c2 = arith.constant 2 : index
    %c0_59 = arith.constant 0 : index
    %c0_60 = arith.constant 0 : index
    %91 = vector.load %arg4[%c2, %c0_59, %c0_60] : memref<8x128x128xf32, #tpu.memory_space<vmem>>, vector<1x128x128xf32>
    %92 = vector.shape_cast %91 : vector<1x128x128xf32> to vector<128x128xf32>
    %c2_61 = arith.constant 2 : index
    %c0_62 = arith.constant 0 : index
    %c0_63 = arith.constant 0 : index
    %93 = vector.load %arg5[%c2_61, %c0_62, %c0_63] : memref<8x1x128xf32, #tpu.memory_space<vmem>>, vector<1x1x128xf32>
    %94 = vector.shape_cast %93 : vector<1x1x128xf32> to vector<1x128xf32>
    %95 = vector.extract_strided_slice %8 {offsets = [0, 256], sizes = [24, 128], strides = [1, 1]} : vector<24x1024xf32> to vector<24x128xf32>
    %cst_64 = arith.constant dense<0.000000e+00> : vector<24x128xf32>
    %96 = tpu.matmul %95, %92, %cst_64 {dimension_numbers = #tpu.dot_dimension_numbers<[1], [0], [0], [1], [0, 0, 1, 1], [], []>} : vector<24x128xf32>, vector<128x128xf32>, vector<24x128xf32> -> vector<24x128xf32>
    %97 = vector.broadcast %94 : vector<1x128xf32> to vector<24x128xf32>
    %98 = arith.addf %96, %97 : vector<24x128xf32>
    %cst_65 = arith.constant 0.000000e+00 : f32
    %99 = vector.broadcast %cst_65 : f32 to vector<24x128xf32>
    %100 = arith.maximumf %98, %99 : vector<24x128xf32>
    %101 = vector.extract_strided_slice %15 {offsets = [0, 256], sizes = [24, 128], strides = [1, 1]} : vector<24x1024xf32> to vector<24x128xf32>
    %cst_66 = arith.constant dense<0.000000e+00> : vector<24x128xf32>
    %102 = tpu.matmul %101, %92, %cst_66 {dimension_numbers = #tpu.dot_dimension_numbers<[1], [0], [0], [1], [0, 0, 1, 1], [], []>} : vector<24x128xf32>, vector<128x128xf32>, vector<24x128xf32> -> vector<24x128xf32>
    %103 = vector.broadcast %94 : vector<1x128xf32> to vector<24x128xf32>
    %104 = arith.addf %102, %103 : vector<24x128xf32>
    %cst_67 = arith.constant 0.000000e+00 : f32
    %105 = vector.broadcast %cst_67 : f32 to vector<24x128xf32>
    %106 = arith.maximumf %104, %105 : vector<24x128xf32>
    %107 = arith.addf %100, %106 : vector<24x128xf32>
    %cst_68 = arith.constant 5.000000e-01 : f32
    %108 = vector.broadcast %cst_68 : f32 to vector<24x128xf32>
    %109 = arith.mulf %107, %108 : vector<24x128xf32>
    %c2_69 = arith.constant 2 : index
    %c0_70 = arith.constant 0 : index
    %c0_71 = arith.constant 0 : index
    %110 = vector.load %arg6[%c2_69, %c0_70, %c0_71] : memref<8x128x128xf32, #tpu.memory_space<vmem>>, vector<1x128x128xf32>
    %111 = vector.shape_cast %110 : vector<1x128x128xf32> to vector<128x128xf32>
    %cst_72 = arith.constant dense<0.000000e+00> : vector<24x128xf32>
    %112 = tpu.matmul %109, %111, %cst_72 {dimension_numbers = #tpu.dot_dimension_numbers<[1], [0], [0], [1], [0, 0, 1, 1], [], []>} : vector<24x128xf32>, vector<128x128xf32>, vector<24x128xf32> -> vector<24x128xf32>
    %c2_73 = arith.constant 2 : index
    %c0_74 = arith.constant 0 : index
    %c0_75 = arith.constant 0 : index
    %113 = vector.load %arg7[%c2_73, %c0_74, %c0_75] : memref<8x1x128xf32, #tpu.memory_space<vmem>>, vector<1x1x128xf32>
    %114 = vector.shape_cast %113 : vector<1x1x128xf32> to vector<1x128xf32>
    %115 = vector.broadcast %114 : vector<1x128xf32> to vector<24x128xf32>
    %116 = arith.addf %112, %115 : vector<24x128xf32>
    %cst_76 = arith.constant 0.000000e+00 : f32
    %117 = vector.broadcast %cst_76 : f32 to vector<24x128xf32>
    %118 = arith.maximumf %116, %117 : vector<24x128xf32>
    %c2_77 = arith.constant 2 : index
    %c0_78 = arith.constant 0 : index
    %c0_79 = arith.constant 0 : index
    %119 = vector.load %arg8[%c2_77, %c0_78, %c0_79] : memref<8x1x128xf32, #tpu.memory_space<vmem>>, vector<1x1x128xf32>
    %120 = vector.shape_cast %119 : vector<1x1x128xf32> to vector<1x128xf32>
    %121 = vector.broadcast %120 : vector<1x128xf32> to vector<24x128xf32>
    %122 = arith.mulf %118, %121 : vector<24x128xf32>
    %cst_80 = arith.constant dense<0.000000e+00> : vector<24xf32>
    %123 = vector.multi_reduction <add>, %122, %cst_80 [1] : vector<24x128xf32> to vector<24xf32>
    %124 = vector.shape_cast %123 : vector<24xf32> to vector<24x1xf32>
    %c2_81 = arith.constant 2 : index
    %125 = memref.load %arg9[%c2_81] : memref<8xf32, #tpu.memory_space<smem>>
    %126 = vector.broadcast %125 : f32 to vector<24x1xf32>
    %127 = arith.addf %124, %126 : vector<24x1xf32>
    %128 = arith.addf %90, %127 : vector<24x1xf32>
    %c3 = arith.constant 3 : index
    %c0_82 = arith.constant 0 : index
    %c0_83 = arith.constant 0 : index
    %129 = vector.load %arg4[%c3, %c0_82, %c0_83] : memref<8x128x128xf32, #tpu.memory_space<vmem>>, vector<1x128x128xf32>
    %130 = vector.shape_cast %129 : vector<1x128x128xf32> to vector<128x128xf32>
    %c3_84 = arith.constant 3 : index
    %c0_85 = arith.constant 0 : index
    %c0_86 = arith.constant 0 : index
    %131 = vector.load %arg5[%c3_84, %c0_85, %c0_86] : memref<8x1x128xf32, #tpu.memory_space<vmem>>, vector<1x1x128xf32>
    %132 = vector.shape_cast %131 : vector<1x1x128xf32> to vector<1x128xf32>
    %133 = vector.extract_strided_slice %8 {offsets = [0, 384], sizes = [24, 128], strides = [1, 1]} : vector<24x1024xf32> to vector<24x128xf32>
    %cst_87 = arith.constant dense<0.000000e+00> : vector<24x128xf32>
    %134 = tpu.matmul %133, %130, %cst_87 {dimension_numbers = #tpu.dot_dimension_numbers<[1], [0], [0], [1], [0, 0, 1, 1], [], []>} : vector<24x128xf32>, vector<128x128xf32>, vector<24x128xf32> -> vector<24x128xf32>
    %135 = vector.broadcast %132 : vector<1x128xf32> to vector<24x128xf32>
    %136 = arith.addf %134, %135 : vector<24x128xf32>
    %cst_88 = arith.constant 0.000000e+00 : f32
    %137 = vector.broadcast %cst_88 : f32 to vector<24x128xf32>
    %138 = arith.maximumf %136, %137 : vector<24x128xf32>
    %139 = vector.extract_strided_slice %15 {offsets = [0, 384], sizes = [24, 128], strides = [1, 1]} : vector<24x1024xf32> to vector<24x128xf32>
    %cst_89 = arith.constant dense<0.000000e+00> : vector<24x128xf32>
    %140 = tpu.matmul %139, %130, %cst_89 {dimension_numbers = #tpu.dot_dimension_numbers<[1], [0], [0], [1], [0, 0, 1, 1], [], []>} : vector<24x128xf32>, vector<128x128xf32>, vector<24x128xf32> -> vector<24x128xf32>
    %141 = vector.broadcast %132 : vector<1x128xf32> to vector<24x128xf32>
    %142 = arith.addf %140, %141 : vector<24x128xf32>
    %cst_90 = arith.constant 0.000000e+00 : f32
    %143 = vector.broadcast %cst_90 : f32 to vector<24x128xf32>
    %144 = arith.maximumf %142, %143 : vector<24x128xf32>
    %145 = arith.addf %138, %144 : vector<24x128xf32>
    %cst_91 = arith.constant 5.000000e-01 : f32
    %146 = vector.broadcast %cst_91 : f32 to vector<24x128xf32>
    %147 = arith.mulf %145, %146 : vector<24x128xf32>
    %c3_92 = arith.constant 3 : index
    %c0_93 = arith.constant 0 : index
    %c0_94 = arith.constant 0 : index
    %148 = vector.load %arg6[%c3_92, %c0_93, %c0_94] : memref<8x128x128xf32, #tpu.memory_space<vmem>>, vector<1x128x128xf32>
    %149 = vector.shape_cast %148 : vector<1x128x128xf32> to vector<128x128xf32>
    %cst_95 = arith.constant dense<0.000000e+00> : vector<24x128xf32>
    %150 = tpu.matmul %147, %149, %cst_95 {dimension_numbers = #tpu.dot_dimension_numbers<[1], [0], [0], [1], [0, 0, 1, 1], [], []>} : vector<24x128xf32>, vector<128x128xf32>, vector<24x128xf32> -> vector<24x128xf32>
    %c3_96 = arith.constant 3 : index
    %c0_97 = arith.constant 0 : index
    %c0_98 = arith.constant 0 : index
    %151 = vector.load %arg7[%c3_96, %c0_97, %c0_98] : memref<8x1x128xf32, #tpu.memory_space<vmem>>, vector<1x1x128xf32>
    %152 = vector.shape_cast %151 : vector<1x1x128xf32> to vector<1x128xf32>
    %153 = vector.broadcast %152 : vector<1x128xf32> to vector<24x128xf32>
    %154 = arith.addf %150, %153 : vector<24x128xf32>
    %cst_99 = arith.constant 0.000000e+00 : f32
    %155 = vector.broadcast %cst_99 : f32 to vector<24x128xf32>
    %156 = arith.maximumf %154, %155 : vector<24x128xf32>
    %c3_100 = arith.constant 3 : index
    %c0_101 = arith.constant 0 : index
    %c0_102 = arith.constant 0 : index
    %157 = vector.load %arg8[%c3_100, %c0_101, %c0_102] : memref<8x1x128xf32, #tpu.memory_space<vmem>>, vector<1x1x128xf32>
    %158 = vector.shape_cast %157 : vector<1x1x128xf32> to vector<1x128xf32>
    %159 = vector.broadcast %158 : vector<1x128xf32> to vector<24x128xf32>
    %160 = arith.mulf %156, %159 : vector<24x128xf32>
    %cst_103 = arith.constant dense<0.000000e+00> : vector<24xf32>
    %161 = vector.multi_reduction <add>, %160, %cst_103 [1] : vector<24x128xf32> to vector<24xf32>
    %162 = vector.shape_cast %161 : vector<24xf32> to vector<24x1xf32>
    %c3_104 = arith.constant 3 : index
    %163 = memref.load %arg9[%c3_104] : memref<8xf32, #tpu.memory_space<smem>>
    %164 = vector.broadcast %163 : f32 to vector<24x1xf32>
    %165 = arith.addf %162, %164 : vector<24x1xf32>
    %166 = arith.addf %128, %165 : vector<24x1xf32>
    %c4 = arith.constant 4 : index
    %c0_105 = arith.constant 0 : index
    %c0_106 = arith.constant 0 : index
    %167 = vector.load %arg4[%c4, %c0_105, %c0_106] : memref<8x128x128xf32, #tpu.memory_space<vmem>>, vector<1x128x128xf32>
    %168 = vector.shape_cast %167 : vector<1x128x128xf32> to vector<128x128xf32>
    %c4_107 = arith.constant 4 : index
    %c0_108 = arith.constant 0 : index
    %c0_109 = arith.constant 0 : index
    %169 = vector.load %arg5[%c4_107, %c0_108, %c0_109] : memref<8x1x128xf32, #tpu.memory_space<vmem>>, vector<1x1x128xf32>
    %170 = vector.shape_cast %169 : vector<1x1x128xf32> to vector<1x128xf32>
    %171 = vector.extract_strided_slice %8 {offsets = [0, 512], sizes = [24, 128], strides = [1, 1]} : vector<24x1024xf32> to vector<24x128xf32>
    %cst_110 = arith.constant dense<0.000000e+00> : vector<24x128xf32>
    %172 = tpu.matmul %171, %168, %cst_110 {dimension_numbers = #tpu.dot_dimension_numbers<[1], [0], [0], [1], [0, 0, 1, 1], [], []>} : vector<24x128xf32>, vector<128x128xf32>, vector<24x128xf32> -> vector<24x128xf32>
    %173 = vector.broadcast %170 : vector<1x128xf32> to vector<24x128xf32>
    %174 = arith.addf %172, %173 : vector<24x128xf32>
    %cst_111 = arith.constant 0.000000e+00 : f32
    %175 = vector.broadcast %cst_111 : f32 to vector<24x128xf32>
    %176 = arith.maximumf %174, %175 : vector<24x128xf32>
    %177 = vector.extract_strided_slice %15 {offsets = [0, 512], sizes = [24, 128], strides = [1, 1]} : vector<24x1024xf32> to vector<24x128xf32>
    %cst_112 = arith.constant dense<0.000000e+00> : vector<24x128xf32>
    %178 = tpu.matmul %177, %168, %cst_112 {dimension_numbers = #tpu.dot_dimension_numbers<[1], [0], [0], [1], [0, 0, 1, 1], [], []>} : vector<24x128xf32>, vector<128x128xf32>, vector<24x128xf32> -> vector<24x128xf32>
    %179 = vector.broadcast %170 : vector<1x128xf32> to vector<24x128xf32>
    %180 = arith.addf %178, %179 : vector<24x128xf32>
    %cst_113 = arith.constant 0.000000e+00 : f32
    %181 = vector.broadcast %cst_113 : f32 to vector<24x128xf32>
    %182 = arith.maximumf %180, %181 : vector<24x128xf32>
    %183 = arith.addf %176, %182 : vector<24x128xf32>
    %cst_114 = arith.constant 5.000000e-01 : f32
    %184 = vector.broadcast %cst_114 : f32 to vector<24x128xf32>
    %185 = arith.mulf %183, %184 : vector<24x128xf32>
    %c4_115 = arith.constant 4 : index
    %c0_116 = arith.constant 0 : index
    %c0_117 = arith.constant 0 : index
    %186 = vector.load %arg6[%c4_115, %c0_116, %c0_117] : memref<8x128x128xf32, #tpu.memory_space<vmem>>, vector<1x128x128xf32>
    %187 = vector.shape_cast %186 : vector<1x128x128xf32> to vector<128x128xf32>
    %cst_118 = arith.constant dense<0.000000e+00> : vector<24x128xf32>
    %188 = tpu.matmul %185, %187, %cst_118 {dimension_numbers = #tpu.dot_dimension_numbers<[1], [0], [0], [1], [0, 0, 1, 1], [], []>} : vector<24x128xf32>, vector<128x128xf32>, vector<24x128xf32> -> vector<24x128xf32>
    %c4_119 = arith.constant 4 : index
    %c0_120 = arith.constant 0 : index
    %c0_121 = arith.constant 0 : index
    %189 = vector.load %arg7[%c4_119, %c0_120, %c0_121] : memref<8x1x128xf32, #tpu.memory_space<vmem>>, vector<1x1x128xf32>
    %190 = vector.shape_cast %189 : vector<1x1x128xf32> to vector<1x128xf32>
    %191 = vector.broadcast %190 : vector<1x128xf32> to vector<24x128xf32>
    %192 = arith.addf %188, %191 : vector<24x128xf32>
    %cst_122 = arith.constant 0.000000e+00 : f32
    %193 = vector.broadcast %cst_122 : f32 to vector<24x128xf32>
    %194 = arith.maximumf %192, %193 : vector<24x128xf32>
    %c4_123 = arith.constant 4 : index
    %c0_124 = arith.constant 0 : index
    %c0_125 = arith.constant 0 : index
    %195 = vector.load %arg8[%c4_123, %c0_124, %c0_125] : memref<8x1x128xf32, #tpu.memory_space<vmem>>, vector<1x1x128xf32>
    %196 = vector.shape_cast %195 : vector<1x1x128xf32> to vector<1x128xf32>
    %197 = vector.broadcast %196 : vector<1x128xf32> to vector<24x128xf32>
    %198 = arith.mulf %194, %197 : vector<24x128xf32>
    %cst_126 = arith.constant dense<0.000000e+00> : vector<24xf32>
    %199 = vector.multi_reduction <add>, %198, %cst_126 [1] : vector<24x128xf32> to vector<24xf32>
    %200 = vector.shape_cast %199 : vector<24xf32> to vector<24x1xf32>
    %c4_127 = arith.constant 4 : index
    %201 = memref.load %arg9[%c4_127] : memref<8xf32, #tpu.memory_space<smem>>
    %202 = vector.broadcast %201 : f32 to vector<24x1xf32>
    %203 = arith.addf %200, %202 : vector<24x1xf32>
    %204 = arith.addf %166, %203 : vector<24x1xf32>
    %c5 = arith.constant 5 : index
    %c0_128 = arith.constant 0 : index
    %c0_129 = arith.constant 0 : index
    %205 = vector.load %arg4[%c5, %c0_128, %c0_129] : memref<8x128x128xf32, #tpu.memory_space<vmem>>, vector<1x128x128xf32>
    %206 = vector.shape_cast %205 : vector<1x128x128xf32> to vector<128x128xf32>
    %c5_130 = arith.constant 5 : index
    %c0_131 = arith.constant 0 : index
    %c0_132 = arith.constant 0 : index
    %207 = vector.load %arg5[%c5_130, %c0_131, %c0_132] : memref<8x1x128xf32, #tpu.memory_space<vmem>>, vector<1x1x128xf32>
    %208 = vector.shape_cast %207 : vector<1x1x128xf32> to vector<1x128xf32>
    %209 = vector.extract_strided_slice %8 {offsets = [0, 640], sizes = [24, 128], strides = [1, 1]} : vector<24x1024xf32> to vector<24x128xf32>
    %cst_133 = arith.constant dense<0.000000e+00> : vector<24x128xf32>
    %210 = tpu.matmul %209, %206, %cst_133 {dimension_numbers = #tpu.dot_dimension_numbers<[1], [0], [0], [1], [0, 0, 1, 1], [], []>} : vector<24x128xf32>, vector<128x128xf32>, vector<24x128xf32> -> vector<24x128xf32>
    %211 = vector.broadcast %208 : vector<1x128xf32> to vector<24x128xf32>
    %212 = arith.addf %210, %211 : vector<24x128xf32>
    %cst_134 = arith.constant 0.000000e+00 : f32
    %213 = vector.broadcast %cst_134 : f32 to vector<24x128xf32>
    %214 = arith.maximumf %212, %213 : vector<24x128xf32>
    %215 = vector.extract_strided_slice %15 {offsets = [0, 640], sizes = [24, 128], strides = [1, 1]} : vector<24x1024xf32> to vector<24x128xf32>
    %cst_135 = arith.constant dense<0.000000e+00> : vector<24x128xf32>
    %216 = tpu.matmul %215, %206, %cst_135 {dimension_numbers = #tpu.dot_dimension_numbers<[1], [0], [0], [1], [0, 0, 1, 1], [], []>} : vector<24x128xf32>, vector<128x128xf32>, vector<24x128xf32> -> vector<24x128xf32>
    %217 = vector.broadcast %208 : vector<1x128xf32> to vector<24x128xf32>
    %218 = arith.addf %216, %217 : vector<24x128xf32>
    %cst_136 = arith.constant 0.000000e+00 : f32
    %219 = vector.broadcast %cst_136 : f32 to vector<24x128xf32>
    %220 = arith.maximumf %218, %219 : vector<24x128xf32>
    %221 = arith.addf %214, %220 : vector<24x128xf32>
    %cst_137 = arith.constant 5.000000e-01 : f32
    %222 = vector.broadcast %cst_137 : f32 to vector<24x128xf32>
    %223 = arith.mulf %221, %222 : vector<24x128xf32>
    %c5_138 = arith.constant 5 : index
    %c0_139 = arith.constant 0 : index
    %c0_140 = arith.constant 0 : index
    %224 = vector.load %arg6[%c5_138, %c0_139, %c0_140] : memref<8x128x128xf32, #tpu.memory_space<vmem>>, vector<1x128x128xf32>
    %225 = vector.shape_cast %224 : vector<1x128x128xf32> to vector<128x128xf32>
    %cst_141 = arith.constant dense<0.000000e+00> : vector<24x128xf32>
    %226 = tpu.matmul %223, %225, %cst_141 {dimension_numbers = #tpu.dot_dimension_numbers<[1], [0], [0], [1], [0, 0, 1, 1], [], []>} : vector<24x128xf32>, vector<128x128xf32>, vector<24x128xf32> -> vector<24x128xf32>
    %c5_142 = arith.constant 5 : index
    %c0_143 = arith.constant 0 : index
    %c0_144 = arith.constant 0 : index
    %227 = vector.load %arg7[%c5_142, %c0_143, %c0_144] : memref<8x1x128xf32, #tpu.memory_space<vmem>>, vector<1x1x128xf32>
    %228 = vector.shape_cast %227 : vector<1x1x128xf32> to vector<1x128xf32>
    %229 = vector.broadcast %228 : vector<1x128xf32> to vector<24x128xf32>
    %230 = arith.addf %226, %229 : vector<24x128xf32>
    %cst_145 = arith.constant 0.000000e+00 : f32
    %231 = vector.broadcast %cst_145 : f32 to vector<24x128xf32>
    %232 = arith.maximumf %230, %231 : vector<24x128xf32>
    %c5_146 = arith.constant 5 : index
    %c0_147 = arith.constant 0 : index
    %c0_148 = arith.constant 0 : index
    %233 = vector.load %arg8[%c5_146, %c0_147, %c0_148] : memref<8x1x128xf32, #tpu.memory_space<vmem>>, vector<1x1x128xf32>
    %234 = vector.shape_cast %233 : vector<1x1x128xf32> to vector<1x128xf32>
    %235 = vector.broadcast %234 : vector<1x128xf32> to vector<24x128xf32>
    %236 = arith.mulf %232, %235 : vector<24x128xf32>
    %cst_149 = arith.constant dense<0.000000e+00> : vector<24xf32>
    %237 = vector.multi_reduction <add>, %236, %cst_149 [1] : vector<24x128xf32> to vector<24xf32>
    %238 = vector.shape_cast %237 : vector<24xf32> to vector<24x1xf32>
    %c5_150 = arith.constant 5 : index
    %239 = memref.load %arg9[%c5_150] : memref<8xf32, #tpu.memory_space<smem>>
    %240 = vector.broadcast %239 : f32 to vector<24x1xf32>
    %241 = arith.addf %238, %240 : vector<24x1xf32>
    %242 = arith.addf %204, %241 : vector<24x1xf32>
    %c6 = arith.constant 6 : index
    %c0_151 = arith.constant 0 : index
    %c0_152 = arith.constant 0 : index
    %243 = vector.load %arg4[%c6, %c0_151, %c0_152] : memref<8x128x128xf32, #tpu.memory_space<vmem>>, vector<1x128x128xf32>
    %244 = vector.shape_cast %243 : vector<1x128x128xf32> to vector<128x128xf32>
    %c6_153 = arith.constant 6 : index
    %c0_154 = arith.constant 0 : index
    %c0_155 = arith.constant 0 : index
    %245 = vector.load %arg5[%c6_153, %c0_154, %c0_155] : memref<8x1x128xf32, #tpu.memory_space<vmem>>, vector<1x1x128xf32>
    %246 = vector.shape_cast %245 : vector<1x1x128xf32> to vector<1x128xf32>
    %247 = vector.extract_strided_slice %8 {offsets = [0, 768], sizes = [24, 128], strides = [1, 1]} : vector<24x1024xf32> to vector<24x128xf32>
    %cst_156 = arith.constant dense<0.000000e+00> : vector<24x128xf32>
    %248 = tpu.matmul %247, %244, %cst_156 {dimension_numbers = #tpu.dot_dimension_numbers<[1], [0], [0], [1], [0, 0, 1, 1], [], []>} : vector<24x128xf32>, vector<128x128xf32>, vector<24x128xf32> -> vector<24x128xf32>
    %249 = vector.broadcast %246 : vector<1x128xf32> to vector<24x128xf32>
    %250 = arith.addf %248, %249 : vector<24x128xf32>
    %cst_157 = arith.constant 0.000000e+00 : f32
    %251 = vector.broadcast %cst_157 : f32 to vector<24x128xf32>
    %252 = arith.maximumf %250, %251 : vector<24x128xf32>
    %253 = vector.extract_strided_slice %15 {offsets = [0, 768], sizes = [24, 128], strides = [1, 1]} : vector<24x1024xf32> to vector<24x128xf32>
    %cst_158 = arith.constant dense<0.000000e+00> : vector<24x128xf32>
    %254 = tpu.matmul %253, %244, %cst_158 {dimension_numbers = #tpu.dot_dimension_numbers<[1], [0], [0], [1], [0, 0, 1, 1], [], []>} : vector<24x128xf32>, vector<128x128xf32>, vector<24x128xf32> -> vector<24x128xf32>
    %255 = vector.broadcast %246 : vector<1x128xf32> to vector<24x128xf32>
    %256 = arith.addf %254, %255 : vector<24x128xf32>
    %cst_159 = arith.constant 0.000000e+00 : f32
    %257 = vector.broadcast %cst_159 : f32 to vector<24x128xf32>
    %258 = arith.maximumf %256, %257 : vector<24x128xf32>
    %259 = arith.addf %252, %258 : vector<24x128xf32>
    %cst_160 = arith.constant 5.000000e-01 : f32
    %260 = vector.broadcast %cst_160 : f32 to vector<24x128xf32>
    %261 = arith.mulf %259, %260 : vector<24x128xf32>
    %c6_161 = arith.constant 6 : index
    %c0_162 = arith.constant 0 : index
    %c0_163 = arith.constant 0 : index
    %262 = vector.load %arg6[%c6_161, %c0_162, %c0_163] : memref<8x128x128xf32, #tpu.memory_space<vmem>>, vector<1x128x128xf32>
    %263 = vector.shape_cast %262 : vector<1x128x128xf32> to vector<128x128xf32>
    %cst_164 = arith.constant dense<0.000000e+00> : vector<24x128xf32>
    %264 = tpu.matmul %261, %263, %cst_164 {dimension_numbers = #tpu.dot_dimension_numbers<[1], [0], [0], [1], [0, 0, 1, 1], [], []>} : vector<24x128xf32>, vector<128x128xf32>, vector<24x128xf32> -> vector<24x128xf32>
    %c6_165 = arith.constant 6 : index
    %c0_166 = arith.constant 0 : index
    %c0_167 = arith.constant 0 : index
    %265 = vector.load %arg7[%c6_165, %c0_166, %c0_167] : memref<8x1x128xf32, #tpu.memory_space<vmem>>, vector<1x1x128xf32>
    %266 = vector.shape_cast %265 : vector<1x1x128xf32> to vector<1x128xf32>
    %267 = vector.broadcast %266 : vector<1x128xf32> to vector<24x128xf32>
    %268 = arith.addf %264, %267 : vector<24x128xf32>
    %cst_168 = arith.constant 0.000000e+00 : f32
    %269 = vector.broadcast %cst_168 : f32 to vector<24x128xf32>
    %270 = arith.maximumf %268, %269 : vector<24x128xf32>
    %c6_169 = arith.constant 6 : index
    %c0_170 = arith.constant 0 : index
    %c0_171 = arith.constant 0 : index
    %271 = vector.load %arg8[%c6_169, %c0_170, %c0_171] : memref<8x1x128xf32, #tpu.memory_space<vmem>>, vector<1x1x128xf32>
    %272 = vector.shape_cast %271 : vector<1x1x128xf32> to vector<1x128xf32>
    %273 = vector.broadcast %272 : vector<1x128xf32> to vector<24x128xf32>
    %274 = arith.mulf %270, %273 : vector<24x128xf32>
    %cst_172 = arith.constant dense<0.000000e+00> : vector<24xf32>
    %275 = vector.multi_reduction <add>, %274, %cst_172 [1] : vector<24x128xf32> to vector<24xf32>
    %276 = vector.shape_cast %275 : vector<24xf32> to vector<24x1xf32>
    %c6_173 = arith.constant 6 : index
    %277 = memref.load %arg9[%c6_173] : memref<8xf32, #tpu.memory_space<smem>>
    %278 = vector.broadcast %277 : f32 to vector<24x1xf32>
    %279 = arith.addf %276, %278 : vector<24x1xf32>
    %280 = arith.addf %242, %279 : vector<24x1xf32>
    %c7 = arith.constant 7 : index
    %c0_174 = arith.constant 0 : index
    %c0_175 = arith.constant 0 : index
    %281 = vector.load %arg4[%c7, %c0_174, %c0_175] : memref<8x128x128xf32, #tpu.memory_space<vmem>>, vector<1x128x128xf32>
    %282 = vector.shape_cast %281 : vector<1x128x128xf32> to vector<128x128xf32>
    %c7_176 = arith.constant 7 : index
    %c0_177 = arith.constant 0 : index
    %c0_178 = arith.constant 0 : index
    %283 = vector.load %arg5[%c7_176, %c0_177, %c0_178] : memref<8x1x128xf32, #tpu.memory_space<vmem>>, vector<1x1x128xf32>
    %284 = vector.shape_cast %283 : vector<1x1x128xf32> to vector<1x128xf32>
    %285 = vector.extract_strided_slice %8 {offsets = [0, 896], sizes = [24, 128], strides = [1, 1]} : vector<24x1024xf32> to vector<24x128xf32>
    %cst_179 = arith.constant dense<0.000000e+00> : vector<24x128xf32>
    %286 = tpu.matmul %285, %282, %cst_179 {dimension_numbers = #tpu.dot_dimension_numbers<[1], [0], [0], [1], [0, 0, 1, 1], [], []>} : vector<24x128xf32>, vector<128x128xf32>, vector<24x128xf32> -> vector<24x128xf32>
    %287 = vector.broadcast %284 : vector<1x128xf32> to vector<24x128xf32>
    %288 = arith.addf %286, %287 : vector<24x128xf32>
    %cst_180 = arith.constant 0.000000e+00 : f32
    %289 = vector.broadcast %cst_180 : f32 to vector<24x128xf32>
    %290 = arith.maximumf %288, %289 : vector<24x128xf32>
    %291 = vector.extract_strided_slice %15 {offsets = [0, 896], sizes = [24, 128], strides = [1, 1]} : vector<24x1024xf32> to vector<24x128xf32>
    %cst_181 = arith.constant dense<0.000000e+00> : vector<24x128xf32>
    %292 = tpu.matmul %291, %282, %cst_181 {dimension_numbers = #tpu.dot_dimension_numbers<[1], [0], [0], [1], [0, 0, 1, 1], [], []>} : vector<24x128xf32>, vector<128x128xf32>, vector<24x128xf32> -> vector<24x128xf32>
    %293 = vector.broadcast %284 : vector<1x128xf32> to vector<24x128xf32>
    %294 = arith.addf %292, %293 : vector<24x128xf32>
    %cst_182 = arith.constant 0.000000e+00 : f32
    %295 = vector.broadcast %cst_182 : f32 to vector<24x128xf32>
    %296 = arith.maximumf %294, %295 : vector<24x128xf32>
    %297 = arith.addf %290, %296 : vector<24x128xf32>
    %cst_183 = arith.constant 5.000000e-01 : f32
    %298 = vector.broadcast %cst_183 : f32 to vector<24x128xf32>
    %299 = arith.mulf %297, %298 : vector<24x128xf32>
    %c7_184 = arith.constant 7 : index
    %c0_185 = arith.constant 0 : index
    %c0_186 = arith.constant 0 : index
    %300 = vector.load %arg6[%c7_184, %c0_185, %c0_186] : memref<8x128x128xf32, #tpu.memory_space<vmem>>, vector<1x128x128xf32>
    %301 = vector.shape_cast %300 : vector<1x128x128xf32> to vector<128x128xf32>
    %cst_187 = arith.constant dense<0.000000e+00> : vector<24x128xf32>
    %302 = tpu.matmul %299, %301, %cst_187 {dimension_numbers = #tpu.dot_dimension_numbers<[1], [0], [0], [1], [0, 0, 1, 1], [], []>} : vector<24x128xf32>, vector<128x128xf32>, vector<24x128xf32> -> vector<24x128xf32>
    %c7_188 = arith.constant 7 : index
    %c0_189 = arith.constant 0 : index
    %c0_190 = arith.constant 0 : index
    %303 = vector.load %arg7[%c7_188, %c0_189, %c0_190] : memref<8x1x128xf32, #tpu.memory_space<vmem>>, vector<1x1x128xf32>
    %304 = vector.shape_cast %303 : vector<1x1x128xf32> to vector<1x128xf32>
    %305 = vector.broadcast %304 : vector<1x128xf32> to vector<24x128xf32>
    %306 = arith.addf %302, %305 : vector<24x128xf32>
    %cst_191 = arith.constant 0.000000e+00 : f32
    %307 = vector.broadcast %cst_191 : f32 to vector<24x128xf32>
    %308 = arith.maximumf %306, %307 : vector<24x128xf32>
    %c7_192 = arith.constant 7 : index
    %c0_193 = arith.constant 0 : index
    %c0_194 = arith.constant 0 : index
    %309 = vector.load %arg8[%c7_192, %c0_193, %c0_194] : memref<8x1x128xf32, #tpu.memory_space<vmem>>, vector<1x1x128xf32>
    %310 = vector.shape_cast %309 : vector<1x1x128xf32> to vector<1x128xf32>
    %311 = vector.broadcast %310 : vector<1x128xf32> to vector<24x128xf32>
    %312 = arith.mulf %308, %311 : vector<24x128xf32>
    %cst_195 = arith.constant dense<0.000000e+00> : vector<24xf32>
    %313 = vector.multi_reduction <add>, %312, %cst_195 [1] : vector<24x128xf32> to vector<24xf32>
    %314 = vector.shape_cast %313 : vector<24xf32> to vector<24x1xf32>
    %c7_196 = arith.constant 7 : index
    %315 = memref.load %arg9[%c7_196] : memref<8xf32, #tpu.memory_space<smem>>
    %316 = vector.broadcast %315 : f32 to vector<24x1xf32>
    %317 = arith.addf %314, %316 : vector<24x1xf32>
    %318 = arith.addf %280, %317 : vector<24x1xf32>
    %cst_197 = arith.constant 1.250000e-01 : f32
    %319 = vector.broadcast %cst_197 : f32 to vector<24x1xf32>
    %320 = arith.mulf %318, %319 : vector<24x1xf32>
    %c0_198 = arith.constant 0 : index
    %c0_199 = arith.constant 0 : index
    %321 = vector.load %arg10[%c0_198, %c0_199] : memref<24x1xf32, #tpu.memory_space<vmem>>, vector<24x1xf32>
    tpu.vector_store %arg10[%c0_198, %c0_199], %320 {strides = array<i32>} : memref<24x1xf32, #tpu.memory_space<vmem>>, vector<24x1xf32>,
    return
  }
  func.func @transform_0(%arg0: i32) -> (i32, i32, i32) {
    %c0_i32 = arith.constant 0 : i32
    %c0_i32_0 = arith.constant 0 : i32
    %c0_i32_1 = arith.constant 0 : i32
    return %c0_i32, %arg0, %c0_i32_0 : i32, i32, i32
  }
  func.func @transform_1(%arg0: i32) -> (i32, i32) {
    %c0_i32 = arith.constant 0 : i32
    %c0_i32_0 = arith.constant 0 : i32
    %c0_i32_1 = arith.constant 0 : i32
    return %c0_i32, %c0_i32_0 : i32, i32
  }
  func.func @transform_2(%arg0: i32) -> (i32, i32) {
    %c0_i32 = arith.constant 0 : i32
    %c0_i32_0 = arith.constant 0 : i32
    %c0_i32_1 = arith.constant 0 : i32
    return %c0_i32, %c0_i32_0 : i32, i32
  }
  func.func @transform_3(%arg0: i32) -> (i32, i32, i32) {
    %c0_i32 = arith.constant 0 : i32
    %c0_i32_0 = arith.constant 0 : i32
    %c0_i32_1 = arith.constant 0 : i32
    %c0_i32_2 = arith.constant 0 : i32
    return %c0_i32, %c0_i32_0, %c0_i32_1 : i32, i32, i32
  }
  func.func @transform_4(%arg0: i32) -> (i32, i32, i32) {
    %c0_i32 = arith.constant 0 : i32
    %c0_i32_0 = arith.constant 0 : i32
    %c0_i32_1 = arith.constant 0 : i32
    %c0_i32_2 = arith.constant 0 : i32
    return %c0_i32, %c0_i32_0, %c0_i32_1 : i32, i32, i32
  }
  func.func @transform_5(%arg0: i32) -> (i32, i32, i32) {
    %c0_i32 = arith.constant 0 : i32
    %c0_i32_0 = arith.constant 0 : i32
    %c0_i32_1 = arith.constant 0 : i32
    %c0_i32_2 = arith.constant 0 : i32
    return %c0_i32, %c0_i32_0, %c0_i32_1 : i32, i32, i32
  }
  func.func @transform_6(%arg0: i32) -> (i32, i32, i32) {
    %c0_i32 = arith.constant 0 : i32
    %c0_i32_0 = arith.constant 0 : i32
    %c0_i32_1 = arith.constant 0 : i32
    %c0_i32_2 = arith.constant 0 : i32
    return %c0_i32, %c0_i32_0, %c0_i32_1 : i32, i32, i32
  }
  func.func @transform_7(%arg0: i32) -> (i32, i32, i32) {
    %c0_i32 = arith.constant 0 : i32
    %c0_i32_0 = arith.constant 0 : i32
    %c0_i32_1 = arith.constant 0 : i32
    %c0_i32_2 = arith.constant 0 : i32
    return %c0_i32, %c0_i32_0, %c0_i32_1 : i32, i32, i32
  }
  func.func @transform_8(%arg0: i32) -> i32 {
    %c0_i32 = arith.constant 0 : i32
    %c0_i32_0 = arith.constant 0 : i32
    return %c0_i32 : i32
  }
  func.func @transform_9(%arg0: i32) -> (i32, i32) {
    %c0_i32 = arith.constant 0 : i32
    %c0_i32_0 = arith.constant 0 : i32
    return %arg0, %c0_i32 : i32, i32
  }
}

</mosaic_0001>

<bundles_post_ra>
// kernel: tpu_custom_call.1
= control target key start
LH: loop header
LB: loop body
LE: loop exit
PB: predicated region body
PF: predicated region fallthrough
CT: control target
= control target key end

     0   :  { %14 = vsyncpa [#allocation3], 0  ;;  %s3425_s0 = inlined_call_operand.hbm [shape: f32[2,24,128], index: 0, kind: input, shape index: {}]   ;;  %s3426_s1 = inlined_call_operand.hbm [shape: f32[128,1024], index: 1, kind: input, shape index: {}]   ;;  %s3427_s2 = inlined_call_operand.hbm [shape: f32[1,1024], index: 2, kind: input, shape index: {}]   ;;  %s3428_s3 = inlined_call_operand.hbm [shape: f32[8,128,128], index: 3, kind: input, shape index: {}]   ;;  %s3429_s4 = inlined_call_operand.hbm [shape: f32[8,1,128], index: 4, kind: input, shape index: {}]   ;;  %s3430_s5 = inlined_call_operand.hbm [shape: f32[8,128,128], index: 5, kind: input, shape index: {}]   ;;  %s3431_s6 = inlined_call_operand.hbm [shape: f32[8,1,128], index: 6, kind: input, shape index: {}]   ;;  %s3432_s7 = inlined_call_operand.hbm [shape: f32[8,1,128], index: 7, kind: input, shape index: {}]   ;;  %s3433_s8 = inlined_call_operand.vmem [shape: f32[8], index: 8, kind: input, shape index: {}]   ;;  %s3434_s9 = inlined_call_operand.vmem [shape: f32[24,1], index: 9, kind: output, shape index: {}]  }
   0x1   :  { %15 = vsyncpa [#allocation6], 0 }
   0x2   :  { %16 = vsyncpa [#allocation9], 0 }
   0x3   :  { %17 = vsyncpa [#allocation12], 0 }
   0x4   :  { %18 = vsyncpa [#allocation15], 0  ;;  %s37_s11 = sshll.u32 %s3426_s1, 4  ;;  %s38_s11 = int_to_ptr.hbm [resolvable:$true] %s37_s11 }
   0x5   :  { %19 = vsyncpa [#allocation4], 0  ;;  %s2329_s12 = smov [#allocation5]   ;;  %s2330_s14 = smov 1024  }
   0x6   :  { %s39_s13 = sshll.u32 %s2329_s12, 4  ;;  %s2331_s15 = smov 64   ;;  %s40_s13 = int_to_ptr.vmem [resolvable:$true] %s39_s13 }
   0x7   :  { %45 = dma.hbm_to_vmem [thread:$0]  %s38_s11, 16384, %s40_s13, [#allocation6], %s2330_s14, %s2330_s14, %s2331_s15  }
   0x8   :  { %s61_s18 = sshll.u32 %s3428_s3, 4  ;;  %s2332_s19 = smov [#allocation8]   ;;  %s62_s18 = int_to_ptr.hbm [resolvable:$true] %s61_s18 }
   0x9   :  { %s63_s20 = sshll.u32 %s2332_s19, 4  ;;  %s87_s23 = sshll.u32 %s3430_s5, 4  ;;  %s64_s20 = int_to_ptr.vmem [resolvable:$true] %s63_s20  ;;  %s88_s23 = int_to_ptr.hbm [resolvable:$true] %s87_s23 }
   0xa   :  { %s2333_s1 = smov 128   ;;  %s2334_s24 = smov 8  }
   0xb   :  { %69 = dma.hbm_to_vmem [thread:$0]  %s62_s18, 16384, %s64_s20, [#allocation9], %s2333_s1, %s2333_s1, %s2334_s24  }
   0xc   :  { %s24_s27 = sshll.u32 %s3425_s0, 4  ;;  %s2335_s28 = smov [#allocation11]   ;;  %s25_s27 = int_to_ptr.hbm [resolvable:$true] %s24_s27 }
   0xd   :  { %s89_s29 = sshll.u32 %s2335_s28, 4  ;;  %s2336_s3 = smov [#allocation2]   ;;  %s90_s29 = int_to_ptr.vmem [resolvable:$true] %s89_s29 }
   0xe   :  { %95 = dma.hbm_to_vmem [thread:$0]  %s88_s23, 16384, %s90_s29, [#allocation12], %s2333_s1, %s2333_s1, %s2334_s24  }
   0xf   :  { %s26_s30 = sshll.u32 %s2336_s3, 4  ;;  %s51_s5 = sshll.u32 %s3427_s2, 4  ;;  %s27_s30 = int_to_ptr.vmem [resolvable:$true] %s26_s30  ;;  %s52_s5 = int_to_ptr.hbm [resolvable:$true] %s51_s5 }
  0x10   :  { %32 = dma.hbm_to_vmem [thread:$0]  %s25_s27, 768, %s27_s30, [#allocation3], %s2333_s1, %s2333_s1, %s2334_s24  }
  0x11   :  { %s74_s14 = sshll.u32 %s3429_s4, 4  ;;  %s2337_s15 = smov [#allocation7]   ;;  %s75_s14 = int_to_ptr.hbm [resolvable:$true] %s74_s14 }
  0x12   :  { %s53_s0 = sshll.u32 %s2337_s15, 4  ;;  %s2338_s16 = smov [#allocation10]   ;;  %s54_s0 = int_to_ptr.vmem [resolvable:$true] %s53_s0 }
  0x13   :  { %56 = dma.hbm_to_vmem [thread:$0]  %s52_s5, 128, %s54_s0, [#allocation6]  }
  0x14   :  { %s76_s17 = sshll.u32 %s2338_s16, 4  ;;  %s2339_s18 = smov 16   ;;  %s77_s17 = int_to_ptr.vmem [resolvable:$true] %s76_s17 }
  0x15   :  { %s2340_s19 = smov 1   ;;  %s100_s21 = sshll.u32 %s3431_s6, 4  ;;  %s101_s21 = int_to_ptr.hbm [resolvable:$true] %s100_s21 }
  0x16   :  { %82 = dma.hbm_to_vmem [thread:$0]  %s75_s14, 128, %s77_s17, [#allocation9], %s2339_s18, %s2339_s18, %s2340_s19  }
  0x17   :  { %s2341_s22 = smov [#allocation13]   ;;  %s113_s24 = sshll.u32 %s3432_s7, 4  ;;  %s114_s24 = int_to_ptr.hbm [resolvable:$true] %s113_s24 }
  0x18   :  { %s102_s23 = sshll.u32 %s2341_s22, 4  ;;  %s2342_s25 = smov [#allocation14]   ;;  %s103_s23 = int_to_ptr.vmem [resolvable:$true] %s102_s23 }
  0x19   :  { %108 = dma.hbm_to_vmem [thread:$0]  %s101_s21, 128, %s103_s23, [#allocation12], %s2339_s18, %s2339_s18, %s2340_s19  }
  0x1a   :  { %s115_s26 = sshll.u32 %s2342_s25, 4  ;;  %s127_s29 = sshll.u32 %s3433_s8, 4  ;;  %s116_s26 = int_to_ptr.vmem [resolvable:$true] %s115_s26  ;;  %s128_s29 = int_to_ptr.vmem [resolvable:$true] %s127_s29 }
  0x1b   :  { %121 = dma.hbm_to_vmem [thread:$0]  %s114_s24, 128, %s116_s26, [#allocation15], %s2339_s18, %s2339_s18, %s2340_s19  }
  0x1c   :  { %s2343_s6 = smov [#allocation16]  }
  0x1d   :  { %130 = dma.vmem_to_smem %s128_s29, 16, %s2343_s6, [#allocation4]  }
  0x1e   :  { %2317 = dma.done.wait [#allocation3], 768  }
  0x1f   :  { %2318 = vsyncadd [#allocation3], 4294966528 }
  0x20   :  { %2319 = dma.done.wait [#allocation6], 16512  }
  0x21   :  { %2320 = vsyncadd [#allocation6], 4294950784 }
  0x22   :  { %2321 = dma.done.wait [#allocation9], 16512  }
  0x23   :  { %2322 = vsyncadd [#allocation9], 4294950784 }
  0x24   :  { %2323 = dma.done.wait [#allocation12], 16512  }
  0x25   :  { %2324 = vsyncadd [#allocation12], 4294950784 }
  0x26   :  { %2325 = dma.done.wait [#allocation15], 128  }
  0x27   :  { %2326 = vsyncadd [#allocation15], 4294967168 }
  0x28   :  { %2327 = dma.done.wait [#allocation4], 16  }
  0x29   :  { %2328 = vsyncadd [#allocation4], 4294967280 }
  0x2a   :  { %167 = sfence }
  0x2b   :  { %v2421_v0 = vld [vmem:[#allocation5 + $0x3c0] sm:$0xff]  ;;  %v2423_v1 = vld [vmem:[#allocation5 + $0x3c8] sm:$0xff]  ;;  %v2483_v22 = vld [vmem:[#allocation5 + $0x3d8] sm:$0xff]  ;;  %s931_s7 = sld [smem:[#allocation16]]  ;;  %vm2052_vm0 = vcmask 7168  }
  0x2c   :  { %v2425_v2 = vld [vmem:[#allocation5 + $0x380] sm:$0xff]  ;;  %317 = vmatpush.msra.mxu0 %v2421_v0  ;;  %343 = vmatpush.msra.mxu1 %v2423_v1  ;;  %v2429_v3 = vld [vmem:[#allocation5 + $0x388] sm:$0xff]  ;;  %v2494_v26 = vld [vmem:[#allocation5 + $0x398] sm:$0xff]  ;;  %s2066_s8 = sld [smem:[#allocation16 + $0x1]] }
  0x2d   :  { %v2431_v4 = vld [vmem:[#allocation5 + $0x340] sm:$0xff]  ;;  %v2433_v5 = vld [vmem:[#allocation5 + $0x348] sm:$0xff]  ;;  %395 = vmatpush.msra.mxu3 %v2483_v22  ;;  %v2503_v29 = vld [vmem:[#allocation5 + $0x358] sm:$0xff]  ;;  %s2067_s3 = sld [smem:[#allocation16 + $0x2]] }
  0x2e   :  { %318 = vmatpush.msra.mxu0 %v2425_v2  ;;  %344 = vmatpush.msra.mxu1 %v2429_v3  ;;  %v2437_v6 = vld [vmem:[#allocation5 + $0x300] sm:$0xff]  ;;  %v2439_v7 = vld [vmem:[#allocation5 + $0x308] sm:$0xff]  ;;  %v2512_v32 = vld [vmem:[#allocation5 + $0x318] sm:$0xff]  ;;  %s2068_s30 = sld [smem:[#allocation16 + $0x3]] }
  0x2f   :  { %v2443_v8 = vld [vmem:[#allocation5 + $0x2c0] sm:$0xff]  ;;  %v2445_v9 = vld [vmem:[#allocation5 + $0x2c8] sm:$0xff]  ;;  %396 = vmatpush.msra.mxu3 %v2494_v26  ;;  %v2521_v35 = vld [vmem:[#allocation5 + $0x2d8] sm:$0xff]  ;;  %s2069_s10 = sld [smem:[#allocation16 + $0x4]] }
  0x30   :  { %319 = vmatpush.msra.mxu0 %v2431_v4  ;;  %345 = vmatpush.msra.mxu1 %v2433_v5  ;;  %v2449_v10 = vld [vmem:[#allocation5 + $0x280] sm:$0xff]  ;;  %v2451_v11 = vld [vmem:[#allocation5 + $0x288] sm:$0xff]  ;;  %v2532_v39 = vld [vmem:[#allocation5 + $0x298] sm:$0xff]  ;;  %s2070_s11 = sld [smem:[#allocation16 + $0x5]] }
  0x31   :  { %v2455_v12 = vld [vmem:[#allocation5 + $0x240] sm:$0xff]  ;;  %v2457_v13 = vld [vmem:[#allocation5 + $0x248] sm:$0xff]  ;;  %397 = vmatpush.msra.mxu3 %v2503_v29  ;;  %3458 = vst [vmem:[#allocation23_spill] sm:$0xff] %v2532_v39  ;;  %v2540_v42 = vld [vmem:[#allocation2] sm:$0xff]  ;;  %s2071_s5 = sld [smem:[#allocation16 + $0x6]] }
  0x32   :  { %320 = vmatpush.msra.mxu0 %v2437_v6  ;;  %346 = vmatpush.msra.mxu1 %v2439_v7  ;;  %v2461_v14 = vld [vmem:[#allocation5 + $0x200] sm:$0xff]  ;;  %v2463_v15 = vld [vmem:[#allocation5 + $0x208] sm:$0xff]  ;;  %v2545_v43 = vld [vmem:[#allocation5 + $0x258] sm:$0xff]  ;;  %s2072_s12 = sld [smem:[#allocation16 + $0x7]] }
  0x33   :  { %v2467_v16 = vld [vmem:[#allocation5 + $0x1c0] sm:$0xff]  ;;  %v2469_v17 = vld [vmem:[#allocation5 + $0x1c8] sm:$0xff]  ;;  %398 = vmatpush.msra.mxu3 %v2512_v32  ;;  %3459 = vst [vmem:[#allocation24_spill] sm:$0xff] %v2545_v43  ;;  %v2557_v46 = vld [vmem:[#allocation5 + $0x218] sm:$0xff] }
  0x34   :  { %321 = vmatpush.msra.mxu0 %v2443_v8  ;;  %347 = vmatpush.msra.mxu1 %v2445_v9  ;;  %v2473_v18 = vld [vmem:[#allocation5 + $0x180] sm:$0xff]  ;;  %v2475_v19 = vld [vmem:[#allocation5 + $0x188] sm:$0xff]  ;;  %3460 = vst [vmem:[#allocation25_spill] sm:$0xff] %v2557_v46  ;;  %v2566_v49 = vld [vmem:[#allocation5 + $0x1d8] sm:$0xff] }
  0x35   :  { %v2479_v20 = vld [vmem:[#allocation5 + $0x140] sm:$0xff]  ;;  %v2481_v21 = vld [vmem:[#allocation5 + $0x148] sm:$0xff]  ;;  %399 = vmatpush.msra.mxu3 %v2521_v35  ;;  %3461 = vst [vmem:[#allocation26_spill] sm:$0xff] %v2566_v49  ;;  %v2575_v52 = vld [vmem:[#allocation2 + $0x8] sm:$0xff] }
  0x36   :  { %322 = vmatpush.msra.mxu0 %v2449_v10  ;;  %348 = vmatpush.msra.mxu1 %v2451_v11  ;;  %v2487_v23 = vld [vmem:[#allocation5 + $0x100] sm:$0xff]  ;;  %v2489_v24 = vld [vmem:[#allocation5 + $0x108] sm:$0xff]  ;;  %v2584_v55 = vld [vmem:[#allocation5 + $0x198] sm:$0xff] }
  0x37   :  { %v2491_v25 = vld [vmem:[#allocation5 + $0xc0] sm:$0xff]  ;;  %v2498_v27 = vld [vmem:[#allocation5 + $0xc8] sm:$0xff]  ;;  %400 = vmatpush.msra.mxu3 %v2532_v39  ;;  %3462 = vst [vmem:[#allocation27_spill] sm:$0xff] %v2584_v55  ;;  %v2594_v58 = vld [vmem:[#allocation5 + $0x158] sm:$0xff] }
  0x38   :  { %323 = vmatpush.msra.mxu0 %v2455_v12  ;;  %349 = vmatpush.msra.mxu1 %v2457_v13  ;;  %v2500_v28 = vld [vmem:[#allocation5 + $0x80] sm:$0xff]  ;;  %v2507_v30 = vld [vmem:[#allocation5 + $0x88] sm:$0xff]  ;;  %3464 = vst [vmem:[#allocation29_spill] sm:$0xff] %v2594_v58  ;;  %v2603_v61 = vld [vmem:[#allocation5 + $0x118] sm:$0xff] }
  0x39   :  { %v2509_v31 = vld [vmem:[#allocation5 + $0x40] sm:$0xff]  ;;  %v2516_v33 = vld [vmem:[#allocation5 + $0x48] sm:$0xff]  ;;  %401 = vmatpush.msra.mxu3 %v2545_v43  ;;  %3467 = vst [vmem:[#allocation32_spill] sm:$0xff] %v2603_v61 }
  0x3a   :  { %324 = vmatpush.msra.mxu0 %v2461_v14  ;;  %350 = vmatpush.msra.mxu1 %v2463_v15  ;;  %v2518_v34 = vld [vmem:[#allocation5] sm:$0xff]  ;;  %v2525_v36 = vld [vmem:[#allocation5 + $0x8] sm:$0xff] }
  0x3b   :  { %v2527_v37 = vld [vmem:[#allocation5 + $0x3e0] sm:$0xff]  ;;  %v2529_v38 = vld [vmem:[#allocation5 + $0x3e8] sm:$0xff]  ;;  %402 = vmatpush.msra.mxu3 %v2557_v46 }
  0x3c   :  { %325 = vmatpush.msra.mxu0 %v2467_v16  ;;  %351 = vmatpush.msra.mxu1 %v2469_v17  ;;  %v2536_v40 = vld [vmem:[#allocation5 + $0x3a0] sm:$0xff]  ;;  %v2538_v41 = vld [vmem:[#allocation5 + $0x3a8] sm:$0xff] }
  0x3d   :  { %v2549_v44 = vld [vmem:[#allocation5 + $0x360] sm:$0xff]  ;;  %v2551_v45 = vld [vmem:[#allocation5 + $0x368] sm:$0xff]  ;;  %403 = vmatpush.msra.mxu3 %v2566_v49 }
  0x3e   :  { %326 = vmatpush.msra.mxu0 %v2473_v18  ;;  %352 = vmatpush.msra.mxu1 %v2475_v19  ;;  %v2559_v47 = vld [vmem:[#allocation5 + $0x320] sm:$0xff]  ;;  %v2561_v48 = vld [vmem:[#allocation5 + $0x328] sm:$0xff] }
  0x3f   :  { %v2568_v50 = vld [vmem:[#allocation5 + $0x2e0] sm:$0xff]  ;;  %v2570_v51 = vld [vmem:[#allocation5 + $0x2e8] sm:$0xff]  ;;  %404 = vmatpush.msra.mxu3 %v2584_v55 }
  0x40   :  { %327 = vmatpush.msra.mxu0 %v2479_v20  ;;  %353 = vmatpush.msra.mxu1 %v2481_v21  ;;  %v2577_v53 = vld [vmem:[#allocation5 + $0x2a0] sm:$0xff]  ;;  %v2579_v54 = vld [vmem:[#allocation5 + $0x2a8] sm:$0xff] }
  0x41   :  { %v2586_v56 = vld [vmem:[#allocation5 + $0x260] sm:$0xff]  ;;  %v2588_v57 = vld [vmem:[#allocation5 + $0x268] sm:$0xff]  ;;  %405 = vmatpush.msra.mxu3 %v2594_v58 }
  0x42   :  { %328 = vmatpush.msra.mxu0 %v2487_v23  ;;  %354 = vmatpush.msra.mxu1 %v2489_v24  ;;  %3463 = vst [vmem:[#allocation28_spill] sm:$0xff] %v2588_v57  ;;  %v2596_v59 = vld [vmem:[#allocation5 + $0x220] sm:$0xff]  ;;  %v2598_v60 = vld [vmem:[#allocation5 + $0x228] sm:$0xff] }
  0x43   :  { %3465 = vst [vmem:[#allocation30_spill] sm:$0xff] %v2596_v59  ;;  %v2605_v62 = vld [vmem:[#allocation5 + $0x1e0] sm:$0xff]  ;;  %v2607_v63 = vld [vmem:[#allocation5 + $0x1e8] sm:$0xff]  ;;  %406 = vmatpush.msra.mxu3 %v2603_v61 }
  0x44   :  { %329 = vmatpush.msra.mxu0 %v2491_v25  ;;  %355 = vmatpush.msra.mxu1 %v2498_v27  ;;  %3466 = vst [vmem:[#allocation31_spill] sm:$0xff] %v2598_v60  ;;  %v2612_v49 = vld [vmem:[#allocation2 + $0x10] sm:$0xff]  ;;  %v2616_v55 = vld [vmem:[#allocation5 + $0x1a8] sm:$0xff] }
  0x45   :  { %3468 = vst [vmem:[#allocation33_spill] sm:$0xff] %v2605_v62  ;;  %v2614_v46 = vld [vmem:[#allocation5 + $0x1a0] sm:$0xff]  ;;  %v2625_v58 = vld [vmem:[#allocation5 + $0x168] sm:$0xff] }
  0x46   :  { %330 = vmatpush.msra.mxu0 %v2500_v28  ;;  %356 = vmatpush.msra.mxu1 %v2507_v30  ;;  %3469 = vst [vmem:[#allocation34_spill] sm:$0xff] %v2607_v63  ;;  %v2623_v43 = vld [vmem:[#allocation5 + $0x160] sm:$0xff]  ;;  %v2644_v39 = vld [vmem:[#allocation5 + $0xe8] sm:$0xff] }
  0x47   :  { %3470 = vst [vmem:[#allocation35_spill] sm:$0xff] %v2614_v46  ;;  %v2633_v61 = vld [vmem:[#allocation5 + $0x120] sm:$0xff] }
  0x48   :  { %331 = vmatpush.msra.mxu0 %v2509_v31  ;;  %357 = vmatpush.msra.mxu1 %v2516_v33  ;;  %3471 = vst [vmem:[#allocation36_spill] sm:$0xff] %v2616_v55 }
  0x49   :  { %3473 = vst [vmem:[#allocation38_spill] sm:$0xff] %v2623_v43 }
  0x4a   :  { %332 = vmatpush.msra.mxu0 %v2518_v34  ;;  %358 = vmatpush.msra.mxu1 %v2525_v36  ;;  %3474 = vst [vmem:[#allocation39_spill] sm:$0xff] %v2625_v58 }
  0x4b   :  { %333 = vmatmul.f32.vlgmr.msra.gmra.mxu0 %v2540_v42  ;;  %359 = vmatmul.f32.vlgmr.msra.gmra.mxu1 %v2540_v42  ;;  %3476 = vst [vmem:[#allocation41_spill] sm:$0xff] %v2633_v61 }
  0x4c   :  { %421 = vmatpush.msrb.mxu0 %v2527_v37  ;;  %447 = vmatpush.msrb.mxu1 %v2529_v38 }
  0x4e   :  { %422 = vmatpush.msrb.mxu0 %v2536_v40  ;;  %448 = vmatpush.msrb.mxu1 %v2538_v41 }
  0x50   :  { %423 = vmatpush.msrb.mxu0 %v2549_v44  ;;  %449 = vmatpush.msrb.mxu1 %v2551_v45 }
  0x52   :  { %424 = vmatpush.msrb.mxu0 %v2559_v47  ;;  %450 = vmatpush.msrb.mxu1 %v2561_v48 }
  0x53   :  { %336 = vmatmul.f32.gmra.mxu0 %v2575_v52  ;;  %362 = vmatmul.f32.gmra.mxu1 %v2575_v52 }
  0x54   :  { %425 = vmatpush.msrb.mxu0 %v2568_v50  ;;  %451 = vmatpush.msrb.mxu1 %v2570_v51 }
  0x56   :  { %426 = vmatpush.msrb.mxu0 %v2577_v53  ;;  %452 = vmatpush.msrb.mxu1 %v2579_v54 }
  0x58   :  { %427 = vmatpush.msrb.mxu0 %v2586_v56  ;;  %453 = vmatpush.msrb.mxu1 %v2588_v57  ;;  %v2621_v57 = vld [vmem:[#allocation5 + $0xd8] sm:$0xff] }
  0x59   :  { %3472 = vst [vmem:[#allocation37_spill] sm:$0xff] %v2621_v57  ;;  %407 = vmatpush.msra.mxu3 %v2621_v57  ;;  %v2653_v57 = vld [vmem:[#allocation5 + $0xa8] sm:$0xff] }
  0x5a   :  { %428 = vmatpush.msrb.mxu0 %v2596_v59  ;;  %454 = vmatpush.msrb.mxu1 %v2598_v60  ;;  %v2631_v60 = vld [vmem:[#allocation5 + $0x98] sm:$0xff]  ;;  %v2642_v59 = vld [vmem:[#allocation5 + $0xe0] sm:$0xff]  ;;  %3479 = vst [vmem:[#allocation44_spill] sm:$0xff] %v2653_v57 }
  0x5b   :  { %339 = vmatmul.f32.gmra.mxu0 %v2612_v49  ;;  %365 = vmatmul.f32.gmra.mxu1 %v2612_v49  ;;  %3475 = vst [vmem:[#allocation40_spill] sm:$0xff] %v2631_v60 }
  0x5c   :  { %429 = vmatpush.msrb.mxu0 %v2605_v62  ;;  %455 = vmatpush.msrb.mxu1 %v2607_v63  ;;  %v2635_v62 = vld [vmem:[#allocation5 + $0x128] sm:$0xff]  ;;  %v2640_v63 = vld [vmem:[#allocation5 + $0x58] sm:$0xff] }
  0x5d   :  { %3477 = vst [vmem:[#allocation42_spill] sm:$0xff] %v2635_v62  ;;  %408 = vmatpush.msra.mxu3 %v2631_v60  ;;  %v2662_v60 = vld [vmem:[#allocation5 + $0x68] sm:$0xff] }
  0x5e   :  { %430 = vmatpush.msrb.mxu0 %v2614_v46  ;;  %456 = vmatpush.msrb.mxu1 %v2616_v55  ;;  %3478 = vst [vmem:[#allocation43_spill] sm:$0xff] %v2640_v63  ;;  %v2649_v55 = vld [vmem:[#allocation5 + $0x18] sm:$0xff]  ;;  %v2651_v46 = vld [vmem:[#allocation5 + $0xa0] sm:$0xff] }
  0x5f   :  { %409 = vmatpush.msra.mxu3 %v2640_v63  ;;  %3480 = vst [vmem:[#allocation45_spill] sm:$0xff] %v2662_v60  ;;  %v2671_v63 = vld [vmem:[#allocation5 + $0x28] sm:$0xff] }
  0x60   :  { %431 = vmatpush.msrb.mxu0 %v2623_v43  ;;  %457 = vmatpush.msrb.mxu1 %v2625_v58  ;;  %v2658_v58 = vld [vmem:[#allocation5 + $0x3f8] sm:$0xff]  ;;  %v2660_v43 = vld [vmem:[#allocation5 + $0x60] sm:$0xff] }
  0x61   :  { %410 = vmatpush.msra.mxu3 %v2649_v55 }
  0x62   :  { %432 = vmatpush.msrb.mxu0 %v2633_v61  ;;  %458 = vmatpush.msrb.mxu1 %v2635_v62  ;;  %v2667_v62 = vld [vmem:[#allocation5 + $0x3b8] sm:$0xff]  ;;  %v2669_v61 = vld [vmem:[#allocation5 + $0x20] sm:$0xff] }
  0x63   :  { %499 = vmatpush.msrb.mxu3 %v2658_v58 }
  0x64   :  { %433 = vmatpush.msrb.mxu0 %v2642_v59  ;;  %459 = vmatpush.msrb.mxu1 %v2644_v39 }
  0x65   :  { %500 = vmatpush.msrb.mxu3 %v2667_v62 }
  0x66   :  { %434 = vmatpush.msrb.mxu0 %v2651_v46  ;;  %460 = vmatpush.msrb.mxu1 %v2653_v57  ;;  %v2681_v57 = vld [vmem:[#allocation5 + $0x378] sm:$0xff] }
  0x67   :  { %501 = vmatpush.msrb.mxu3 %v2681_v57 }
  0x68   :  { %435 = vmatpush.msrb.mxu0 %v2660_v43  ;;  %461 = vmatpush.msrb.mxu1 %v2662_v60  ;;  %v2687_v60 = vld [vmem:[#allocation5 + $0x338] sm:$0xff] }
  0x69   :  { %502 = vmatpush.msrb.mxu3 %v2687_v60 }
  0x6a   :  { %436 = vmatpush.msrb.mxu0 %v2669_v61  ;;  %462 = vmatpush.msrb.mxu1 %v2671_v63 }
  0x6b   :  { %437 = vmatmul.f32.vlgmr.msrb.gmra.mxu0 %v2540_v42  ;;  %463 = vmatmul.f32.vlgmr.msrb.gmra.mxu1 %v2540_v42 }
  0x6c   :  { %553 = vmatpush.msra.mxu0 %v2421_v0  ;;  %579 = vmatpush.msra.mxu1 %v2423_v1  ;;  %v2692_v0 = vld [vmem:[#allocation5 + $0x2f8] sm:$0xff] }
  0x6d   :  { %503 = vmatpush.msrb.mxu3 %v2692_v0  ;;  %v2700_v1 = vld [vmem:[#allocation5 + $0x2b8] sm:$0xff] }
  0x6e   :  { %554 = vmatpush.msra.mxu0 %v2425_v2  ;;  %580 = vmatpush.msra.mxu1 %v2429_v3  ;;  %v2706_v2 = vld [vmem:[#allocation5 + $0x278] sm:$0xff] }
  0x6f   :  { %504 = vmatpush.msrb.mxu3 %v2700_v1  ;;  %v2711_v3 = vld [vmem:[#allocation5 + $0x238] sm:$0xff] }
  0x70   :  { %555 = vmatpush.msra.mxu0 %v2431_v4  ;;  %581 = vmatpush.msra.mxu1 %v2433_v5  ;;  %v2719_v4 = vld [vmem:[#allocation5 + $0x1f8] sm:$0xff] }
  0x71   :  { %505 = vmatpush.msrb.mxu3 %v2706_v2  ;;  %v2725_v5 = vld [vmem:[#allocation5 + $0x1b8] sm:$0xff] }
  0x72   :  { %556 = vmatpush.msra.mxu0 %v2437_v6  ;;  %582 = vmatpush.msra.mxu1 %v2439_v7  ;;  %v2730_v6 = vld [vmem:[#allocation5 + $0x178] sm:$0xff] }
  0x73   :  { %440 = vmatmul.f32.gmra.mxu0 %v2575_v52  ;;  %466 = vmatmul.f32.gmra.mxu1 %v2575_v52  ;;  %v2735_v7 = vld [vmem:[#allocation5 + $0x138] sm:$0xff] }
  0x74   :  { %557 = vmatpush.msra.mxu0 %v2443_v8  ;;  %583 = vmatpush.msra.mxu1 %v2445_v9  ;;  %v2740_v8 = vld [vmem:[#allocation5 + $0xf8] sm:$0xff] }
  0x75   :  { %506 = vmatpush.msrb.mxu3 %v2711_v3  ;;  %v2745_v9 = vld [vmem:[#allocation5 + $0xb8] sm:$0xff] }
  0x76   :  { %558 = vmatpush.msra.mxu0 %v2449_v10  ;;  %584 = vmatpush.msra.mxu1 %v2451_v11  ;;  %v2750_v10 = vld [vmem:[#allocation2 + $0x18] sm:$0xff]  ;;  %v2755_v11 = vld [vmem:[#allocation5 + $0x78] sm:$0xff] }
  0x77   :  { %507 = vmatpush.msrb.mxu3 %v2719_v4 }
  0x78   :  { %559 = vmatpush.msra.mxu0 %v2455_v12  ;;  %585 = vmatpush.msra.mxu1 %v2457_v13  ;;  %v2760_v12 = vld [vmem:[#allocation5 + $0x38] sm:$0xff]  ;;  %v2768_v13 = vld [vmem:[#allocation2 + $0x20] sm:$0xff] }
  0x79   :  { %508 = vmatpush.msrb.mxu3 %v2725_v5 }
  0x7a   :  { %560 = vmatpush.msra.mxu0 %v2461_v14  ;;  %586 = vmatpush.msra.mxu1 %v2463_v15  ;;  %v2784_v14 = vld [vmem:[#allocation2 + $0x28] sm:$0xff]  ;;  %v2788_v15 = vld [vmem:[#allocation5 + $0x3d0] sm:$0xff] }
  0x7b   :  { %443 = vmatmul.f32.gmra.mxu0 %v2612_v49  ;;  %469 = vmatmul.f32.gmra.mxu1 %v2612_v49 }
  0x7c   :  { %561 = vmatpush.msra.mxu0 %v2467_v16  ;;  %587 = vmatpush.msra.mxu1 %v2469_v17  ;;  %v3481_v16 = vld [vmem:[#allocation23_spill] sm:$0xff]  ;;  %v3482_v17 = vld [vmem:[#allocation30_spill] sm:$0xff] }
  0x7d   :  { %509 = vmatpush.msrb.mxu3 %v2730_v6  ;;  %369 = vmatpush.msra.mxu2 %v2788_v15 }
  0x7e   :  { %562 = vmatpush.msra.mxu0 %v2473_v18  ;;  %588 = vmatpush.msra.mxu1 %v2475_v19  ;;  %v2794_v18 = vld [vmem:[#allocation5 + $0x390] sm:$0xff]  ;;  %v3483_v19 = vld [vmem:[#allocation24_spill] sm:$0xff] }
  0x7f   :  { %510 = vmatpush.msrb.mxu3 %v2735_v7  ;;  %370 = vmatpush.msra.mxu2 %v2794_v18 }
  0x80   :  { %563 = vmatpush.msra.mxu0 %v2479_v20  ;;  %589 = vmatpush.msra.mxu1 %v2481_v21  ;;  %v3484_v20 = vld [vmem:[#allocation33_spill] sm:$0xff] }
  0x81   :  { %511 = vmatpush.msrb.mxu3 %v2740_v8  ;;  %v2800_v21 = vld [vmem:[#allocation5 + $0x350] sm:$0xff] }
  0x82   :  { %564 = vmatpush.msra.mxu0 %v2487_v23  ;;  %590 = vmatpush.msra.mxu1 %v2489_v24  ;;  %v3486_v23 = vld [vmem:[#allocation35_spill] sm:$0xff]  ;;  %v2806_v24 = vld [vmem:[#allocation5 + $0x310] sm:$0xff] }
  0x83   :  { %512 = vmatpush.msrb.mxu3 %v2745_v9  ;;  %371 = vmatpush.msra.mxu2 %v2800_v21 }
  0x84   :  { %565 = vmatpush.msra.mxu0 %v2491_v25  ;;  %591 = vmatpush.msra.mxu1 %v2498_v27  ;;  %v3487_v25 = vld [vmem:[#allocation28_spill] sm:$0xff]  ;;  %v3489_v27 = vld [vmem:[#allocation38_spill] sm:$0xff] }
  0x85   :  { %411 = vmatmul.f32.vlgmr.msra.gmra.mxu3 %v2540_v42  ;;  %372 = vmatpush.msra.mxu2 %v2806_v24 }
  0x86   :  { %566 = vmatpush.msra.mxu0 %v2500_v28  ;;  %592 = vmatpush.msra.mxu1 %v2507_v30  ;;  %v2812_v28 = vld [vmem:[#allocation5 + $0x2d0] sm:$0xff]  ;;  %v3491_v30 = vld [vmem:[#allocation27_spill] sm:$0xff] }
  0x87   :  { %513 = vmatpush.msrb.mxu3 %v2755_v11  ;;  %373 = vmatpush.msra.mxu2 %v2812_v28 }
  0x88   :  { %567 = vmatpush.msra.mxu0 %v2509_v31  ;;  %593 = vmatpush.msra.mxu1 %v2516_v33  ;;  %v3492_v31 = vld [vmem:[#allocation41_spill] sm:$0xff]  ;;  %v3493_v33 = vld [vmem:[#allocation34_spill] sm:$0xff] }
  0x89   :  { %514 = vmatpush.msrb.mxu3 %v2760_v12 }
  0x8a   :  { %568 = vmatpush.msra.mxu0 %v2518_v34  ;;  %594 = vmatpush.msra.mxu1 %v2525_v36  ;;  %v3494_v34 = vld [vmem:[#allocation29_spill] sm:$0xff]  ;;  %v3495_v36 = vld [vmem:[#allocation32_spill] sm:$0xff] }
  0x8b   :  { %569 = vmatmul.f32.vlgmr.msra.gmra.mxu0 %v2750_v10  ;;  %595 = vmatmul.f32.vlgmr.msra.gmra.mxu1 %v2750_v10 }
  0x8c   :  { %657 = vmatpush.msrb.mxu0 %v2527_v37  ;;  %683 = vmatpush.msrb.mxu1 %v2529_v38  ;;  %v2830_v37 = vld [vmem:[#allocation5 + $0x210] sm:$0xff]  ;;  %v3496_v38 = vld [vmem:[#allocation36_spill] sm:$0xff] }
  0x8d   :  { %631 = vmatpush.msra.mxu3 %v2483_v22  ;;  %v3485_v22 = vld [vmem:[#allocation25_spill] sm:$0xff] }
  0x8e   :  { %658 = vmatpush.msrb.mxu0 %v2536_v40  ;;  %684 = vmatpush.msrb.mxu1 %v2538_v41  ;;  %v3497_v40 = vld [vmem:[#allocation37_spill] sm:$0xff]  ;;  %v800_v41 = vld [vmem:[#allocation8 + $0x78] sm:$0xff] }
  0x8f   :  { %632 = vmatpush.msra.mxu3 %v2494_v26  ;;  %v3488_v26 = vld [vmem:[#allocation26_spill] sm:$0xff] }
  0x90   :  { %659 = vmatpush.msrb.mxu0 %v2549_v44  ;;  %685 = vmatpush.msrb.mxu1 %v2551_v45  ;;  %v2836_v44 = vld [vmem:[#allocation5 + $0x1d0] sm:$0xff]  ;;  %v3498_v45 = vld [vmem:[#allocation39_spill] sm:$0xff] }
  0x91   :  { %633 = vmatpush.msra.mxu3 %v2503_v29  ;;  %v3490_v29 = vld [vmem:[#allocation31_spill] sm:$0xff] }
  0x92   :  { %660 = vmatpush.msrb.mxu0 %v2559_v47  ;;  %414 = vmatmul.f32.gmra.mxu3 %v2575_v52  ;;  %v3499_v47 = vld [vmem:[#allocation40_spill] sm:$0xff] }
  0x93   :  { %572 = vmatmul.f32.gmra.mxu0 %v2768_v13  ;;  %598 = vmatmul.f32.gmra.mxu1 %v2768_v13 }
  0x94   :  { %661 = vmatpush.msrb.mxu0 %v2568_v50  ;;  %686 = vmatpush.msrb.mxu1 %v2561_v48  ;;  %v3500_v48 = vld [vmem:[#allocation43_spill] sm:$0xff]  ;;  %v2846_v50 = vld [vmem:[#allocation8 + $0x68] sm:$0xff] }
  0x95   :  { %634 = vmatpush.msra.mxu3 %v2512_v32  ;;  %v2818_v32 = vld [vmem:[#allocation5 + $0x290] sm:$0xff] }
  0x96   :  { %662 = vmatpush.msrb.mxu0 %v2577_v53  ;;  %687 = vmatpush.msrb.mxu1 %v2570_v51  ;;  %v2854_v51 = vld [vmem:[#allocation5 + $0x190] sm:$0xff]  ;;  %v3501_v53 = vld [vmem:[#allocation42_spill] sm:$0xff] }
  0x97   :  { %635 = vmatpush.msra.mxu3 %v2521_v35  ;;  %v2824_v35 = vld [vmem:[#allocation5 + $0x250] sm:$0xff]  ;;  %374 = vmatpush.msra.mxu2 %v2818_v32 }
  0x98   :  { %663 = vmatpush.msrb.mxu0 %v2586_v56  ;;  %688 = vmatpush.msrb.mxu1 %v2579_v54  ;;  %v2859_v54 = vld [vmem:[#allocation5 + $0x150] sm:$0xff]  ;;  %v2861_v56 = vld [vmem:[#allocation8 + $0x58] sm:$0xff] }
  0x99   :  { %636 = vmatpush.msra.mxu3 %v3481_v16  ;;  %375 = vmatpush.msra.mxu2 %v2824_v35  ;;  %v2877_v16 = vld [vmem:[#allocation8 + $0x48] sm:$0xff] }
  0x9a   :  { %664 = vmatpush.msrb.mxu0 %v3482_v17  ;;  %417 = vmatmul.f32.gmra.mxu3 %v2612_v49  ;;  %v3503_v17 = vld [vmem:[#allocation45_spill] sm:$0xff] }
  0x9b   :  { %575 = vmatmul.f32.gmra.mxu0 %v2784_v14  ;;  %601 = vmatmul.f32.gmra.mxu1 %v2784_v14 }
  0x9c   :  { %637 = vmatpush.msra.mxu3 %v3483_v19  ;;  %665 = vmatpush.msrb.mxu0 %v3484_v20  ;;  %v2894_v19 = vld [vmem:[#allocation8 + $0x38] sm:$0xff]  ;;  %v2904_v20 = vld [vmem:[#allocation5 + $0x10] sm:$0xff] }
  0x9d   :  { %689 = vmatpush.msrb.mxu1 %v3487_v25  ;;  %376 = vmatpush.msra.mxu2 %v2830_v37  ;;  %v2939_v25 = vld [vmem:[#allocation8 + $0x8] sm:$0xff] }
  0x9e   :  { %638 = vmatpush.msra.mxu3 %v3485_v22  ;;  %666 = vmatpush.msrb.mxu0 %v3486_v23  ;;  %v2910_v22 = vld [vmem:[#allocation5 + $0x3f0] sm:$0xff] }
  0x9f   :  { %690 = vmatpush.msrb.mxu1 %v3490_v29  ;;  %377 = vmatpush.msra.mxu2 %v2836_v44  ;;  %v2925_v23 = vld [vmem:[#allocation5 + $0x370] sm:$0xff] }
  0xa0   :  { %639 = vmatpush.msra.mxu3 %v3488_v26  ;;  %667 = vmatpush.msrb.mxu0 %v3489_v27  ;;  %v2943_v26 = vld [vmem:[#allocation7] sm:$0xff]  ;;  %v2949_v27 = vld [vmem:[#allocation8] sm:$0xff]  ;;  %v2959_v29 = vld [vmem:[#allocation5 + $0x2b0] sm:$0xff] }
  0xa1   :  { %691 = vmatpush.msrb.mxu1 %v3493_v33  ;;  %378 = vmatpush.msra.mxu2 %v2854_v51 }
  0xa2   :  { %640 = vmatpush.msra.mxu3 %v3491_v30  ;;  %668 = vmatpush.msrb.mxu0 %v3492_v31  ;;  %v951_v31 = vld [vmem:[#allocation8 + $0xf0] sm:$0xff] }
  0xa3   :  { %515 = vmatmul.f32.vlgmr.msrb.gmra.mxu3 %v2540_v42  ;;  %692 = vmatpush.msrb.mxu1 %v3496_v38  ;;  %v2976_v38 = vld [vmem:[#allocation5 + $0x230] sm:$0xff] }
  0xa4   :  { %641 = vmatpush.msra.mxu3 %v3494_v34  ;;  %669 = vmatpush.msrb.mxu0 %v2642_v59  ;;  %v2869_v59 = vld [vmem:[#allocation8 + $0x50] sm:$0xff]  ;;  %v2971_v34 = vld [vmem:[#allocation5 + $0x270] sm:$0xff] }
  0xa5   :  { %693 = vmatpush.msrb.mxu1 %v3498_v45  ;;  %379 = vmatpush.msra.mxu2 %v2859_v54  ;;  %v948_v45 = vld [vmem:[#allocation8 + $0xd8] sm:$0xff] }
  0xa6   :  { %642 = vmatpush.msra.mxu3 %v3495_v36  ;;  %670 = vmatpush.msrb.mxu0 %v2651_v46  ;;  %v2842_v46 = vld [vmem:[#allocation8 + $0x70] sm:$0xff]  ;;  %v950_v36 = vld [vmem:[#allocation8 + $0xe8] sm:$0xff] }
  0xa7   :  { %694 = vmatpush.msrb.mxu1 %v3501_v53  ;;  %v946_v53 = vld [vmem:[#allocation8 + $0xc8] sm:$0xff] }
  0xa8   :  { %643 = vmatpush.msra.mxu3 %v3497_v40  ;;  %671 = vmatpush.msrb.mxu0 %v2660_v43  ;;  %v2852_v43 = vld [vmem:[#allocation8 + $0x60] sm:$0xff]  ;;  %v2978_v40 = vld [vmem:[#allocation5 + $0x1f0] sm:$0xff] }
  0xa9   :  { %695 = vmatpush.msrb.mxu1 %v2644_v39  ;;  %v2883_v39 = vld [vmem:[#allocation5 + $0x90] sm:$0xff] }
  0xaa   :  { %644 = vmatpush.msra.mxu3 %v3499_v47  ;;  %672 = vmatpush.msrb.mxu0 %v2669_v61  ;;  %v2875_v61 = vld [vmem:[#allocation5 + $0xd0] sm:$0xff] }
  0xab   :  { %673 = vmatmul.f32.vlgmr.msrb.gmra.mxu0 %v2750_v10  ;;  %518 = vmatmul.f32.gmra.mxu3 %v2575_v52  ;;  %v2985_v47 = vld [vmem:[#allocation5 + $0x170] sm:$0xff] }
  0xac   :  { %805 = vmatpush.msra.mxu0 %v800_v41  ;;  %645 = vmatpush.msra.mxu3 %v3500_v48  ;;  %v947_v48 = vld [vmem:[#allocation8 + $0xd0] sm:$0xff] }
  0xae   :  { %806 = vmatpush.msra.mxu0 %v2842_v46  ;;  %646 = vmatpush.msra.mxu3 %v2649_v55  ;;  %v2867_v55 = vld [vmem:[#allocation5 + $0x110] sm:$0xff] }
  0xaf   :  { %380 = vmatpush.msra.mxu2 %v2867_v55 }
  0xb0   :  { %735 = vmatpush.msrb.mxu3 %v2658_v58  ;;  %807 = vmatpush.msra.mxu0 %v2846_v50  ;;  %v3502_v58 = vld [vmem:[#allocation44_spill] sm:$0xff] }
  0xb1   :  { %696 = vmatpush.msrb.mxu1 %v3502_v58  ;;  %381 = vmatpush.msra.mxu2 %v2875_v61  ;;  %v945_v58 = vld [vmem:[#allocation8 + $0xc0] sm:$0xff] }
  0xb2   :  { %736 = vmatpush.msrb.mxu3 %v2667_v62  ;;  %808 = vmatpush.msra.mxu0 %v2852_v43  ;;  %v2886_v62 = vld [vmem:[#allocation8 + $0x40] sm:$0xff] }
  0xb3   :  { %676 = vmatmul.f32.gmra.mxu0 %v2768_v13  ;;  %521 = vmatmul.f32.gmra.mxu3 %v2612_v49 }
  0xb4   :  { %737 = vmatpush.msrb.mxu3 %v2681_v57  ;;  %809 = vmatpush.msra.mxu0 %v2861_v56  ;;  %v2890_v57 = vld [vmem:[#allocation5 + $0x50] sm:$0xff] }
  0xb5   :  { %697 = vmatpush.msrb.mxu1 %v3503_v17  ;;  %382 = vmatpush.msra.mxu2 %v2883_v39  ;;  %v944_v17 = vld [vmem:[#allocation8 + $0xb8] sm:$0xff] }
  0xb6   :  { %810 = vmatpush.msra.mxu0 %v2869_v59  ;;  %738 = vmatpush.msrb.mxu3 %v2687_v60  ;;  %v2900_v60 = vld [vmem:[#allocation8 + $0x30] sm:$0xff] }
  0xb7   :  { %698 = vmatpush.msrb.mxu1 %v2671_v63  ;;  %383 = vmatpush.msra.mxu2 %v2890_v57  ;;  %v2915_v63 = vld [vmem:[#allocation8 + $0x20] sm:$0xff] }
  0xb8   :  { %811 = vmatpush.msra.mxu0 %v2877_v16  ;;  %739 = vmatpush.msrb.mxu3 %v2692_v0  ;;  %v2907_v0 = vld [vmem:[#allocation8 + $0x28] sm:$0xff] }
  0xb9   :  { %834 = vmatpush.msra.mxu1 %v800_v41  ;;  %384 = vmatpush.msra.mxu2 %v2904_v20  ;;  %v2981_v41 = vld [vmem:[#allocation5 + $0x1b0] sm:$0xff] }
  0xba   :  { %812 = vmatpush.msra.mxu0 %v2886_v62  ;;  %740 = vmatpush.msrb.mxu3 %v2700_v1  ;;  %v2918_v1 = vld [vmem:[#allocation5 + $0x3b0] sm:$0xff] }
  0xbb   :  { %679 = vmatmul.f32.gmra.mxu0 %v2784_v14  ;;  %647 = vmatmul.f32.vlgmr.msra.gmra.mxu3 %v2750_v10 }
  0xbc   :  { %813 = vmatpush.msra.mxu0 %v2894_v19  ;;  %741 = vmatpush.msrb.mxu3 %v2706_v2  ;;  %v2923_v2 = vld [vmem:[#allocation8 + $0x18] sm:$0xff] }
  0xbd   :  { %473 = vmatpush.msrb.mxu2 %v2910_v22  ;;  %835 = vmatpush.msra.mxu1 %v2842_v46 }
  0xbe   :  { %814 = vmatpush.msra.mxu0 %v2900_v60  ;;  %742 = vmatpush.msrb.mxu3 %v2711_v3  ;;  %v2931_v3 = vld [vmem:[#allocation8 + $0x10] sm:$0xff] }
  0xbf   :  { %474 = vmatpush.msrb.mxu2 %v2918_v1  ;;  %836 = vmatpush.msra.mxu1 %v2846_v50 }
  0xc0   :  { %815 = vmatpush.msra.mxu0 %v2907_v0  ;;  %743 = vmatpush.msrb.mxu3 %v2719_v4  ;;  %v2936_v4 = vld [vmem:[#allocation5 + $0x330] sm:$0xff] }
  0xc1   :  { %475 = vmatpush.msrb.mxu2 %v2925_v23  ;;  %837 = vmatpush.msra.mxu1 %v2852_v43 }
  0xc2   :  { %816 = vmatpush.msra.mxu0 %v2915_v63  ;;  %744 = vmatpush.msrb.mxu3 %v2725_v5  ;;  %v2946_v5 = vld [vmem:[#allocation5 + $0x2f0] sm:$0xff] }
  0xc3   :  { %385 = vmatmul.f32.vlgmr.msra.gmra.mxu2 %v2540_v42  ;;  %650 = vmatmul.f32.gmra.mxu3 %v2768_v13 }
  0xc4   :  { %817 = vmatpush.msra.mxu0 %v2923_v2  ;;  %745 = vmatpush.msrb.mxu3 %v2730_v6  ;;  %v2956_v6 = vperm.slane %v2943_v26, 0 }
  0xc5   :  { %476 = vmatpush.msrb.mxu2 %v2936_v4  ;;  %699 = vmatmul.f32.vlgmr.msrb.gmra.mxu1 %v2750_v10 }
  0xc6   :  { %818 = vmatpush.msra.mxu0 %v2931_v3  ;;  %746 = vmatpush.msrb.mxu3 %v2735_v7  ;;  %v952_v7 = vld [vmem:[#allocation8 + $0xf8] sm:$0xff] }
  0xc7   :  { %477 = vmatpush.msrb.mxu2 %v2946_v5  ;;  %838 = vmatpush.msra.mxu1 %v2861_v56  ;;  %v2994_v56 = vld [vmem:[#allocation5 + $0x130] sm:$0xff] }
  0xc8   :  { %819 = vmatpush.msra.mxu0 %v2939_v25  ;;  %747 = vmatpush.msrb.mxu3 %v2740_v8  ;;  %v334_v30 = vpop.f32.mrf.mxu0  ;;  %v2967_v33 = vpop.f32.mrf.mxu1 }
  0xc9   :  { %478 = vmatpush.msrb.mxu2 %v2959_v29  ;;  %v335_v8 = vadd.f32 %v334_v30, %v2956_v6  ;;  %839 = vmatpush.msra.mxu1 %v2869_v59  ;;  %v2997_v59 = vld [vmem:[#allocation5 + $0xf0] sm:$0xff] }
  0xca   :  { %820 = vmatpush.msra.mxu0 %v2949_v27  ;;  %748 = vmatpush.msrb.mxu3 %v2745_v9  ;;  %v3007_v30 = vld [vmem:[#allocation5 + $0x70] sm:$0xff] }
  0xcb   :  { %653 = vmatmul.f32.gmra.mxu3 %v2784_v14  ;;  %v525_v9 = vmax.f32 %v335_v8, 0.0  ;;  %479 = vmatpush.msrb.mxu2 %v2971_v34  ;;  %v943_v8 = vld [vmem:[#allocation8 + $0xb0] sm:$0xff] }
  0xcc   :  { %987 = vmatpush.msrb.mxu0 %v952_v7  ;;  %749 = vmatpush.msrb.mxu3 %v2755_v11  ;;  %v949_v11 = vld [vmem:[#allocation8 + $0xe0] sm:$0xff] }
  0xcd   :  { %821 = vmatmul.f32.vlgmr.msra.gmra.mxu0 %v525_v9  ;;  %480 = vmatpush.msrb.mxu2 %v2976_v38 }
  0xce   :  { %988 = vmatpush.msrb.mxu0 %v951_v31  ;;  %750 = vmatpush.msrb.mxu3 %v2760_v12 }
  0xcf   :  { %481 = vmatpush.msrb.mxu2 %v2978_v40  ;;  %840 = vmatpush.msra.mxu1 %v2877_v16  ;;  %v3001_v16 = vld [vmem:[#allocation5 + $0xb0] sm:$0xff] }
  0xd0   :  { %958 = vmatpush.msra.mxu3 %v952_v7  ;;  %989 = vmatpush.msrb.mxu0 %v950_v36  ;;  %v337_v12 = vpop.f32.mrf.mxu0  ;;  %v2990_v50 = vpop.f32.mrf.mxu1 }
  0xd1   :  { %v338_v46 = vadd.f32 %v337_v12, %v2956_v6  ;;  %482 = vmatpush.msrb.mxu2 %v2981_v41  ;;  %841 = vmatpush.msra.mxu1 %v2886_v62  ;;  %v939_v12 = vld [vmem:[#allocation8 + $0x90] sm:$0xff] }
  0xd2   :  { %959 = vmatpush.msra.mxu3 %v951_v31  ;;  %990 = vmatpush.msrb.mxu0 %v949_v11 }
  0xd3   :  { %751 = vmatmul.f32.vlgmr.msrb.gmra.mxu3 %v2750_v10  ;;  %v533_v43 = vmax.f32 %v338_v46, 0.0  ;;  %483 = vmatpush.msrb.mxu2 %v2985_v47  ;;  %v938_v46 = vld [vmem:[#allocation8 + $0x88] sm:$0xff] }
  0xd4   :  { %960 = vmatpush.msra.mxu3 %v950_v36  ;;  %991 = vmatpush.msrb.mxu0 %v948_v45  ;;  %v942_v36 = vld [vmem:[#allocation8 + $0xa8] sm:$0xff] }
  0xd5   :  { %824 = vmatmul.f32.gmra.mxu0 %v533_v43  ;;  %388 = vmatmul.f32.gmra.mxu2 %v2575_v52  ;;  %v1037_v43 = vld [vmem:[#allocation11 + $0xf0] sm:$0xff] }
  0xd6   :  { %961 = vmatpush.msra.mxu3 %v949_v11  ;;  %992 = vmatpush.msrb.mxu0 %v947_v48  ;;  %v3016_v11 = vperm.slane %v2943_v26, 1 }
  0xd7   :  { %484 = vmatpush.msrb.mxu2 %v2994_v56  ;;  %702 = vmatmul.f32.gmra.mxu1 %v2768_v13 }
  0xd8   :  { %962 = vmatpush.msra.mxu3 %v948_v45  ;;  %993 = vmatpush.msrb.mxu0 %v946_v53  ;;  %v340_v62 = vpop.f32.mrf.mxu0  ;;  %v366_v9 = vpop.f32.mrf.mxu1  ;;  %v941_v45 = vld [vmem:[#allocation8 + $0xa0] sm:$0xff] }
  0xd9   :  { %485 = vmatpush.msrb.mxu2 %v2997_v59  ;;  %v341_v7 = vadd.f32 %v340_v62, %v2956_v6  ;;  %842 = vmatpush.msra.mxu1 %v2894_v19  ;;  %v3012_v19 = vld [vmem:[#allocation5 + $0x30] sm:$0xff] }
  0xda   :  { %963 = vmatpush.msra.mxu3 %v947_v48  ;;  %994 = vmatpush.msrb.mxu0 %v945_v58 }
  0xdb   :  { %486 = vmatpush.msrb.mxu2 %v3001_v16  ;;  %754 = vmatmul.f32.gmra.mxu3 %v2768_v13  ;;  %v541_v31 = vmax.f32 %v341_v7, 0.0  ;;  %v1032_v7 = vld [vmem:[#allocation11 + $0xc8] sm:$0xff] }
  0xdc   :  { %964 = vmatpush.msra.mxu3 %v946_v53  ;;  %995 = vmatpush.msrb.mxu0 %v944_v17  ;;  %v882_v53 = vld [vmem:[#allocation11 + $0x68] sm:$0xff] }
  0xdd   :  { %843 = vmatpush.msra.mxu1 %v2900_v60  ;;  %827 = vmatmul.f32.gmra.mxu0 %v541_v31  ;;  %v940_v60 = vld [vmem:[#allocation8 + $0x98] sm:$0xff]  ;;  %v1031_v31 = vld [vmem:[#allocation11 + $0xc0] sm:$0xff] }
  0xde   :  { %965 = vmatpush.msra.mxu3 %v945_v58  ;;  %996 = vmatpush.msrb.mxu0 %v943_v8  ;;  %v879_v58 = vld [vmem:[#allocation11 + $0x50] sm:$0xff] }
  0xdf   :  { %487 = vmatpush.msrb.mxu2 %v3007_v30  ;;  %844 = vmatpush.msra.mxu1 %v2907_v0  ;;  %v361_v0 = vadd.f32 %v2967_v33, %v3016_v11  ;;  %v937_v33 = vld [vmem:[#allocation8 + $0x80] sm:$0xff] }
  0xe0   :  { %966 = vmatpush.msra.mxu3 %v944_v17  ;;  %997 = vmatpush.msrb.mxu0 %v942_v36  ;;  %v878_v17 = vld [vmem:[#allocation11 + $0x48] sm:$0xff] }
  0xe1   :  { %391 = vmatmul.f32.gmra.mxu2 %v2612_v49  ;;  %845 = vmatpush.msra.mxu1 %v2915_v63 }
  0xe2   :  { %967 = vmatpush.msra.mxu3 %v943_v8  ;;  %488 = vmatpush.msrb.mxu2 %v3012_v19  ;;  %v876_v8 = vld [vmem:[#allocation11 + $0x38] sm:$0xff] }
  0xe3   :  { %998 = vmatpush.msrb.mxu0 %v941_v45  ;;  %757 = vmatmul.f32.gmra.mxu3 %v2784_v14 }
  0xe4   :  { %968 = vmatpush.msra.mxu3 %v942_v36  ;;  %605 = vmatpush.msra.mxu2 %v2788_v15  ;;  %v526_v15 = vmax.f32 %v361_v0, 0.0  ;;  %v875_v36 = vld [vmem:[#allocation11 + $0x30] sm:$0xff] }
  0xe5   :  { %705 = vmatmul.f32.gmra.mxu1 %v2784_v14  ;;  %999 = vmatpush.msrb.mxu0 %v940_v60 }
  0xe6   :  { %969 = vmatpush.msra.mxu3 %v941_v45  ;;  %606 = vmatpush.msra.mxu2 %v2794_v18  ;;  %v364_v18 = vadd.f32 %v2990_v50, %v3016_v11  ;;  %v883_v50 = vld [vmem:[#allocation11 + $0x70] sm:$0xff]  ;;  %v1028_v45 = vld [vmem:[#allocation11 + $0xa8] sm:$0xff] }
  0xe7   :  { %846 = vmatpush.msra.mxu1 %v2923_v2  ;;  %1000 = vmatpush.msrb.mxu0 %v939_v12 }
  0xe8   :  { %970 = vmatpush.msra.mxu3 %v940_v60  ;;  %607 = vmatpush.msra.mxu2 %v2800_v21  ;;  %v3029_v63 = vpop.f32.mrf.mxu0  ;;  %v3031_v48 = vpop.f32.mrf.mxu1  ;;  %v534_v21 = vmax.f32 %v364_v18, 0.0  ;;  %v1026_v18 = vld [vmem:[#allocation11 + $0x98] sm:$0xff] }
  0xe9   :  { %847 = vmatpush.msra.mxu1 %v2931_v3  ;;  %1001 = vmatpush.msrb.mxu0 %v938_v46 }
  0xea   :  { %971 = vmatpush.msra.mxu3 %v939_v12  ;;  %608 = vmatpush.msra.mxu2 %v2806_v24  ;;  %v873_v12 = vld [vmem:[#allocation11 + $0x20] sm:$0xff] }
  0xeb   :  { %848 = vmatpush.msra.mxu1 %v2939_v25  ;;  %489 = vmatmul.f32.vlgmr.msrb.gmra.mxu2 %v2540_v42  ;;  %v367_v42 = vadd.f32 %v366_v9, %v3016_v11  ;;  %v1030_v9 = vld [vmem:[#allocation11 + $0xb8] sm:$0xff] }
  0xec   :  { %972 = vmatpush.msra.mxu3 %v938_v46  ;;  %609 = vmatpush.msra.mxu2 %v2812_v28  ;;  %v1027_v46 = vld [vmem:[#allocation11 + $0xa0] sm:$0xff] }
  0xed   :  { %849 = vmatpush.msra.mxu1 %v2949_v27  ;;  %1002 = vmatpush.msrb.mxu0 %v937_v33  ;;  %v542_v28 = vmax.f32 %v367_v42, 0.0  ;;  %v1025_v42 = vld [vmem:[#allocation11 + $0x90] sm:$0xff] }
  0xee   :  { %973 = vmatpush.msra.mxu3 %v937_v33  ;;  %610 = vmatpush.msra.mxu2 %v2818_v32  ;;  %v872_v33 = vld [vmem:[#allocation11 + $0x18] sm:$0xff] }
  0xef   :  { %974 = vmatmul.f32.vlgmr.msra.gmra.mxu3 %v526_v15 }
  0xf0   :  { %611 = vmatpush.msra.mxu2 %v2824_v35  ;;  %v3043_v24 = vpop.f32.mrf.mxu0  ;;  %v3045_v2 = vpop.f32.mrf.mxu1 }
  0xf2   :  { %612 = vmatpush.msra.mxu2 %v2830_v37 }
  0xf3   :  { %492 = vmatmul.f32.gmra.mxu2 %v2575_v52 }
  0xf4   :  { %613 = vmatpush.msra.mxu2 %v2836_v44 }
  0xf6   :  { %614 = vmatpush.msra.mxu2 %v2854_v51 }
  0xf7   :  { %977 = vmatmul.f32.gmra.mxu3 %v534_v21  ;;  %v871_v21 = vld [vmem:[#allocation11 + $0x10] sm:$0xff] }
  0xf8   :  { %615 = vmatpush.msra.mxu2 %v2859_v54  ;;  %v3055_v32 = vpop.f32.mrf.mxu0  ;;  %v3057_v35 = vpop.f32.mrf.mxu1 }
  0xf9   :  { %3504 = vst [vmem:[#allocation23_spill] sm:$0xff] %v3057_v35 }
  0xfa   :  { %616 = vmatpush.msra.mxu2 %v2867_v55 }
  0xfb   :  { %495 = vmatmul.f32.gmra.mxu2 %v2612_v49 }
  0xfc   :  { %617 = vmatpush.msra.mxu2 %v2875_v61 }
  0xfe   :  { %618 = vmatpush.msra.mxu2 %v2883_v39 }
  0xff   :  { %980 = vmatmul.f32.gmra.mxu3 %v542_v28  ;;  %v870_v28 = vld [vmem:[#allocation11 + $0x8] sm:$0xff] }
 0x100   :  { %619 = vmatpush.msra.mxu2 %v2890_v57 }
 0x102   :  { %620 = vmatpush.msra.mxu2 %v2904_v20 }
 0x103   :  { %621 = vmatmul.f32.vlgmr.msra.gmra.mxu2 %v2750_v10 }
 0x104   :  { %709 = vmatpush.msrb.mxu2 %v2910_v22 }
 0x106   :  { %710 = vmatpush.msrb.mxu2 %v2918_v1 }
 0x108   :  { %v570_v52 = vpop.f32.mrf.mxu0  ;;  %v596_v37 = vpop.f32.mrf.mxu1  ;;  %711 = vmatpush.msrb.mxu2 %v2925_v23 }
 0x109   :  { %v571_v49 = vadd.f32 %v570_v52, %v2956_v6  ;;  %v597_v44 = vadd.f32 %v596_v37, %v3016_v11  ;;  %v3071_v55 = vpop.f32.mrf.mxu3  ;;  %v1024_v52 = vld [vmem:[#allocation11 + $0x88] sm:$0xff]  ;;  %v1111_v37 = vld [vmem:[#allocation8 + $0x178] sm:$0xff] }
 0x10a   :  { %712 = vmatpush.msrb.mxu2 %v2936_v4  ;;  %1146 = vmatpush.msrb.mxu3 %v1111_v37 }
 0x10b   :  { %v761_v51 = vmax.f32 %v571_v49, 0.0  ;;  %v762_v54 = vmax.f32 %v597_v44, 0.0  ;;  %624 = vmatmul.f32.gmra.mxu2 %v2768_v13  ;;  %v869_v49 = vld [vmem:[#allocation11] sm:$0xff] }
 0x10c   :  { %713 = vmatpush.msrb.mxu2 %v2946_v5  ;;  %v1023_v44 = vld [vmem:[#allocation11 + $0x80] sm:$0xff] }
 0x10d   :  { %850 = vmatmul.f32.vlgmr.msra.gmra.mxu1 %v761_v51  ;;  %1003 = vmatmul.f32.vlgmr.msrb.gmra.mxu0 %v762_v54  ;;  %v3113_v54 = vld [vmem:[#allocation8 + $0x1f8] sm:$0xff] }
 0x10e   :  { %714 = vmatpush.msrb.mxu2 %v2959_v29 }
 0x110   :  { %v573_v61 = vpop.f32.mrf.mxu0  ;;  %v599_v39 = vpop.f32.mrf.mxu1  ;;  %715 = vmatpush.msrb.mxu2 %v2971_v34 }
 0x111   :  { %v574_v57 = vadd.f32 %v573_v61, %v2956_v6  ;;  %v600_v20 = vadd.f32 %v599_v39, %v3016_v11 }
 0x112   :  { %716 = vmatpush.msrb.mxu2 %v2976_v38 }
 0x113   :  { %v769_v22 = vmax.f32 %v574_v57, 0.0  ;;  %v770_v1 = vmax.f32 %v600_v20, 0.0  ;;  %627 = vmatmul.f32.gmra.mxu2 %v2784_v14  ;;  %v1110_v57 = vld [vmem:[#allocation8 + $0x170] sm:$0xff] }
 0x114   :  { %717 = vmatpush.msrb.mxu2 %v2978_v40  ;;  %v3120_v20 = vld [vmem:[#allocation8 + $0x1f0] sm:$0xff]  ;;  %1147 = vmatpush.msrb.mxu3 %v1110_v57 }
 0x115   :  { %853 = vmatmul.f32.gmra.mxu1 %v769_v22  ;;  %1006 = vmatmul.f32.gmra.mxu0 %v770_v1  ;;  %v3082_v5 = vpop.f32.mrf.mxu3  ;;  %v1109_v22 = vld [vmem:[#allocation8 + $0x168] sm:$0xff] }
 0x116   :  { %718 = vmatpush.msrb.mxu2 %v2981_v41  ;;  %v884_v41 = vld [vmem:[#allocation11 + $0x78] sm:$0xff]  ;;  %v3122_v1 = vld [vmem:[#allocation8 + $0x1e8] sm:$0xff]  ;;  %1148 = vmatpush.msrb.mxu3 %v1109_v22 }
 0x118   :  { %v576_v23 = vpop.f32.mrf.mxu0  ;;  %v602_v3 = vpop.f32.mrf.mxu1  ;;  %719 = vmatpush.msrb.mxu2 %v2985_v47  ;;  %v1038_v47 = vld [vmem:[#allocation11 + $0xf8] sm:$0xff] }
 0x119   :  { %v577_v4 = vadd.f32 %v576_v23, %v2956_v6  ;;  %v603_v25 = vadd.f32 %v602_v3, %v3016_v11  ;;  %1044 = vmatpush.msrb.mxu1 %v1038_v47  ;;  %v874_v11 = vld [vmem:[#allocation11 + $0x28] sm:$0xff]  ;;  %v3137_v47 = vld [vmem:[#allocation8 + $0x1d8] sm:$0xff] }
 0x11a   :  { %720 = vmatpush.msrb.mxu2 %v2994_v56  ;;  %v1036_v56 = vld [vmem:[#allocation11 + $0xe8] sm:$0xff] }
 0x11b   :  { %v777_v27 = vmax.f32 %v577_v4, 0.0  ;;  %v778_v29 = vmax.f32 %v603_v25, 0.0  ;;  %1045 = vmatpush.msrb.mxu1 %v1037_v43  ;;  %v1108_v25 = vld [vmem:[#allocation8 + $0x160] sm:$0xff] }
 0x11c   :  { %721 = vmatpush.msrb.mxu2 %v2997_v59  ;;  %v881_v59 = vld [vmem:[#allocation11 + $0x60] sm:$0xff]  ;;  %1149 = vmatpush.msrb.mxu3 %v1108_v25 }
 0x11d   :  { %856 = vmatmul.f32.gmra.mxu1 %v777_v27  ;;  %1009 = vmatmul.f32.gmra.mxu0 %v778_v29  ;;  %v3088_v34 = vpop.f32.mrf.mxu3  ;;  %v3132_v27 = vld [vmem:[#allocation8 + $0x1e0] sm:$0xff] }
 0x11e   :  { %722 = vmatpush.msrb.mxu2 %v3001_v16  ;;  %1046 = vmatpush.msrb.mxu1 %v1036_v56  ;;  %v1033_v16 = vld [vmem:[#allocation11 + $0xd0] sm:$0xff]  ;;  %v3144_v56 = vld [vmem:[#allocation8 + $0x1d0] sm:$0xff] }
 0x120   :  { %723 = vmatpush.msrb.mxu2 %v3007_v30  ;;  %v877_v30 = vld [vmem:[#allocation11 + $0x40] sm:$0xff] }
 0x122   :  { %724 = vmatpush.msrb.mxu2 %v3012_v19  ;;  %v1029_v19 = vld [vmem:[#allocation11 + $0xb0] sm:$0xff] }
 0x123   :  { %725 = vmatmul.f32.vlgmr.msrb.gmra.mxu2 %v2750_v10  ;;  %v1035_v10 = vld [vmem:[#allocation11 + $0xe0] sm:$0xff] }
 0x124   :  { %889 = vmatpush.msra.mxu2 %v884_v41  ;;  %1047 = vmatpush.msrb.mxu1 %v1035_v10  ;;  %v1107_v41 = vld [vmem:[#allocation8 + $0x158] sm:$0xff]  ;;  %v1105_v10 = vld [vmem:[#allocation8 + $0x148] sm:$0xff] }
 0x125   :  { %1150 = vmatpush.msrb.mxu3 %v1107_v41 }
 0x126   :  { %v3094_v6 = vpop.f32.mrf.mxu3  ;;  %890 = vmatpush.msra.mxu2 %v883_v50 }
 0x127   :  { %3505 = vst [vmem:[#allocation30_spill] sm:$0xff] %v3094_v6 }
 0x128   :  { %891 = vmatpush.msra.mxu2 %v882_v53  ;;  %v3105_v60 = vpop.f32.mrf.mxu0  ;;  %v1106_v53 = vld [vmem:[#allocation8 + $0x150] sm:$0xff] }
 0x129   :  { %1151 = vmatpush.msrb.mxu3 %v1106_v53 }
 0x12a   :  { %892 = vmatpush.msra.mxu2 %v881_v59 }
 0x12b   :  { %728 = vmatmul.f32.gmra.mxu2 %v2768_v13  ;;  %v880_v13 = vld [vmem:[#allocation11 + $0x58] sm:$0xff]  ;;  %1152 = vmatpush.msrb.mxu3 %v1105_v10 }
 0x12c   :  { %893 = vmatpush.msra.mxu2 %v880_v13  ;;  %v3149_v13 = vld [vmem:[#allocation8 + $0x1c8] sm:$0xff] }
 0x12e   :  { %v3098_v38 = vpop.f32.mrf.mxu3  ;;  %894 = vmatpush.msra.mxu2 %v879_v58  ;;  %v3152_v58 = vld [vmem:[#allocation8 + $0x1c0] sm:$0xff] }
 0x12f   :  { %3506 = vst [vmem:[#allocation24_spill] sm:$0xff] %v3098_v38 }
 0x130   :  { %895 = vmatpush.msra.mxu2 %v878_v17  ;;  %v3111_v51 = vpop.f32.mrf.mxu0  ;;  %v3155_v17 = vld [vmem:[#allocation8 + $0x1b8] sm:$0xff] }
 0x132   :  { %896 = vmatpush.msra.mxu2 %v877_v30  ;;  %v3158_v30 = vld [vmem:[#allocation8 + $0x1b0] sm:$0xff] }
 0x133   :  { %731 = vmatmul.f32.gmra.mxu2 %v2784_v14  ;;  %v1034_v14 = vld [vmem:[#allocation11 + $0xd8] sm:$0xff] }
 0x134   :  { %1048 = vmatpush.msrb.mxu1 %v1034_v14  ;;  %897 = vmatpush.msra.mxu2 %v876_v8  ;;  %v1104_v14 = vld [vmem:[#allocation8 + $0x140] sm:$0xff]  ;;  %v1101_v8 = vld [vmem:[#allocation8 + $0x128] sm:$0xff] }
 0x135   :  { %1153 = vmatpush.msrb.mxu3 %v1104_v14 }
 0x136   :  { %v3101_v40 = vpop.f32.mrf.mxu3  ;;  %1049 = vmatpush.msrb.mxu1 %v1033_v16  ;;  %898 = vmatpush.msra.mxu2 %v875_v36  ;;  %v1103_v16 = vld [vmem:[#allocation8 + $0x138] sm:$0xff] }
 0x137   :  { %3507 = vst [vmem:[#allocation33_spill] sm:$0xff] %v3101_v40  ;;  %1154 = vmatpush.msrb.mxu3 %v1103_v16 }
 0x138   :  { %1050 = vmatpush.msrb.mxu1 %v1032_v7  ;;  %899 = vmatpush.msra.mxu2 %v874_v11  ;;  %v3126_v23 = vpop.f32.mrf.mxu0  ;;  %v1102_v7 = vld [vmem:[#allocation8 + $0x130] sm:$0xff] }
 0x139   :  { %1155 = vmatpush.msrb.mxu3 %v1102_v7 }
 0x13a   :  { %1051 = vmatpush.msrb.mxu1 %v1031_v31  ;;  %900 = vmatpush.msra.mxu2 %v873_v12  ;;  %v3170_v12 = vld [vmem:[#allocation8 + $0x1a0] sm:$0xff] }
 0x13b   :  { %1156 = vmatpush.msrb.mxu3 %v1101_v8 }
 0x13c   :  { %1052 = vmatpush.msrb.mxu1 %v1030_v9  ;;  %901 = vmatpush.msra.mxu2 %v872_v33  ;;  %v3162_v9 = vld [vmem:[#allocation8 + $0x1a8] sm:$0xff]  ;;  %v3173_v33 = vld [vmem:[#allocation8 + $0x198] sm:$0xff] }
 0x13e   :  { %v3103_v62 = vpop.f32.mrf.mxu3  ;;  %1053 = vmatpush.msrb.mxu1 %v1029_v19  ;;  %902 = vmatpush.msra.mxu2 %v871_v21  ;;  %v3176_v21 = vld [vmem:[#allocation8 + $0x190] sm:$0xff] }
 0x140   :  { %1054 = vmatpush.msrb.mxu1 %v1028_v45  ;;  %903 = vmatpush.msra.mxu2 %v870_v28  ;;  %v1100_v45 = vld [vmem:[#allocation8 + $0x120] sm:$0xff]  ;;  %v3178_v28 = vld [vmem:[#allocation8 + $0x188] sm:$0xff] }
 0x141   :  { %1157 = vmatpush.msrb.mxu3 %v1100_v45 }
 0x142   :  { %1055 = vmatpush.msrb.mxu1 %v1027_v46  ;;  %904 = vmatpush.msra.mxu2 %v869_v49  ;;  %v3135_v29 = vpop.f32.mrf.mxu1  ;;  %v1099_v46 = vld [vmem:[#allocation8 + $0x118] sm:$0xff] }
 0x143   :  { %1158 = vmatpush.msrb.mxu3 %v1099_v46 }
 0x144   :  { %1056 = vmatpush.msrb.mxu1 %v1026_v18  ;;  %1117 = vmatpush.msrb.mxu2 %v1111_v37  ;;  %v1098_v18 = vld [vmem:[#allocation8 + $0x110] sm:$0xff] }
 0x145   :  { %1159 = vmatpush.msrb.mxu3 %v1098_v18 }
 0x146   :  { %v3107_v0 = vpop.f32.mrf.mxu3  ;;  %v3109_v15 = vpop.f32.mrf.mxu2  ;;  %1057 = vmatpush.msrb.mxu1 %v1025_v42  ;;  %1118 = vmatpush.msrb.mxu2 %v1110_v57  ;;  %v1097_v42 = vld [vmem:[#allocation8 + $0x108] sm:$0xff]  ;;  %v1096_v57 = vld [vmem:[#allocation8 + $0x100] sm:$0xff] }
 0x147   :  { %1160 = vmatpush.msrb.mxu3 %v1097_v42 }
 0x148   :  { %1058 = vmatpush.msrb.mxu1 %v1024_v52  ;;  %1119 = vmatpush.msrb.mxu2 %v1109_v22  ;;  %v3186_v22 = vld [vmem:[#allocation8 + $0x180] sm:$0xff] }
 0x149   :  { %1161 = vmatpush.msrb.mxu3 %v1096_v57 }
 0x14a   :  { %1059 = vmatpush.msrb.mxu1 %v1023_v44  ;;  %1120 = vmatpush.msrb.mxu2 %v1108_v25  ;;  %v3139_v50 = vpop.f32.mrf.mxu0  ;;  %v2088_v25 = vld [vmem:[#allocation10] ss:$0 sm:$0xff] }
 0x14c   :  { %1276 = vmatpush.msra.mxu1 %v3113_v54  ;;  %1121 = vmatpush.msrb.mxu2 %v1107_v41  ;;  %v2089_v41 = vld [vmem:[#allocation10 + $0x1] ss:$0 sm:$0xff] }
 0x14e   :  { %v3115_v61 = vpop.f32.mrf.mxu3  ;;  %1277 = vmatpush.msra.mxu1 %v3120_v20  ;;  %1122 = vmatpush.msrb.mxu2 %v1106_v53  ;;  %v3190_v53 = vperm.slane %v2943_v26, 2 }
 0x150   :  { %1278 = vmatpush.msra.mxu1 %v3122_v1  ;;  %1123 = vmatpush.msrb.mxu2 %v1105_v10 }
 0x152   :  { %1279 = vmatpush.msra.mxu1 %v3132_v27  ;;  %1124 = vmatpush.msrb.mxu2 %v1104_v14  ;;  %v825_v36 = vpop.f32.mrf.mxu0  ;;  %v823_v14 = vadd.f32 %v2088_v25, %v3139_v50 }
 0x154   :  { %1280 = vmatpush.msra.mxu1 %v3137_v47  ;;  %1125 = vmatpush.msrb.mxu2 %v1103_v16  ;;  %v3160_v31 = vpop.f32.mrf.mxu1 }
 0x156   :  { %v3128_v3 = vpop.f32.mrf.mxu3  ;;  %1281 = vmatpush.msra.mxu1 %v3144_v56  ;;  %1126 = vmatpush.msrb.mxu2 %v1102_v7 }
 0x157   :  { %3508 = vst [vmem:[#allocation25_spill] sm:$0xff] %v3128_v3 }
 0x158   :  { %v3117_v39 = vpop.f32.mrf.mxu2  ;;  %1282 = vmatpush.msra.mxu1 %v3149_v13  ;;  %1127 = vmatpush.msrb.mxu2 %v1101_v8 }
 0x15a   :  { %1283 = vmatpush.msra.mxu1 %v3152_v58  ;;  %1128 = vmatpush.msrb.mxu2 %v1100_v45  ;;  %v828_v49 = vpop.f32.mrf.mxu0 }
 0x15c   :  { %1284 = vmatpush.msra.mxu1 %v3155_v17  ;;  %1129 = vmatpush.msrb.mxu2 %v1099_v46 }
 0x15e   :  { %v3142_v43 = vpop.f32.mrf.mxu3  ;;  %1285 = vmatpush.msra.mxu1 %v3158_v30  ;;  %1130 = vmatpush.msrb.mxu2 %v1098_v18 }
 0x15f   :  { %3509 = vst [vmem:[#allocation35_spill] sm:$0xff] %v3142_v43 }
 0x160   :  { %1286 = vmatpush.msra.mxu1 %v3162_v9  ;;  %1131 = vmatpush.msrb.mxu2 %v1097_v42 }
 0x162   :  { %1287 = vmatpush.msra.mxu1 %v3170_v12  ;;  %v3181_v52 = vpop.f32.mrf.mxu1  ;;  %1132 = vmatpush.msrb.mxu2 %v1096_v57 }
 0x163   :  { %3513 = vst [vmem:[#allocation31_spill] sm:$0xff] %v3181_v52 }
 0x164   :  { %v3130_v4 = vpop.f32.mrf.mxu2  ;;  %1288 = vmatpush.msra.mxu1 %v3173_v33 }
 0x166   :  { %v3165_v19 = vpop.f32.mrf.mxu3  ;;  %1289 = vmatpush.msra.mxu1 %v3176_v21 }
 0x167   :  { %3511 = vst [vmem:[#allocation26_spill] sm:$0xff] %v3165_v19  ;;  %v831_v19 = vmax.f32 %v823_v14, 0.0  ;;  %v3197_v14 = vld [vmem:[#allocation8 + $0x270] sm:$0xff] }
 0x168   :  { %1290 = vmatpush.msra.mxu1 %v3178_v28 }
 0x16a   :  { %1291 = vmatpush.msra.mxu1 %v3186_v22 }
 0x16e   :  { %v3147_v59 = vpop.f32.mrf.mxu2 }
 0x16f   :  { %3510 = vst [vmem:[#allocation28_spill] sm:$0xff] %v3147_v59 }
 0x172   :  { %v975_v44 = vpop.f32.mrf.mxu3 }
 0x173   :  { %v976_v16 = vadd.f32 %v2089_v41, %v975_v44  ;;  %v3194_v44 = vld [vmem:[#allocation8 + $0x278] sm:$0xff] }
 0x175   :  { %v984_v38 = vmax.f32 %v976_v16, 0.0 }
 0x176   :  { %v3167_v11 = vpop.f32.mrf.mxu2 }
 0x177   :  { %3512 = vst [vmem:[#allocation38_spill] sm:$0xff] %v3167_v11 }
 0x17a   :  { %v978_v40 = vpop.f32.mrf.mxu3 }
 0x17b   :  { %v979_v11 = vadd.f32 %v2089_v41, %v978_v40 }
 0x17d   :  { %v985_v40 = vmax.f32 %v979_v11, 0.0 }
 0x17e   :  { %v3183_v37 = vpop.f32.mrf.mxu2 }
 0x17f   :  { %3514 = vst [vmem:[#allocation27_spill] sm:$0xff] %v3183_v37  ;;  %v826_v37 = vadd.f32 %v2088_v25, %v825_v36  ;;  %v3201_v36 = vld [vmem:[#allocation8 + $0x268] sm:$0xff] }
 0x186   :  { %v622_v10 = vpop.f32.mrf.mxu2 }
 0x187   :  { %v623_v7 = vadd.f32 %v622_v10, %v3190_v53 }
 0x189   :  { %v763_v42 = vmax.f32 %v623_v7, 0.0 }
 0x18a   :  { %v851_v8 = vpop.f32.mrf.mxu1  ;;  %v1004_v45 = vpop.f32.mrf.mxu0 }
 0x18b   :  { %v852_v46 = vadd.f32 %v2088_v25, %v851_v8  ;;  %v1005_v18 = vadd.f32 %v2089_v41, %v1004_v45  ;;  %1162 = vmatmul.f32.vlgmr.msrb.gmra.mxu3 %v763_v42 }
 0x18d   :  { %v860_v57 = vmax.f32 %v852_v46, 0.0  ;;  %v1013_v43 = vmax.f32 %v1005_v18, 0.0  ;;  %v3209_v46 = vld [vmem:[#allocation8 + $0x258] sm:$0xff] }
 0x18e   :  { %v625_v10 = vpop.f32.mrf.mxu2 }
 0x18f   :  { %v863_v6 = vadd.f32 %v860_v57, %v831_v19  ;;  %v1016_v3 = vadd.f32 %v1013_v43, %v984_v38  ;;  %v626_v8 = vadd.f32 %v625_v10, %v3190_v53  ;;  %v981_v19 = vpop.f32.mrf.mxu3 }
 0x190   :  { %v982_v11 = vadd.f32 %v2089_v41, %v981_v19  ;;  %v387_v19 = vadd.f32 %v3109_v15, %v3190_v53 }
 0x191   :  { %v866_v59 = vmul.f32 0.5, %v863_v6  ;;  %v1019_v50 = vmul.f32 0.5, %v1016_v3  ;;  %v771_v38 = vmax.f32 %v626_v8, 0.0  ;;  %v832_v6 = vmax.f32 %v826_v37, 0.0 }
 0x192   :  { %v854_v52 = vpop.f32.mrf.mxu1  ;;  %v1007_v35 = vpop.f32.mrf.mxu0 }
 0x193   :  { %v855_v7 = vadd.f32 %v2088_v25, %v854_v52  ;;  %v1008_v45 = vadd.f32 %v2089_v41, %v1007_v35  ;;  %905 = vmatmul.f32.vlgmr.msra.gmra.mxu2 %v866_v59  ;;  %1060 = vmatmul.f32.vlgmr.msrb.gmra.mxu1 %v1019_v50  ;;  %v3205_v52 = vld [vmem:[#allocation8 + $0x260] sm:$0xff] }
 0x194   :  { %1305 = vmatpush.msra.mxu2 %v3113_v54  ;;  %1464 = vmatpush.msrb.mxu1 %v3194_v44  ;;  %v829_v54 = vadd.f32 %v2088_v25, %v828_v49 }
 0x195   :  { %v861_v3 = vmax.f32 %v855_v7, 0.0  ;;  %v1014_v43 = vmax.f32 %v1008_v45, 0.0  ;;  %1165 = vmatmul.f32.gmra.mxu3 %v771_v38  ;;  %v986_v7 = vmax.f32 %v982_v11, 0.0 }
 0x196   :  { %1306 = vmatpush.msra.mxu2 %v3120_v20  ;;  %1465 = vmatpush.msrb.mxu1 %v3197_v14  ;;  %v628_v18 = vpop.f32.mrf.mxu2  ;;  %v833_v8 = vmax.f32 %v829_v54, 0.0  ;;  %v3249_v54 = vld [vmem:[#allocation8 + $0x218] sm:$0xff] }
 0x197   :  { %v864_v35 = vadd.f32 %v861_v3, %v832_v6  ;;  %v1017_v59 = vadd.f32 %v1014_v43, %v985_v40  ;;  %v629_v57 = vadd.f32 %v628_v18, %v3190_v53  ;;  %v3222_v6 = vld [vmem:[#allocation8 + $0x240] sm:$0xff]  ;;  %v3229_v43 = vld [vmem:[#allocation8 + $0x238] sm:$0xff] }
 0x198   :  { %1307 = vmatpush.msra.mxu2 %v3122_v1  ;;  %1466 = vmatpush.msrb.mxu1 %v3201_v36  ;;  %v3214_v1 = vld [vmem:[#allocation8 + $0x250] sm:$0xff] }
 0x199   :  { %v867_v37 = vmul.f32 0.5, %v864_v35  ;;  %v1020_v16 = vmul.f32 0.5, %v1017_v59  ;;  %v779_v49 = vmax.f32 %v629_v57, 0.0  ;;  %v3241_v35 = vld [vmem:[#allocation8 + $0x228] sm:$0xff]  ;;  %v527_v59 = vmax.f32 %v387_v19, 0.0  ;;  %v1355_v19 = vld [vmem:[#allocation11 + $0x1f0] sm:$0xff] }
 0x19a   :  { %v857_v42 = vpop.f32.mrf.mxu1  ;;  %v1010_v20 = vpop.f32.mrf.mxu0  ;;  %1308 = vmatpush.msra.mxu2 %v3132_v27  ;;  %1467 = vmatpush.msrb.mxu1 %v3205_v52  ;;  %v3218_v27 = vld [vmem:[#allocation8 + $0x248] sm:$0xff] }
 0x19b   :  { %v858_v50 = vadd.f32 %v2088_v25, %v857_v42  ;;  %v1011_v10 = vadd.f32 %v2089_v41, %v1010_v20  ;;  %908 = vmatmul.f32.gmra.mxu2 %v867_v37  ;;  %1063 = vmatmul.f32.gmra.mxu1 %v1020_v16  ;;  %v393_v37 = vadd.f32 %v3130_v4, %v3190_v53 }
 0x19c   :  { %1309 = vmatpush.msra.mxu2 %v3137_v47  ;;  %1468 = vmatpush.msrb.mxu1 %v3209_v46  ;;  %v3227_v47 = vperm.slane %v2943_v26, 3 }
 0x19d   :  { %v862_v45 = vmax.f32 %v858_v50, 0.0  ;;  %v1015_v38 = vmax.f32 %v1011_v10, 0.0  ;;  %1168 = vmatmul.f32.gmra.mxu3 %v779_v49  ;;  %v543_v16 = vmax.f32 %v393_v37, 0.0  ;;  %v1349_v37 = vld [vmem:[#allocation11 + $0x1c0] sm:$0xff] }
 0x19e   :  { %1310 = vmatpush.msra.mxu2 %v3144_v56  ;;  %1469 = vmatpush.msrb.mxu1 %v3214_v1  ;;  %v3233_v56 = vld [vmem:[#allocation8 + $0x230] sm:$0xff]  ;;  %v416_v15 = vadd.f32 %v3082_v5, %v3227_v47  ;;  %v1197_v5 = vld [vmem:[#allocation11 + $0x178] sm:$0xff]  ;;  %v649_v20 = vadd.f32 %v3103_v62, %v3227_v47  ;;  %v655_v62 = vadd.f32 %v3115_v61, %v3227_v47 }
 0x19f   :  { %v865_v25 = vadd.f32 %v862_v45, %v833_v8  ;;  %v1018_v41 = vadd.f32 %v1015_v38, %v986_v7  ;;  %1203 = vmatpush.msra.mxu0 %v1197_v5  ;;  %v1194_v8 = vld [vmem:[#allocation11 + $0x160] sm:$0xff]  ;;  %v1192_v7 = vld [vmem:[#allocation11 + $0x150] sm:$0xff]  ;;  %v1187_v61 = vld [vmem:[#allocation11 + $0x128] sm:$0xff] }
 0x1a0   :  { %1311 = vmatpush.msra.mxu2 %v3149_v13  ;;  %1470 = vmatpush.msrb.mxu1 %v3218_v27  ;;  %v413_v13 = vadd.f32 %v3071_v55, %v3227_v47  ;;  %v3253_v55 = vld [vmem:[#allocation8 + $0x210] sm:$0xff]  ;;  %v536_v11 = vmax.f32 %v416_v15, 0.0  ;;  %v764_v57 = vmax.f32 %v649_v20, 0.0  ;;  %v780_v49 = vmax.f32 %v655_v62, 0.0  ;;  %v1190_v45 = vld [vmem:[#allocation11 + $0x140] sm:$0xff]  ;;  %v1347_v20 = vld [vmem:[#allocation11 + $0x1b0] sm:$0xff] }
 0x1a1   :  { %v868_v40 = vmul.f32 0.5, %v865_v25  ;;  %v1021_v3 = vmul.f32 0.5, %v1018_v41  ;;  %v1188_v25 = vld [vmem:[#allocation11 + $0x130] sm:$0xff]  ;;  %v1186_v41 = vld [vmem:[#allocation11 + $0x120] sm:$0xff] }
 0x1a2   :  { %1312 = vmatpush.msra.mxu2 %v3152_v58  ;;  %1471 = vmatpush.msrb.mxu1 %v3222_v6  ;;  %v3245_v58 = vld [vmem:[#allocation8 + $0x220] sm:$0xff]  ;;  %v1182_v15 = vld [vmem:[#allocation11 + $0x100] sm:$0xff] }
 0x1a3   :  { %911 = vmatmul.f32.gmra.mxu2 %v868_v40  ;;  %1066 = vmatmul.f32.gmra.mxu1 %v1021_v3  ;;  %v1356_v40 = vld [vmem:[#allocation11 + $0x1f8] sm:$0xff] }
 0x1a4   :  { %1313 = vmatpush.msra.mxu2 %v3155_v17  ;;  %1472 = vmatpush.msrb.mxu1 %v3229_v43  ;;  %v528_v17 = vmax.f32 %v413_v13, 0.0  ;;  %v1184_v13 = vld [vmem:[#allocation11 + $0x110] sm:$0xff] }
 0x1a5   :  { %1362 = vmatpush.msra.mxu3 %v1356_v40 }
 0x1a6   :  { %1314 = vmatpush.msra.mxu2 %v3158_v30  ;;  %1473 = vmatpush.msrb.mxu1 %v3233_v56  ;;  %v390_v30 = vadd.f32 %v3117_v39, %v3190_v53  ;;  %v1196_v39 = vld [vmem:[#allocation11 + $0x170] sm:$0xff]  ;;  %v652_v53 = vadd.f32 %v3107_v0, %v3227_v47  ;;  %v1191_v0 = vld [vmem:[#allocation11 + $0x148] sm:$0xff]  ;;  %v3290_v38 = vpop.f32.mrf.mxu2 }
 0x1a7   :  { %1204 = vmatpush.msra.mxu0 %v1196_v39  ;;  %1363 = vmatpush.msra.mxu3 %v1355_v19  ;;  %v2090_v39 = vld [vmem:[#allocation13 + $0x1] ss:$0 sm:$0xff] }
 0x1a8   :  { %1315 = vmatpush.msra.mxu2 %v3162_v9  ;;  %1474 = vmatpush.msrb.mxu1 %v3241_v35  ;;  %v3261_v9 = vld [vmem:[#allocation8 + $0x208] sm:$0xff]  ;;  %v772_v50 = vmax.f32 %v652_v53, 0.0 }
 0x1aa   :  { %1316 = vmatpush.msra.mxu2 %v3170_v12  ;;  %1475 = vmatpush.msrb.mxu1 %v3245_v58  ;;  %v3265_v12 = vld [vmem:[#allocation8 + $0x200] sm:$0xff] }
 0x1ab   :  { %1133 = vmatmul.f32.vlgmr.msrb.gmra.mxu2 %v527_v59  ;;  %1292 = vmatmul.f32.vlgmr.msra.gmra.mxu1 %v528_v17  ;;  %v1183_v17 = vld [vmem:[#allocation11 + $0x108] sm:$0xff] }
 0x1ac   :  { %1317 = vmatpush.msra.mxu2 %v3173_v33  ;;  %1476 = vmatpush.msrb.mxu1 %v3249_v54  ;;  %v535_v33 = vmax.f32 %v390_v30, 0.0  ;;  %v1354_v59 = vld [vmem:[#allocation11 + $0x1e8] sm:$0xff]  ;;  %v1353_v30 = vld [vmem:[#allocation11 + $0x1e0] sm:$0xff] }
 0x1ad   :  { %1364 = vmatpush.msra.mxu3 %v1354_v59 }
 0x1ae   :  { %1318 = vmatpush.msra.mxu2 %v3176_v21  ;;  %1477 = vmatpush.msrb.mxu1 %v3253_v55  ;;  %v419_v21 = vadd.f32 %v3088_v34, %v3227_v47  ;;  %v1185_v47 = vld [vmem:[#allocation11 + $0x118] sm:$0xff]  ;;  %v3292_v3 = vpop.f32.mrf.mxu2 }
 0x1af   :  { %1365 = vmatpush.msra.mxu3 %v1353_v30 }
 0x1b0   :  { %1319 = vmatpush.msra.mxu2 %v3178_v28  ;;  %1478 = vmatpush.msrb.mxu1 %v3261_v9  ;;  %v1195_v28 = vld [vmem:[#allocation11 + $0x168] sm:$0xff]  ;;  %v544_v18 = vmax.f32 %v419_v21, 0.0 }
 0x1b1   :  { %1205 = vmatpush.msra.mxu0 %v1195_v28  ;;  %v1350_v21 = vld [vmem:[#allocation11 + $0x1c8] sm:$0xff] }
 0x1b2   :  { %1320 = vmatpush.msra.mxu2 %v3186_v22  ;;  %1479 = vmatpush.msrb.mxu1 %v3265_v12  ;;  %v3276_v22 = vperm.slane %v2943_v26, 4 }
 0x1b3   :  { %1136 = vmatmul.f32.gmra.mxu2 %v535_v33  ;;  %1295 = vmatmul.f32.gmra.mxu1 %v536_v11  ;;  %v1352_v33 = vld [vmem:[#allocation11 + $0x1d8] sm:$0xff]  ;;  %v1351_v11 = vld [vmem:[#allocation11 + $0x1d0] sm:$0xff] }
 0x1b4   :  { %v675_v42 = vadd.f32 %v3105_v60, %v3276_v22  ;;  %v678_v4 = vadd.f32 %v3111_v51, %v3276_v22  ;;  %v681_v60 = vadd.f32 %v3126_v23, %v3276_v22  ;;  %1206 = vmatpush.msra.mxu0 %v1194_v8  ;;  %v1193_v51 = vld [vmem:[#allocation11 + $0x158] sm:$0xff]  ;;  %1366 = vmatpush.msra.mxu3 %v1352_v33 }
 0x1b5   :  { %v1189_v23 = vld [vmem:[#allocation11 + $0x138] sm:$0xff] }
 0x1b6   :  { %v765_v34 = vmax.f32 %v675_v42, 0.0  ;;  %v773_v26 = vmax.f32 %v678_v4, 0.0  ;;  %v781_v10 = vmax.f32 %v681_v60, 0.0  ;;  %1207 = vmatpush.msra.mxu0 %v1193_v51  ;;  %v3296_v5 = vpop.f32.mrf.mxu2  ;;  %1367 = vmatpush.msra.mxu3 %v1351_v11  ;;  %v2091_v42 = vld [vmem:[#allocation13] ss:$0 sm:$0xff]  ;;  %v1581_v33 = vld [vmem:[#allocation8 + $0x2c0] sm:$0xff] }
 0x1b7   :  { %v2093_v4 = vld [vmem:[#allocation14] ss:$0 sm:$0xff] }
 0x1b8   :  { %1208 = vmatpush.msra.mxu0 %v1192_v7  ;;  %1368 = vmatpush.msra.mxu3 %v1350_v21  ;;  %v1588_v7 = vld [vmem:[#allocation8 + $0x2f8] sm:$0xff] }
 0x1b9   :  { %v1580_v21 = vld [vmem:[#allocation8 + $0x2b8] sm:$0xff] }
 0x1ba   :  { %1209 = vmatpush.msra.mxu0 %v1191_v0  ;;  %1369 = vmatpush.msra.mxu3 %v1349_v37 }
 0x1bb   :  { %1139 = vmatmul.f32.gmra.mxu2 %v543_v16  ;;  %1298 = vmatmul.f32.gmra.mxu1 %v544_v18  ;;  %v1348_v18 = vld [vmem:[#allocation11 + $0x1b8] sm:$0xff] }
 0x1bc   :  { %1210 = vmatpush.msra.mxu0 %v1190_v45  ;;  %1370 = vmatpush.msra.mxu3 %v1348_v18 }
 0x1be   :  { %1211 = vmatpush.msra.mxu0 %v1189_v23  ;;  %1371 = vmatpush.msra.mxu3 %v1347_v20 }
 0x1c0   :  { %1212 = vmatpush.msra.mxu0 %v1188_v25 }
 0x1c2   :  { %1213 = vmatpush.msra.mxu0 %v1187_v61 }
 0x1c3   :  { %1321 = vmatmul.f32.vlgmr.msra.gmra.mxu2 %v764_v57  ;;  %1480 = vmatmul.f32.vlgmr.msrb.gmra.mxu1 %v765_v34  ;;  %v1346_v34 = vld [vmem:[#allocation11 + $0x1a8] sm:$0xff] }
 0x1c4   :  { %1214 = vmatpush.msra.mxu0 %v1186_v41  ;;  %1372 = vmatpush.msra.mxu3 %v1346_v34 }
 0x1c6   :  { %1215 = vmatpush.msra.mxu0 %v1185_v47  ;;  %v1585_v47 = vld [vmem:[#allocation8 + $0x2e0] sm:$0xff] }
 0x1c8   :  { %1216 = vmatpush.msra.mxu0 %v1184_v13  ;;  %v2095_v13 = vld [vmem:[#allocation10 + $0x2] ss:$0 sm:$0xff] }
 0x1ca   :  { %1217 = vmatpush.msra.mxu0 %v1183_v17 }
 0x1cb   :  { %1324 = vmatmul.f32.gmra.mxu2 %v772_v50  ;;  %1483 = vmatmul.f32.gmra.mxu1 %v773_v26 }
 0x1cc   :  { %1218 = vmatpush.msra.mxu0 %v1182_v15  ;;  %v1582_v15 = vld [vmem:[#allocation8 + $0x2c8] sm:$0xff] }
 0x1ce   :  { %1435 = vmatpush.msrb.mxu0 %v3194_v44  ;;  %v2092_v44 = vld [vmem:[#allocation14 + $0x1] ss:$0 sm:$0xff] }
 0x1d0   :  { %1436 = vmatpush.msrb.mxu0 %v3197_v14 }
 0x1d2   :  { %1437 = vmatpush.msrb.mxu0 %v3201_v36 }
 0x1d3   :  { %1327 = vmatmul.f32.gmra.mxu2 %v780_v49  ;;  %1486 = vmatmul.f32.gmra.mxu1 %v781_v10 }
 0x1d4   :  { %1438 = vmatpush.msrb.mxu0 %v3205_v52 }
 0x1d6   :  { %1439 = vmatpush.msrb.mxu0 %v3209_v46  ;;  %v1345_v46 = vld [vmem:[#allocation11 + $0x1a0] sm:$0xff] }
 0x1d7   :  { %1373 = vmatpush.msra.mxu3 %v1345_v46 }
 0x1d8   :  { %1440 = vmatpush.msrb.mxu0 %v3214_v1  ;;  %v1344_v1 = vld [vmem:[#allocation11 + $0x198] sm:$0xff] }
 0x1d9   :  { %1374 = vmatpush.msra.mxu3 %v1344_v1 }
 0x1da   :  { %1441 = vmatpush.msrb.mxu0 %v3218_v27  ;;  %v1343_v27 = vld [vmem:[#allocation11 + $0x190] sm:$0xff] }
 0x1db   :  { %1375 = vmatpush.msra.mxu3 %v1343_v27 }
 0x1dc   :  { %1442 = vmatpush.msrb.mxu0 %v3222_v6  ;;  %v1342_v6 = vld [vmem:[#allocation11 + $0x188] sm:$0xff] }
 0x1dd   :  { %1376 = vmatpush.msra.mxu3 %v1342_v6  ;;  %v2094_v6 = vld [vmem:[#allocation10 + $0x3] ss:$0 sm:$0xff] }
 0x1de   :  { %1443 = vmatpush.msrb.mxu0 %v3229_v43  ;;  %v1341_v43 = vld [vmem:[#allocation11 + $0x180] sm:$0xff] }
 0x1df   :  { %1377 = vmatpush.msra.mxu3 %v1341_v43 }
 0x1e0   :  { %1444 = vmatpush.msrb.mxu0 %v3233_v56  ;;  %v1587_v56 = vld [vmem:[#allocation8 + $0x2f0] sm:$0xff] }
 0x1e1   :  { %1594 = vmatpush.msrb.mxu3 %v1588_v7 }
 0x1e2   :  { %1445 = vmatpush.msrb.mxu0 %v3241_v35  ;;  %v1586_v35 = vld [vmem:[#allocation8 + $0x2e8] sm:$0xff] }
 0x1e3   :  { %1595 = vmatpush.msrb.mxu3 %v1587_v56 }
 0x1e4   :  { %1446 = vmatpush.msrb.mxu0 %v3245_v58 }
 0x1e5   :  { %1596 = vmatpush.msrb.mxu3 %v1586_v35 }
 0x1e6   :  { %1447 = vmatpush.msrb.mxu0 %v3249_v54  ;;  %v1584_v54 = vld [vmem:[#allocation8 + $0x2d8] sm:$0xff] }
 0x1e7   :  { %1597 = vmatpush.msrb.mxu3 %v1585_v47 }
 0x1e8   :  { %1448 = vmatpush.msrb.mxu0 %v3253_v55  ;;  %v1583_v55 = vld [vmem:[#allocation8 + $0x2d0] sm:$0xff] }
 0x1e9   :  { %1598 = vmatpush.msrb.mxu3 %v1584_v54 }
 0x1ea   :  { %1449 = vmatpush.msrb.mxu0 %v3261_v9 }
 0x1eb   :  { %1599 = vmatpush.msrb.mxu3 %v1583_v55 }
 0x1ec   :  { %1450 = vmatpush.msrb.mxu0 %v3265_v12  ;;  %v1579_v12 = vld [vmem:[#allocation8 + $0x2b0] sm:$0xff] }
 0x1ed   :  { %1600 = vmatpush.msrb.mxu3 %v1582_v15 }
 0x1ef   :  { %1601 = vmatpush.msrb.mxu3 %v1581_v33 }
 0x1f1   :  { %1602 = vmatpush.msrb.mxu3 %v1580_v21 }
 0x1f3   :  { %1603 = vmatpush.msrb.mxu3 %v1579_v12 }
 0x20e   :  { %v1163_v61 = vpop.f32.mrf.mxu3 }
 0x20f   :  { %v1164_v59 = vadd.f32 %v2095_v13, %v1163_v61 }
 0x210   :  { %v1061_v28 = vpop.f32.mrf.mxu1 }
 0x211   :  { %v1062_v16 = vadd.f32 %v2090_v39, %v1061_v28 }
 0x213   :  { %v1070_v14 = vmax.f32 %v1062_v16, 0.0 }
 0x215   :  { %v1078_v36 = vmul.f32 %v2092_v44, %v1070_v14 }
 0x216   :  { %v906_v52 = vpop.f32.mrf.mxu2 }
 0x217   :  { %v907_v57 = vadd.f32 %v2091_v42, %v906_v52  ;;  %1081 = vadd.xlane.f32.xlu1 %v1078_v36  ;;  %v1576_v52 = vld [vmem:[#allocation8 + $0x298] sm:$0xff] }
 0x218   :  { %v1064_v53 = vpop.f32.mrf.mxu1  ;;  %v1166_v9 = vpop.f32.mrf.mxu3 }
 0x219   :  { %v915_v26 = vmax.f32 %v907_v57, 0.0  ;;  %v1065_v50 = vadd.f32 %v2090_v39, %v1064_v53  ;;  %v1167_v16 = vadd.f32 %v2095_v13, %v1166_v9 }
 0x21b   :  { %v1071_v60 = vmax.f32 %v1065_v50, 0.0  ;;  %v922_v62 = vmul.f32 %v2093_v4, %v915_v26  ;;  %v1173_v36 = vmax.f32 %v1167_v16, 0.0  ;;  %v1574_v26 = vld [vmem:[#allocation8 + $0x288] sm:$0xff] }
 0x21d   :  { %925 = vadd.xlane.f32.xlu0 %v922_v62  ;;  %v1079_v10 = vmul.f32 %v2092_v44, %v1071_v60  ;;  %v1573_v62 = vld [vmem:[#allocation8 + $0x280] sm:$0xff] }
 0x21e   :  { %v909_v49 = vpop.f32.mrf.mxu2 }
 0x21f   :  { %v910_v8 = vadd.f32 %v2091_v42, %v909_v49  ;;  %1083 = vadd.xlane.f32.xlu2 %v1079_v10 }
 0x220   :  { %v1067_v51 = vpop.f32.mrf.mxu1  ;;  %v1169_v34 = vpop.f32.mrf.mxu3 }
 0x221   :  { %v916_v0 = vmax.f32 %v910_v8, 0.0  ;;  %v1068_v45 = vadd.f32 %v2090_v39, %v1067_v51  ;;  %v1172_v39 = vmax.f32 %v1164_v59, 0.0  ;;  %v1170_v46 = vadd.f32 %v2095_v13, %v1169_v34 }
 0x223   :  { %v1072_v23 = vmax.f32 %v1068_v45, 0.0  ;;  %v923_v25 = vmul.f32 %v2093_v4, %v916_v0  ;;  %v1174_v10 = vmax.f32 %v1170_v46, 0.0  ;;  %v3355_v46 = vld [vmem:[#allocation8 + $0x320] sm:$0xff] }
 0x225   :  { %927 = vadd.xlane.f32.xlu0 %v923_v25  ;;  %v1080_v41 = vmul.f32 %v2092_v44, %v1072_v23  ;;  %v1578_v44 = vld [vmem:[#allocation8 + $0x2a8] sm:$0xff] }
 0x226   :  { %v912_v58 = vpop.f32.mrf.mxu2  ;;  %1604 = vmatpush.msrb.mxu3 %v1578_v44 }
 0x227   :  { %v913_v40 = vadd.f32 %v2091_v42, %v912_v58  ;;  %1085 = vadd.xlane.f32.xlu2 %v1080_v41  ;;  %v1577_v42 = vld [vmem:[#allocation8 + $0x2a0] sm:$0xff] }
 0x228   :  { %1605 = vmatpush.msrb.mxu3 %v1577_v42  ;;  %v1293_v1 = vpop.f32.mrf.mxu1 }
 0x229   :  { %v917_v19 = vmax.f32 %v913_v40, 0.0  ;;  %v1294_v43 = vadd.f32 %v2094_v6, %v1293_v1  ;;  %v3361_v1 = vld [vmem:[#allocation8 + $0x310] sm:$0xff] }
 0x22a   :  { %1606 = vmatpush.msrb.mxu3 %v1576_v52 }
 0x22b   :  { %v924_v17 = vmul.f32 %v2093_v4, %v917_v19  ;;  %v1575_v4 = vld [vmem:[#allocation8 + $0x290] sm:$0xff]  ;;  %v1302_v23 = vmax.f32 %v1294_v43, 0.0 }
 0x22c   :  { %1607 = vmatpush.msrb.mxu3 %v1575_v4 }
 0x22d   :  { %929 = vadd.xlane.f32.xlu1 %v924_v17  ;;  %v3321_v17 = vld [vmem:[#allocation8 + $0x368] sm:$0xff] }
 0x22e   :  { %v1134_v30 = vpop.f32.mrf.mxu2  ;;  %1608 = vmatpush.msrb.mxu3 %v1574_v26 }
 0x22f   :  { %v1135_v11 = vadd.f32 %v2095_v13, %v1134_v30  ;;  %v3324_v30 = vld [vmem:[#allocation8 + $0x360] sm:$0xff] }
 0x230   :  { %1609 = vmatpush.msrb.mxu3 %v1573_v62  ;;  %v1296_v45 = vpop.f32.mrf.mxu1 }
 0x231   :  { %v1143_v37 = vmax.f32 %v1135_v11, 0.0  ;;  %v1297_v41 = vadd.f32 %v2094_v6, %v1296_v45 }
 0x233   :  { %v1175_v28 = vadd.f32 %v1172_v39, %v1143_v37  ;;  %v1303_v19 = vmax.f32 %v1297_v41, 0.0  ;;  %v3327_v39 = vld [vmem:[#allocation8 + $0x358] sm:$0xff]  ;;  %v3330_v37 = vld [vmem:[#allocation8 + $0x350] sm:$0xff] }
 0x235   :  { %v1178_v18 = vmul.f32 0.5, %v1175_v28 }
 0x236   :  { %v1137_v14 = vpop.f32.mrf.mxu2 }
 0x237   :  { %v1138_v20 = vadd.f32 %v2095_v13, %v1137_v14  ;;  %1219 = vmatmul.f32.vlgmr.msra.gmra.mxu0 %v1178_v18  ;;  %v3338_v14 = vld [vmem:[#allocation8 + $0x340] sm:$0xff] }
 0x238   :  { %1623 = vmatpush.msra.mxu0 %v1588_v7  ;;  %v1299_v59 = vpop.f32.mrf.mxu1 }
 0x239   :  { %v1144_v57 = vmax.f32 %v1138_v20, 0.0  ;;  %v1300_v9 = vadd.f32 %v2094_v6, %v1299_v59  ;;  %v1504_v59 = vld [vmem:[#allocation11 + $0x220] sm:$0xff] }
 0x23a   :  { %1624 = vmatpush.msra.mxu0 %v1587_v56  ;;  %v439_v56 = vadd.f32 %v3029_v63, %v3276_v22  ;;  %v442_v63 = vadd.f32 %v3043_v24, %v3276_v22 }
 0x23b   :  { %v1176_v53 = vadd.f32 %v1173_v36, %v1144_v57  ;;  %v1304_v28 = vmax.f32 %v1300_v9, 0.0  ;;  %v1501_v9 = vld [vmem:[#allocation11 + $0x208] sm:$0xff] }
 0x23c   :  { %1625 = vmatpush.msra.mxu0 %v1586_v35  ;;  %v529_v61 = vmax.f32 %v439_v56, 0.0  ;;  %v537_v11 = vmax.f32 %v442_v63, 0.0  ;;  %v1515_v56 = vld [vmem:[#allocation11 + $0x278] sm:$0xff] }
 0x23d   :  { %v1179_v50 = vmul.f32 0.5, %v1176_v53  ;;  %1521 = vmatpush.msrb.mxu2 %v1515_v56  ;;  %v1507_v63 = vld [vmem:[#allocation11 + $0x238] sm:$0xff] }
 0x23e   :  { %v1140_v60 = vpop.f32.mrf.mxu2  ;;  %1626 = vmatpush.msra.mxu0 %v1585_v47  ;;  %v3314_v47 = vld [vmem:[#allocation8 + $0x378] sm:$0xff]  ;;  %v1903_v56 = vld [vmem:[#allocation8 + $0x3e0] sm:$0xff] }
 0x23f   :  { %v1141_v27 = vadd.f32 %v2095_v13, %v1140_v60  ;;  %1222 = vmatmul.f32.gmra.mxu0 %v1179_v50  ;;  %v3358_v50 = vld [vmem:[#allocation8 + $0x318] sm:$0xff]  ;;  %v3366_v60 = vld [vmem:[#allocation8 + $0x308] sm:$0xff] }
 0x240   :  { %1627 = vmatpush.msra.mxu0 %v1584_v54  ;;  %v3316_v54 = vld [vmem:[#allocation8 + $0x370] sm:$0xff] }
 0x241   :  { %v1145_v49 = vmax.f32 %v1141_v27, 0.0 }
 0x242   :  { %1628 = vmatpush.msra.mxu0 %v1583_v55 }
 0x243   :  { %v1177_v8 = vadd.f32 %v1174_v10, %v1145_v49 }
 0x244   :  { %1629 = vmatpush.msra.mxu0 %v1582_v15 }
 0x245   :  { %v1180_v51 = vmul.f32 0.5, %v1177_v8  ;;  %v3516_v8 = vld [vmem:[#allocation31_spill] sm:$0xff] }
 0x246   :  { %v1322_v7 = vpop.f32.mrf.mxu2  ;;  %1630 = vmatpush.msra.mxu0 %v1581_v33 }
 0x247   :  { %v1323_v0 = vadd.f32 %v2094_v6, %v1322_v7  ;;  %1225 = vmatmul.f32.gmra.mxu0 %v1180_v51 }
 0x248   :  { %1631 = vmatpush.msra.mxu0 %v1580_v21 }
 0x249   :  { %v1331_v25 = vmax.f32 %v1323_v0, 0.0 }
 0x24a   :  { %1632 = vmatpush.msra.mxu0 %v1579_v12  ;;  %v445_v12 = vadd.f32 %v3055_v32, %v3276_v22  ;;  %v3347_v32 = vld [vmem:[#allocation8 + $0x330] sm:$0xff] }
 0x24b   :  { %v1334_v35 = vadd.f32 %v1331_v25, %v1302_v23  ;;  %v1514_v23 = vld [vmem:[#allocation11 + $0x270] sm:$0xff] }
 0x24c   :  { %1633 = vmatpush.msra.mxu0 %v1578_v44  ;;  %v3335_v44 = vld [vmem:[#allocation8 + $0x348] sm:$0xff]  ;;  %v545_v34 = vmax.f32 %v445_v12, 0.0  ;;  %1522 = vmatpush.msrb.mxu2 %v1514_v23 }
 0x24d   :  { %v1337_v58 = vmul.f32 0.5, %v1334_v35  ;;  %v1513_v35 = vld [vmem:[#allocation11 + $0x268] sm:$0xff]  ;;  %v2097_v12 = vld [vmem:[#allocation13 + $0x2] ss:$0 sm:$0xff] }
 0x24e   :  { %v1325_v40 = vpop.f32.mrf.mxu2  ;;  %1634 = vmatpush.msra.mxu0 %v1577_v42  ;;  %v3341_v42 = vld [vmem:[#allocation7] sm:$0xff]  ;;  %1523 = vmatpush.msrb.mxu2 %v1513_v35 }
 0x24f   :  { %v1326_v13 = vadd.f32 %v2094_v6, %v1325_v40  ;;  %1378 = vmatmul.f32.vlgmr.msra.gmra.mxu3 %v1337_v58  ;;  %1451 = vmatmul.f32.vlgmr.msrb.gmra.mxu0 %v529_v61  ;;  %v306_v20 = vperm.slane %v3341_v42, 5  ;;  %v3376_v51 = vperm.slane %v3341_v42, 6  ;;  %v1512_v61 = vld [vmem:[#allocation11 + $0x260] sm:$0xff]  ;;  %v1511_v58 = vld [vmem:[#allocation11 + $0x258] sm:$0xff] }
 0x250   :  { %1635 = vmatpush.msra.mxu0 %v1576_v52  ;;  %1782 = vmatpush.msra.mxu3 %v3314_v47  ;;  %v3344_v52 = vld [vmem:[#allocation8 + $0x338] sm:$0xff] }
 0x251   :  { %v1332_v55 = vmax.f32 %v1326_v13, 0.0  ;;  %v465_v22 = vadd.f32 %v3031_v48, %v306_v20  ;;  %v701_v57 = vadd.f32 %v3135_v29, %v306_v20  ;;  %v468_v48 = vadd.f32 %v3045_v2, %v306_v20  ;;  %1524 = vmatpush.msrb.mxu2 %v1512_v61  ;;  %v1508_v13 = vld [vmem:[#allocation11 + $0x240] sm:$0xff] }
 0x252   :  { %1636 = vmatpush.msra.mxu0 %v1575_v4  ;;  %1783 = vmatpush.msra.mxu3 %v3316_v54  ;;  %v3352_v4 = vld [vmem:[#allocation8 + $0x328] sm:$0xff]  ;;  %v704_v29 = vadd.f32 %v3160_v31, %v306_v20  ;;  %v707_v2 = vadd.f32 %v3516_v8, %v306_v20  ;;  %v727_v7 = vadd.f32 %v3290_v38, %v3376_v51  ;;  %v1510_v38 = vld [vmem:[#allocation11 + $0x250] sm:$0xff] }
 0x253   :  { %v1335_v15 = vadd.f32 %v1332_v55, %v1303_v19  ;;  %v530_v53 = vmax.f32 %v465_v22, 0.0  ;;  %v538_v10 = vmax.f32 %v468_v48, 0.0  ;;  %v730_v45 = vadd.f32 %v3292_v3, %v3376_v51  ;;  %1525 = vmatpush.msrb.mxu2 %v1511_v58  ;;  %v1509_v3 = vld [vmem:[#allocation11 + $0x248] sm:$0xff]  ;;  %v1506_v19 = vld [vmem:[#allocation11 + $0x230] sm:$0xff] }
 0x254   :  { %1637 = vmatpush.msra.mxu0 %v1574_v26  ;;  %1784 = vmatpush.msra.mxu3 %v3321_v17  ;;  %v766_v26 = vmax.f32 %v701_v57, 0.0  ;;  %v774_v27 = vmax.f32 %v704_v29, 0.0  ;;  %v782_v43 = vmax.f32 %v707_v2, 0.0  ;;  %v767_v0 = vmax.f32 %v727_v7, 0.0  ;;  %v1505_v55 = vld [vmem:[#allocation11 + $0x228] sm:$0xff]  ;;  %v1902_v58 = vld [vmem:[#allocation8 + $0x3d8] sm:$0xff] }
 0x255   :  { %v1338_v33 = vmul.f32 0.5, %v1335_v15  ;;  %v775_v25 = vmax.f32 %v730_v45, 0.0  ;;  %v733_v41 = vadd.f32 %v3296_v5, %v3376_v51  ;;  %1526 = vmatpush.msrb.mxu2 %v1510_v38  ;;  %v1503_v5 = vld [vmem:[#allocation11 + $0x218] sm:$0xff]  ;;  %v1502_v15 = vld [vmem:[#allocation11 + $0x210] sm:$0xff]  ;;  %v1905_v2 = vld [vmem:[#allocation8 + $0x3f0] sm:$0xff] }
 0x256   :  { %v1328_v24 = vpop.f32.mrf.mxu2  ;;  %1638 = vmatpush.msra.mxu0 %v1573_v62  ;;  %1785 = vmatpush.msra.mxu3 %v3324_v30  ;;  %v3369_v62 = vld [vmem:[#allocation8 + $0x300] sm:$0xff]  ;;  %v2099_v7 = vld [vmem:[#allocation13 + $0x3] ss:$0 sm:$0xff] }
 0x257   :  { %v1329_v21 = vadd.f32 %v2094_v6, %v1328_v24  ;;  %1381 = vmatmul.f32.gmra.mxu3 %v1338_v33  ;;  %1454 = vmatmul.f32.gmra.mxu0 %v537_v11  ;;  %v3515_v6 = vld [vmem:[#allocation23_spill] sm:$0xff]  ;;  %v783_v40 = vmax.f32 %v733_v41, 0.0  ;;  %v1500_v33 = vld [vmem:[#allocation11 + $0x200] sm:$0xff]  ;;  %v1674_v11 = vld [vmem:[#allocation11 + $0x2f8] sm:$0xff] }
 0x258   :  { %1786 = vmatpush.msra.mxu3 %v3327_v39  ;;  %v471_v49 = vadd.f32 %v3515_v6, %v306_v20  ;;  %1527 = vmatpush.msrb.mxu2 %v1509_v3  ;;  %v1673_v24 = vld [vmem:[#allocation11 + $0x2f0] sm:$0xff]  ;;  %v2096_v29 = vld [vmem:[#allocation10 + $0x4] ss:$0 sm:$0xff]  ;;  %v2100_v41 = vld [vmem:[#allocation14 + $0x3] ss:$0 sm:$0xff] }
 0x259   :  { %v1333_v16 = vmax.f32 %v1329_v21, 0.0  ;;  %1680 = vmatpush.msra.mxu1 %v1674_v11  ;;  %v1672_v21 = vld [vmem:[#allocation11 + $0x2e8] sm:$0xff] }
 0x25a   :  { %1787 = vmatpush.msra.mxu3 %v3330_v37  ;;  %v546_v31 = vmax.f32 %v471_v49, 0.0  ;;  %1528 = vmatpush.msrb.mxu2 %v1508_v13  ;;  %v1906_v49 = vld [vmem:[#allocation8 + $0x3f8] sm:$0xff]  ;;  %v1901_v13 = vld [vmem:[#allocation8 + $0x3d0] sm:$0xff] }
 0x25b   :  { %v1336_v18 = vadd.f32 %v1333_v16, %v1304_v28  ;;  %1681 = vmatpush.msra.mxu1 %v1673_v24  ;;  %v1671_v28 = vld [vmem:[#allocation11 + $0x2e0] sm:$0xff]  ;;  %v2098_v16 = vld [vmem:[#allocation14 + $0x2] ss:$0 sm:$0xff] }
 0x25c   :  { %1788 = vmatpush.msra.mxu3 %v3335_v44  ;;  %1529 = vmatpush.msrb.mxu2 %v1507_v63 }
 0x25d   :  { %v1339_v36 = vmul.f32 0.5, %v1336_v18  ;;  %1682 = vmatpush.msra.mxu1 %v1672_v21 }
 0x25e   :  { %1789 = vmatpush.msra.mxu3 %v3338_v14  ;;  %1530 = vmatpush.msrb.mxu2 %v1506_v19 }
 0x25f   :  { %1384 = vmatmul.f32.gmra.mxu3 %v1339_v36  ;;  %1457 = vmatmul.f32.gmra.mxu0 %v545_v34  ;;  %v1666_v36 = vld [vmem:[#allocation11 + $0x2b8] sm:$0xff] }
 0x260   :  { %1790 = vmatpush.msra.mxu3 %v3344_v52  ;;  %1531 = vmatpush.msrb.mxu2 %v1505_v55 }
 0x261   :  { %1683 = vmatpush.msra.mxu1 %v1671_v28 }
 0x262   :  { %1791 = vmatpush.msra.mxu3 %v3347_v32  ;;  %1532 = vmatpush.msrb.mxu2 %v1504_v59  ;;  %v1900_v59 = vld [vmem:[#allocation8 + $0x3c8] sm:$0xff] }
 0x264   :  { %1792 = vmatpush.msra.mxu3 %v3352_v4  ;;  %1533 = vmatpush.msrb.mxu2 %v1503_v5 }
 0x266   :  { %1793 = vmatpush.msra.mxu3 %v3355_v46  ;;  %1534 = vmatpush.msrb.mxu2 %v1502_v15 }
 0x267   :  { %1610 = vmatmul.f32.vlgmr.msrb.gmra.mxu3 %v530_v53  ;;  %1639 = vmatmul.f32.vlgmr.msra.gmra.mxu0 %v766_v26  ;;  %v1481_v53 = vpop.f32.mrf.mxu1  ;;  %v1662_v26 = vld [vmem:[#allocation11 + $0x298] sm:$0xff] }
 0x268   :  { %1794 = vmatpush.msra.mxu3 %v3358_v50  ;;  %1535 = vmatpush.msrb.mxu2 %v1501_v9  ;;  %v1482_v6 = vadd.f32 %v2096_v29, %v1481_v53  ;;  %v1899_v9 = vld [vmem:[#allocation8 + $0x3c0] sm:$0xff] }
 0x269   :  { %v3517_v53 = vld [vmem:[#allocation28_spill] sm:$0xff] }
 0x26a   :  { %1795 = vmatpush.msra.mxu3 %v3361_v1  ;;  %1536 = vmatpush.msrb.mxu2 %v1500_v33 }
 0x26c   :  { %1796 = vmatpush.msra.mxu3 %v3366_v60  ;;  %1753 = vmatpush.msra.mxu2 %v3314_v47 }
 0x26e   :  { %1797 = vmatpush.msra.mxu3 %v3369_v62  ;;  %1754 = vmatpush.msra.mxu2 %v3316_v54  ;;  %v1670_v54 = vld [vmem:[#allocation11 + $0x2d8] sm:$0xff] }
 0x26f   :  { %1613 = vmatmul.f32.gmra.mxu3 %v538_v10  ;;  %1642 = vmatmul.f32.gmra.mxu0 %v774_v27 }
 0x270   :  { %1755 = vmatpush.msra.mxu2 %v3321_v17  ;;  %1684 = vmatpush.msra.mxu1 %v1670_v54 }
 0x272   :  { %1756 = vmatpush.msra.mxu2 %v3324_v30  ;;  %v1669_v30 = vld [vmem:[#allocation11 + $0x2d0] sm:$0xff] }
 0x273   :  { %1685 = vmatpush.msra.mxu1 %v1669_v30 }
 0x274   :  { %1757 = vmatpush.msra.mxu2 %v3327_v39  ;;  %v1668_v39 = vld [vmem:[#allocation11 + $0x2c8] sm:$0xff] }
 0x275   :  { %1686 = vmatpush.msra.mxu1 %v1668_v39  ;;  %v1896_v39 = vld [vmem:[#allocation8 + $0x3a8] sm:$0xff] }
 0x276   :  { %1758 = vmatpush.msra.mxu2 %v3330_v37  ;;  %v1667_v37 = vld [vmem:[#allocation11 + $0x2c0] sm:$0xff] }
 0x277   :  { %1616 = vmatmul.f32.gmra.mxu3 %v546_v31  ;;  %1645 = vmatmul.f32.gmra.mxu0 %v782_v43  ;;  %v1484_v43 = vpop.f32.mrf.mxu1  ;;  %v1490_v31 = vmax.f32 %v1482_v6, 0.0 }
 0x278   :  { %1759 = vmatpush.msra.mxu2 %v3335_v44  ;;  %1687 = vmatpush.msra.mxu1 %v1667_v37  ;;  %v1895_v37 = vld [vmem:[#allocation8 + $0x3a0] sm:$0xff] }
 0x27a   :  { %1760 = vmatpush.msra.mxu2 %v3338_v14  ;;  %1688 = vmatpush.msra.mxu1 %v1666_v36  ;;  %v1665_v14 = vld [vmem:[#allocation11 + $0x2b0] sm:$0xff] }
 0x27c   :  { %1761 = vmatpush.msra.mxu2 %v3344_v52  ;;  %1689 = vmatpush.msra.mxu1 %v1665_v14  ;;  %v1664_v52 = vld [vmem:[#allocation11 + $0x2a8] sm:$0xff]  ;;  %v1894_v14 = vld [vmem:[#allocation8 + $0x398] sm:$0xff] }
 0x27e   :  { %1762 = vmatpush.msra.mxu2 %v3347_v32  ;;  %1690 = vmatpush.msra.mxu1 %v1664_v52  ;;  %v1663_v32 = vld [vmem:[#allocation11 + $0x2a0] sm:$0xff] }
 0x27f   :  { %1798 = vmatmul.f32.vlgmr.msra.gmra.mxu3 %v767_v0  ;;  %v1904_v0 = vld [vmem:[#allocation8 + $0x3e8] sm:$0xff]  ;;  %v1487_v5 = vpop.f32.mrf.mxu1 }
 0x280   :  { %1763 = vmatpush.msra.mxu2 %v3352_v4  ;;  %1691 = vmatpush.msra.mxu1 %v1663_v32  ;;  %v1488_v11 = vadd.f32 %v2096_v29, %v1487_v5  ;;  %v1893_v32 = vld [vmem:[#allocation8 + $0x390] sm:$0xff] }
 0x282   :  { %1764 = vmatpush.msra.mxu2 %v3355_v46  ;;  %1692 = vmatpush.msra.mxu1 %v1662_v26  ;;  %v1661_v46 = vld [vmem:[#allocation11 + $0x290] sm:$0xff] }
 0x284   :  { %1765 = vmatpush.msra.mxu2 %v3358_v50  ;;  %1693 = vmatpush.msra.mxu1 %v1661_v46  ;;  %v1660_v50 = vld [vmem:[#allocation11 + $0x288] sm:$0xff] }
 0x286   :  { %1766 = vmatpush.msra.mxu2 %v3361_v1  ;;  %1694 = vmatpush.msra.mxu1 %v1660_v50  ;;  %v1659_v1 = vld [vmem:[#allocation11 + $0x280] sm:$0xff] }
 0x287   :  { %1801 = vmatmul.f32.gmra.mxu3 %v775_v25  ;;  %v1485_v25 = vadd.f32 %v2096_v29, %v1484_v43 }
 0x288   :  { %1767 = vmatpush.msra.mxu2 %v3366_v60  ;;  %1695 = vmatpush.msra.mxu1 %v1659_v1 }
 0x289   :  { %v1491_v63 = vmax.f32 %v1485_v25, 0.0  ;;  %v3519_v25 = vld [vmem:[#allocation27_spill] sm:$0xff] }
 0x28a   :  { %1768 = vmatpush.msra.mxu2 %v3369_v62  ;;  %1912 = vmatpush.msrb.mxu1 %v1906_v49 }
 0x28c   :  { %1913 = vmatpush.msrb.mxu1 %v1905_v2 }
 0x28e   :  { %1914 = vmatpush.msrb.mxu1 %v1904_v0 }
 0x28f   :  { %1804 = vmatmul.f32.gmra.mxu3 %v783_v40 }
 0x290   :  { %1915 = vmatpush.msrb.mxu1 %v1903_v56 }
 0x292   :  { %1916 = vmatpush.msrb.mxu1 %v1902_v58 }
 0x294   :  { %1917 = vmatpush.msrb.mxu1 %v1901_v13 }
 0x296   :  { %1918 = vmatpush.msrb.mxu1 %v1900_v59 }
 0x298   :  { %1919 = vmatpush.msrb.mxu1 %v1899_v9 }
 0x2b4   :  { %v1220_v47 = vpop.f32.mrf.mxu0 }
 0x2b5   :  { %v1221_v17 = vadd.f32 %v2097_v12, %v1220_v47 }
 0x2b7   :  { %v1229_v18 = vmax.f32 %v1221_v17, 0.0  ;;  %v1897_v17 = vld [vmem:[#allocation8 + $0x3b0] sm:$0xff] }
 0x2b9   :  { %v1237_v20 = vmul.f32 %v2098_v16, %v1229_v18 }
 0x2bb   :  { %1240 = vadd.xlane.f32.xlu0 %v1237_v20 }
 0x2bc   :  { %v1223_v44 = vpop.f32.mrf.mxu0 }
 0x2bd   :  { %v1224_v34 = vadd.f32 %v2097_v12, %v1223_v44 }
 0x2bf   :  { %v1230_v22 = vmax.f32 %v1224_v34, 0.0 }
 0x2c1   :  { %v1238_v57 = vmul.f32 %v2098_v16, %v1230_v22 }
 0x2c3   :  { %1242 = vadd.xlane.f32.xlu1 %v1238_v57  ;;  %v2101_v57 = vld [vmem:[#allocation10 + $0x5] ss:$0 sm:$0xff] }
 0x2c4   :  { %v1226_v4 = vpop.f32.mrf.mxu0 }
 0x2c5   :  { %v1227_v48 = vadd.f32 %v2097_v12, %v1226_v4  ;;  %v1898_v12 = vld [vmem:[#allocation8 + $0x3b8] sm:$0xff]  ;;  %v491_v4 = vadd.f32 %v3517_v53, %v3376_v51  ;;  %v1823_v53 = vld [vmem:[#allocation11 + $0x328] sm:$0xff] }
 0x2c6   :  { %1920 = vmatpush.msrb.mxu1 %v1898_v12 }
 0x2c7   :  { %v1231_v27 = vmax.f32 %v1227_v48, 0.0  ;;  %v1892_v48 = vld [vmem:[#allocation8 + $0x388] sm:$0xff]  ;;  %v531_v50 = vmax.f32 %v491_v4, 0.0 }
 0x2c8   :  { %1921 = vmatpush.msrb.mxu1 %v1897_v17  ;;  %v1822_v4 = vld [vmem:[#allocation11 + $0x320] sm:$0xff] }
 0x2c9   :  { %v1239_v10 = vmul.f32 %v2098_v16, %v1231_v27  ;;  %v1492_v16 = vmax.f32 %v1488_v11, 0.0  ;;  %v3522_v11 = vld [vmem:[#allocation35_spill] sm:$0xff] }
 0x2ca   :  { %1922 = vmatpush.msrb.mxu1 %v1896_v39 }
 0x2cb   :  { %1244 = vadd.xlane.f32.xlu2 %v1239_v10 }
 0x2cc   :  { %v1452_v8 = vpop.f32.mrf.mxu0  ;;  %1923 = vmatpush.msrb.mxu1 %v1895_v37 }
 0x2cd   :  { %v1453_v60 = vadd.f32 %v2096_v29, %v1452_v8  ;;  %v3518_v8 = vld [vmem:[#allocation38_spill] sm:$0xff] }
 0x2ce   :  { %1924 = vmatpush.msrb.mxu1 %v1894_v14 }
 0x2cf   :  { %v1461_v62 = vmax.f32 %v1453_v60, 0.0  ;;  %v494_v60 = vadd.f32 %v3518_v8, %v3376_v51 }
 0x2d0   :  { %1925 = vmatpush.msrb.mxu1 %v1893_v32 }
 0x2d1   :  { %v1493_v45 = vadd.f32 %v1490_v31, %v1461_v62 }
 0x2d2   :  { %v1379_v23 = vpop.f32.mrf.mxu3  ;;  %1926 = vmatpush.msrb.mxu1 %v1892_v48 }
 0x2d3   :  { %v1496_v35 = vmul.f32 0.5, %v1493_v45  ;;  %v1380_v61 = vadd.f32 %v2099_v7, %v1379_v23 }
 0x2d4   :  { %v1455_v38 = vpop.f32.mrf.mxu0 }
 0x2d5   :  { %v1388_v40 = vmax.f32 %v1380_v61, 0.0  ;;  %v1456_v3 = vadd.f32 %v2096_v29, %v1455_v38  ;;  %1537 = vmatmul.f32.vlgmr.msrb.gmra.mxu2 %v1496_v35  ;;  %v497_v35 = vadd.f32 %v3519_v25, %v3376_v51 }
 0x2d6   :  { %1941 = vmatpush.msrb.mxu2 %v1906_v49 }
 0x2d7   :  { %v1462_v19 = vmax.f32 %v1456_v3, 0.0  ;;  %v1396_v55 = vmul.f32 %v2100_v41, %v1388_v40  ;;  %v547_v40 = vmax.f32 %v497_v35, 0.0  ;;  %v1983_v35 = vld [vmem:[#allocation11 + $0x3b0] sm:$0xff] }
 0x2d8   :  { %1942 = vmatpush.msrb.mxu2 %v1905_v2 }
 0x2d9   :  { %1399 = vadd.xlane.f32.xlu0 %v1396_v55  ;;  %v1494_v15 = vadd.f32 %v1491_v63, %v1462_v19  ;;  %v3520_v55 = vld [vmem:[#allocation25_spill] sm:$0xff] }
 0x2da   :  { %v1382_v33 = vpop.f32.mrf.mxu3  ;;  %1943 = vmatpush.msrb.mxu2 %v1904_v0 }
 0x2db   :  { %v1383_v24 = vadd.f32 %v2099_v7, %v1382_v33  ;;  %v1497_v21 = vmul.f32 0.5, %v1494_v15  ;;  %v3521_v33 = vld [vmem:[#allocation30_spill] sm:$0xff] }
 0x2dc   :  { %v1458_v28 = vpop.f32.mrf.mxu0  ;;  %1944 = vmatpush.msrb.mxu2 %v1903_v56 }
 0x2dd   :  { %v1389_v47 = vmax.f32 %v1383_v24, 0.0  ;;  %v1459_v54 = vadd.f32 %v2096_v29, %v1458_v28  ;;  %1540 = vmatmul.f32.gmra.mxu2 %v1497_v21  ;;  %v1891_v29 = vld [vmem:[#allocation8 + $0x380] sm:$0xff] }
 0x2de   :  { %1945 = vmatpush.msrb.mxu2 %v1902_v58  ;;  %1927 = vmatpush.msrb.mxu1 %v1891_v29  ;;  %v3523_v28 = vld [vmem:[#allocation24_spill] sm:$0xff] }
 0x2df   :  { %v1463_v30 = vmax.f32 %v1459_v54, 0.0  ;;  %v1397_v18 = vmul.f32 %v2100_v41, %v1389_v47 }
 0x2e0   :  { %1946 = vmatpush.msrb.mxu2 %v1901_v13  ;;  %v308_v13 = vperm.slane %v3341_v42, 7  ;;  %v3524_v42 = vld [vmem:[#allocation26_spill] sm:$0xff] }
 0x2e1   :  { %1401 = vadd.xlane.f32.xlu1 %v1397_v18  ;;  %v1495_v20 = vadd.f32 %v1492_v16, %v1463_v30  ;;  %v3525_v30 = vld [vmem:[#allocation33_spill] sm:$0xff] }
 0x2e2   :  { %v1385_v44 = vpop.f32.mrf.mxu3  ;;  %1947 = vmatpush.msrb.mxu2 %v1900_v59  ;;  %v753_v59 = vadd.f32 %v3520_v55, %v308_v13  ;;  %v517_v51 = vadd.f32 %v3521_v33, %v308_v13  ;;  %v756_v24 = vadd.f32 %v3522_v11, %v308_v13  ;;  %v520_v47 = vadd.f32 %v3523_v28, %v308_v13  ;;  %v1979_v55 = vld [vmem:[#allocation11 + $0x390] sm:$0xff]  ;;  %v1977_v33 = vld [vmem:[#allocation11 + $0x380] sm:$0xff] }
 0x2e3   :  { %v1386_v36 = vadd.f32 %v2099_v7, %v1385_v44  ;;  %v1498_v34 = vmul.f32 0.5, %v1495_v20  ;;  %v539_v7 = vmax.f32 %v494_v60, 0.0  ;;  %v759_v54 = vadd.f32 %v3524_v42, %v308_v13  ;;  %v1833_v20 = vld [vmem:[#allocation11 + $0x378] sm:$0xff]  ;;  %v1831_v44 = vld [vmem:[#allocation11 + $0x368] sm:$0xff] }
 0x2e4   :  { %v1640_v22 = vpop.f32.mrf.mxu0  ;;  %1948 = vmatpush.msrb.mxu2 %v1899_v9  ;;  %v768_v9 = vmax.f32 %v753_v59, 0.0  ;;  %v532_v21 = vmax.f32 %v517_v51, 0.0  ;;  %v523_v18 = vadd.f32 %v3525_v30, %v308_v13  ;;  %1839 = vmatpush.msrb.mxu0 %v1833_v20  ;;  %v2104_v60 = vld [vmem:[#allocation14 + $0x4] ss:$0 sm:$0xff]  ;;  %v1980_v13 = vld [vmem:[#allocation11 + $0x398] sm:$0xff] }
 0x2e5   :  { %v1390_v52 = vmax.f32 %v1386_v36, 0.0  ;;  %1543 = vmatmul.f32.gmra.mxu2 %v1498_v34  ;;  %v1641_v46 = vadd.f32 %v2101_v57, %v1640_v22  ;;  %v784_v16 = vmax.f32 %v759_v54, 0.0  ;;  %v1830_v36 = vld [vmem:[#allocation11 + $0x360] sm:$0xff]  ;;  %v1829_v34 = vld [vmem:[#allocation11 + $0x358] sm:$0xff]  ;;  %v1827_v22 = vld [vmem:[#allocation11 + $0x348] sm:$0xff] }
 0x2e6   :  { %1949 = vmatpush.msrb.mxu2 %v1898_v12  ;;  %v776_v12 = vmax.f32 %v756_v24, 0.0 }
 0x2e7   :  { %v1398_v26 = vmul.f32 %v2100_v41, %v1390_v52  ;;  %v1649_v6 = vmax.f32 %v1641_v46, 0.0  ;;  %v1826_v52 = vld [vmem:[#allocation11 + $0x340] sm:$0xff]  ;;  %v1820_v46 = vld [vmem:[#allocation11 + $0x310] sm:$0xff] }
 0x2e8   :  { %1950 = vmatpush.msrb.mxu2 %v1897_v17  ;;  %v540_v17 = vmax.f32 %v520_v47, 0.0 }
 0x2e9   :  { %1403 = vadd.xlane.f32.xlu2 %v1398_v26  ;;  %v1821_v26 = vld [vmem:[#allocation11 + $0x318] sm:$0xff] }
 0x2ea   :  { %v1611_v27 = vpop.f32.mrf.mxu3  ;;  %1951 = vmatpush.msrb.mxu2 %v1896_v39  ;;  %v548_v39 = vmax.f32 %v523_v18, 0.0 }
 0x2eb   :  { %v1612_v10 = vadd.f32 %v2101_v57, %v1611_v27  ;;  %v2103_v27 = vld [vmem:[#allocation13 + $0x4] ss:$0 sm:$0xff] }
 0x2ec   :  { %v1643_v1 = vpop.f32.mrf.mxu0  ;;  %1952 = vmatpush.msrb.mxu2 %v1895_v37  ;;  %v1832_v37 = vld [vmem:[#allocation11 + $0x370] sm:$0xff] }
 0x2ed   :  { %v1620_v49 = vmax.f32 %v1612_v10, 0.0  ;;  %1769 = vmatmul.f32.vlgmr.msra.gmra.mxu2 %v531_v50  ;;  %v1644_v31 = vadd.f32 %v2101_v57, %v1643_v1  ;;  %1840 = vmatpush.msrb.mxu0 %v1832_v37  ;;  %v1819_v50 = vld [vmem:[#allocation11 + $0x308] sm:$0xff]  ;;  %v1818_v1 = vld [vmem:[#allocation11 + $0x300] sm:$0xff] }
 0x2ee   :  { %1953 = vmatpush.msrb.mxu2 %v1894_v14  ;;  %v1828_v14 = vld [vmem:[#allocation11 + $0x350] sm:$0xff]  ;;  %v1990_v10 = vld [vmem:[#allocation11 + $0x3e8] sm:$0xff] }
 0x2ef   :  { %v1652_v2 = vadd.f32 %v1649_v6, %v1620_v49  ;;  %v1650_v45 = vmax.f32 %v1644_v31, 0.0  ;;  %1841 = vmatpush.msrb.mxu0 %v1831_v44  ;;  %v1989_v6 = vld [vmem:[#allocation11 + $0x3e0] sm:$0xff]  ;;  %v1987_v31 = vld [vmem:[#allocation11 + $0x3d0] sm:$0xff] }
 0x2f0   :  { %1954 = vmatpush.msrb.mxu2 %v1893_v32  ;;  %v1824_v32 = vld [vmem:[#allocation11 + $0x330] sm:$0xff] }
 0x2f1   :  { %v1655_v43 = vmul.f32 0.5, %v1652_v2  ;;  %1842 = vmatpush.msrb.mxu0 %v1830_v36  ;;  %v1988_v2 = vld [vmem:[#allocation11 + $0x3d8] sm:$0xff] }
 0x2f2   :  { %v1614_v62 = vpop.f32.mrf.mxu3  ;;  %1955 = vmatpush.msrb.mxu2 %v1892_v48  ;;  %v1992_v48 = vld [vmem:[#allocation11 + $0x3f8] sm:$0xff] }
 0x2f3   :  { %v1615_v0 = vadd.f32 %v2101_v57, %v1614_v62  ;;  %1696 = vmatmul.f32.vlgmr.msra.gmra.mxu1 %v1655_v43  ;;  %1843 = vmatpush.msrb.mxu0 %v1829_v34 }
 0x2f4   :  { %1956 = vmatpush.msrb.mxu2 %v1891_v29  ;;  %v1646_v23 = vpop.f32.mrf.mxu0  ;;  %1998 = vmatpush.msrb.mxu3 %v1992_v48  ;;  %v1991_v29 = vld [vmem:[#allocation11 + $0x3f0] sm:$0xff] }
 0x2f5   :  { %v1621_v56 = vmax.f32 %v1615_v0, 0.0  ;;  %1772 = vmatmul.f32.gmra.mxu2 %v539_v7  ;;  %v1647_v58 = vadd.f32 %v2101_v57, %v1646_v23  ;;  %1844 = vmatpush.msrb.mxu0 %v1828_v14  ;;  %v1986_v7 = vld [vmem:[#allocation11 + $0x3c8] sm:$0xff]  ;;  %v1985_v0 = vld [vmem:[#allocation11 + $0x3c0] sm:$0xff]  ;;  %v1984_v23 = vld [vmem:[#allocation11 + $0x3b8] sm:$0xff] }
 0x2f6   :  { %1999 = vmatpush.msrb.mxu3 %v1991_v29 }
 0x2f7   :  { %v1653_v61 = vadd.f32 %v1650_v45, %v1621_v56  ;;  %v1651_v63 = vmax.f32 %v1647_v58, 0.0  ;;  %1845 = vmatpush.msrb.mxu0 %v1827_v22  ;;  %v1981_v58 = vld [vmem:[#allocation11 + $0x3a0] sm:$0xff] }
 0x2f8   :  { %2000 = vmatpush.msrb.mxu3 %v1990_v10 }
 0x2f9   :  { %v1656_v41 = vmul.f32 0.5, %v1653_v61  ;;  %1846 = vmatpush.msrb.mxu0 %v1826_v52 }
 0x2fa   :  { %v1617_v38 = vpop.f32.mrf.mxu3  ;;  %2001 = vmatpush.msrb.mxu3 %v1989_v6  ;;  %v2107_v6 = vld [vmem:[#allocation10 + $0x7] ss:$0 sm:$0xff] }
 0x2fb   :  { %v1618_v3 = vadd.f32 %v2101_v57, %v1617_v38  ;;  %1699 = vmatmul.f32.gmra.mxu1 %v1656_v41  ;;  %v1825_v57 = vld [vmem:[#allocation11 + $0x338] sm:$0xff]  ;;  %v1982_v41 = vld [vmem:[#allocation11 + $0x3a8] sm:$0xff] }
 0x2fc   :  { %1847 = vmatpush.msrb.mxu0 %v1825_v57  ;;  %2002 = vmatpush.msrb.mxu3 %v1988_v2 }
 0x2fd   :  { %v1622_v19 = vmax.f32 %v1618_v3, 0.0  ;;  %1775 = vmatmul.f32.gmra.mxu2 %v547_v40 }
 0x2fe   :  { %1848 = vmatpush.msrb.mxu0 %v1824_v32  ;;  %2003 = vmatpush.msrb.mxu3 %v1987_v31 }
 0x2ff   :  { %v1654_v5 = vadd.f32 %v1651_v63, %v1622_v19  ;;  %v2102_v63 = vld [vmem:[#allocation10 + $0x6] ss:$0 sm:$0xff] }
 0x300   :  { %1849 = vmatpush.msrb.mxu0 %v1823_v53  ;;  %2004 = vmatpush.msrb.mxu3 %v1986_v7 }
 0x301   :  { %v1657_v15 = vmul.f32 0.5, %v1654_v5  ;;  %v2105_v5 = vld [vmem:[#allocation13 + $0x5] ss:$0 sm:$0xff] }
 0x302   :  { %1850 = vmatpush.msrb.mxu0 %v1822_v4  ;;  %2005 = vmatpush.msrb.mxu3 %v1985_v0  ;;  %v1799_v38 = vpop.f32.mrf.mxu3 }
 0x303   :  { %1702 = vmatmul.f32.gmra.mxu1 %v1657_v15  ;;  %v1978_v15 = vld [vmem:[#allocation11 + $0x388] sm:$0xff] }
 0x304   :  { %1851 = vmatpush.msrb.mxu0 %v1821_v26  ;;  %2006 = vmatpush.msrb.mxu3 %v1984_v23 }
 0x305   :  { %1957 = vmatmul.f32.vlgmr.msrb.gmra.mxu2 %v768_v9  ;;  %v1800_v9 = vadd.f32 %v2102_v63, %v1799_v38 }
 0x306   :  { %1852 = vmatpush.msrb.mxu0 %v1820_v46  ;;  %2007 = vmatpush.msrb.mxu3 %v1983_v35 }
 0x307   :  { %v1808_v47 = vmax.f32 %v1800_v9, 0.0 }
 0x308   :  { %1853 = vmatpush.msrb.mxu0 %v1819_v50  ;;  %2008 = vmatpush.msrb.mxu3 %v1982_v41 }
 0x30a   :  { %1854 = vmatpush.msrb.mxu0 %v1818_v1  ;;  %2009 = vmatpush.msrb.mxu3 %v1981_v58  ;;  %v1802_v28 = vpop.f32.mrf.mxu3 }
 0x30b   :  { %1928 = vmatmul.f32.vlgmr.msrb.gmra.mxu1 %v532_v21  ;;  %v1803_v30 = vadd.f32 %v2102_v63, %v1802_v28 }
 0x30c   :  { %2010 = vmatpush.msrb.mxu3 %v1980_v13 }
 0x30d   :  { %1960 = vmatmul.f32.gmra.mxu2 %v776_v12  ;;  %v2106_v12 = vld [vmem:[#allocation14 + $0x5] ss:$0 sm:$0xff]  ;;  %v1809_v36 = vmax.f32 %v1803_v30, 0.0 }
 0x30e   :  { %2011 = vmatpush.msrb.mxu3 %v1979_v55 }
 0x310   :  { %2012 = vmatpush.msrb.mxu3 %v1978_v15 }
 0x312   :  { %2013 = vmatpush.msrb.mxu3 %v1977_v33  ;;  %v1805_v22 = vpop.f32.mrf.mxu3  ;;  %v2109_v33 = vld [vmem:[#allocation14 + $0x6] ss:$0 sm:$0xff] }
 0x313   :  { %1931 = vmatmul.f32.gmra.mxu1 %v540_v17  ;;  %v1806_v32 = vadd.f32 %v2102_v63, %v1805_v22 }
 0x315   :  { %1963 = vmatmul.f32.gmra.mxu2 %v784_v16  ;;  %v1810_v29 = vmax.f32 %v1806_v32, 0.0 }
 0x31b   :  { %1934 = vmatmul.f32.gmra.mxu1 %v548_v39 }
 0x358   :  { %v1538_v49 = vpop.f32.mrf.mxu2 }
 0x359   :  { %v1539_v8 = vadd.f32 %v2103_v27, %v1538_v49 }
 0x35b   :  { %v1547_v43 = vmax.f32 %v1539_v8, 0.0 }
 0x35d   :  { %v1555_v62 = vmul.f32 %v2104_v60, %v1547_v43 }
 0x35f   :  { %1558 = vadd.xlane.f32.xlu0 %v1555_v62 }
 0x360   :  { %v1541_v45 = vpop.f32.mrf.mxu2 }
 0x361   :  { %v1542_v56 = vadd.f32 %v2103_v27, %v1541_v45 }
 0x363   :  { %v1548_v25 = vmax.f32 %v1542_v56, 0.0 }
 0x365   :  { %v1556_v61 = vmul.f32 %v2104_v60, %v1548_v25 }
 0x367   :  { %1560 = vadd.xlane.f32.xlu1 %v1556_v61 }
 0x368   :  { %v1544_v40 = vpop.f32.mrf.mxu2 }
 0x369   :  { %v1545_v3 = vadd.f32 %v2103_v27, %v1544_v40 }
 0x36b   :  { %v1549_v19 = vmax.f32 %v1545_v3, 0.0 }
 0x36d   :  { %v1557_v59 = vmul.f32 %v2104_v60, %v1549_v19 }
 0x36f   :  { %1562 = vadd.xlane.f32.xlu2 %v1557_v59 }
 0x370   :  { %v1697_v51 = vpop.f32.mrf.mxu1  ;;  %v1770_v11 = vpop.f32.mrf.mxu2 }
 0x371   :  { %v1698_v24 = vadd.f32 %v2105_v5, %v1697_v51  ;;  %v1771_v21 = vadd.f32 %v2102_v63, %v1770_v11 }
 0x373   :  { %v1706_v42 = vmax.f32 %v1698_v24, 0.0  ;;  %v1779_v54 = vmax.f32 %v1771_v21, 0.0 }
 0x375   :  { %v1811_v17 = vadd.f32 %v1808_v47, %v1779_v54  ;;  %v1714_v16 = vmul.f32 %v2106_v12, %v1706_v42 }
 0x377   :  { %v1814_v18 = vmul.f32 0.5, %v1811_v17  ;;  %1717 = vadd.xlane.f32.xlu0 %v1714_v16  ;;  %v2110_v16 = vld [vmem:[#allocation13 + $0x7] ss:$0 sm:$0xff] }
 0x378   :  { %v1700_v39 = vpop.f32.mrf.mxu1  ;;  %v1773_v20 = vpop.f32.mrf.mxu2 }
 0x379   :  { %v1701_v37 = vadd.f32 %v2105_v5, %v1700_v39  ;;  %v1774_v44 = vadd.f32 %v2102_v63, %v1773_v20  ;;  %1855 = vmatmul.f32.vlgmr.msrb.gmra.mxu0 %v1814_v18  ;;  %v2111_v39 = vld [vmem:[#allocation14 + $0x7] ss:$0 sm:$0xff] }
 0x37b   :  { %v1707_v34 = vmax.f32 %v1701_v37, 0.0  ;;  %v1780_v14 = vmax.f32 %v1774_v44, 0.0 }
 0x37d   :  { %v1812_v52 = vadd.f32 %v1809_v36, %v1780_v14  ;;  %v1715_v57 = vmul.f32 %v2106_v12, %v1707_v34 }
 0x37f   :  { %v1815_v53 = vmul.f32 0.5, %v1812_v52  ;;  %1719 = vadd.xlane.f32.xlu1 %v1715_v57 }
 0x380   :  { %v1703_v4 = vpop.f32.mrf.mxu1  ;;  %v1776_v26 = vpop.f32.mrf.mxu2 }
 0x381   :  { %v1704_v48 = vadd.f32 %v2105_v5, %v1703_v4  ;;  %v1777_v46 = vadd.f32 %v2102_v63, %v1776_v26  ;;  %1858 = vmatmul.f32.gmra.mxu0 %v1815_v53  ;;  %v2108_v5 = vld [vmem:[#allocation13 + $0x6] ss:$0 sm:$0xff]  ;;  %v926_v53 = vpop.xlane.xlu0 %925  ;;  %v1082_v4 = vpop.xlane.xlu1 %1081 }
 0x383   :  { %v1708_v27 = vmax.f32 %v1704_v48, 0.0  ;;  %v1781_v50 = vmax.f32 %v1777_v46, 0.0  ;;  %v1084_v48 = vpop.xlane.xlu2 %1083 }
 0x385   :  { %v1813_v10 = vadd.f32 %v1810_v29, %v1781_v50  ;;  %v1716_v1 = vmul.f32 %v2106_v12, %v1708_v27 }
 0x387   :  { %v1816_v49 = vmul.f32 0.5, %v1813_v10  ;;  %1721 = vadd.xlane.f32.xlu2 %v1716_v1 }
 0x388   :  { %v1929_v8 = vpop.f32.mrf.mxu1  ;;  %v1958_v60 = vpop.f32.mrf.mxu2 }
 0x389   :  { %v1930_v2 = vadd.f32 %v2107_v6, %v1929_v8  ;;  %v1959_v43 = vadd.f32 %v2107_v6, %v1958_v60  ;;  %1861 = vmatmul.f32.gmra.mxu0 %v1816_v49  ;;  %v928_v26 = vpop.xlane.xlu0 %927  ;;  %v930_v46 = vpop.xlane.xlu1 %929  ;;  %v932_v60 = vstv %s931_s7 }
 0x38b   :  { %v1938_v31 = vmax.f32 %v1930_v2, 0.0  ;;  %v1967_v62 = vmax.f32 %v1959_v43, 0.0  ;;  %v1086_v27 = vpop.xlane.xlu2 %1085 }
 0x38d   :  { %v1970_v7 = vadd.f32 %v1967_v62, %v1938_v31  ;;  %v1088_v31 = vstv %s2066_s8  ;;  %v1247_v62 = vstv %s2067_s3 }
 0x38f   :  { %v1973_v0 = vmul.f32 0.5, %v1970_v7  ;;  %v933_v7 = vadd.f32 %v932_v60, %v926_v53 }
 0x390   :  { %v1932_v45 = vpop.f32.mrf.mxu1  ;;  %v1961_v56 = vpop.f32.mrf.mxu2 }
 0x391   :  { %v1933_v23 = vadd.f32 %v2107_v6, %v1932_v45  ;;  %v1962_v25 = vadd.f32 %v2107_v6, %v1961_v56  ;;  %2014 = vmatmul.f32.vlgmr.msrb.gmra.mxu3 %v1973_v0  ;;  %v1241_v29 = vpop.xlane.xlu0 %1240  ;;  %v1243_v50 = vpop.xlane.xlu1 %1242  ;;  %v1406_v0 = vstv %s2068_s30  ;;  %v1089_v45 = vadd.f32 %v1088_v31, %v1082_v4 }
 0x392   :  { %v1248_v56 = vadd.f32 %v1247_v62, %v1241_v29 }
 0x393   :  { %v1939_v35 = vmax.f32 %v1933_v23, 0.0  ;;  %v1968_v61 = vmax.f32 %v1962_v25, 0.0  ;;  %v1245_v1 = vpop.xlane.xlu2 %1244  ;;  %v1565_v23 = vstv %s2069_s10  ;;  %v1092_v25 = vadd.f32 %v1089_v45, %v933_v7 }
 0x395   :  { %v1971_v41 = vadd.f32 %v1968_v61, %v1939_v35 }
 0x397   :  { %v1974_v58 = vmul.f32 0.5, %v1971_v41  ;;  %v1724_v41 = vstv %s2070_s11 }
 0x398   :  { %v1935_v38 = vpop.f32.mrf.mxu1  ;;  %v1964_v40 = vpop.f32.mrf.mxu2 }
 0x399   :  { %v1936_v3 = vadd.f32 %v2107_v6, %v1935_v38  ;;  %v1965_v13 = vadd.f32 %v2107_v6, %v1964_v40  ;;  %2017 = vmatmul.f32.gmra.mxu3 %v1974_v58  ;;  %v1400_v10 = vpop.xlane.xlu0 %1399  ;;  %v1402_v6 = vpop.xlane.xlu1 %1401  ;;  %v1251_v40 = vadd.f32 %v1248_v56, %v1092_v25 }
 0x39a   :  { %v1407_v35 = vadd.f32 %v1406_v0, %v1400_v10 }
 0x39b   :  { %v1940_v63 = vmax.f32 %v1936_v3, 0.0  ;;  %v1969_v19 = vmax.f32 %v1965_v13, 0.0  ;;  %v1404_v8 = vpop.xlane.xlu2 %1403  ;;  %v1883_v13 = vstv %s2071_s5 }
 0x39d   :  { %v1972_v55 = vadd.f32 %v1969_v19, %v1940_v63  ;;  %v934_v63 = vadd.f32 %v932_v60, %v928_v26  ;;  %v1410_v19 = vadd.f32 %v1407_v35, %v1251_v40 }
 0x39f   :  { %v1975_v59 = vmul.f32 0.5, %v1972_v55 }
 0x3a1   :  { %2020 = vmatmul.f32.gmra.mxu3 %v1975_v59  ;;  %v1090_v59 = vadd.f32 %v1088_v31, %v1084_v48 }
 0x3d2   :  { %v1559_v49 = vpop.xlane.xlu0 %1558 }
 0x3d3   :  { %v1566_v3 = vadd.f32 %v1565_v23, %v1559_v49 }
 0x3da   :  { %v1561_v2 = vpop.xlane.xlu1 %1560 }
 0x3e2   :  { %v1563_v61 = vpop.xlane.xlu2 %1562 }
 0x3e3   :  { %v1568_v4 = vadd.f32 %v1565_v23, %v1563_v61 }
 0x3ea   :  { %v1718_v43 = vpop.xlane.xlu0 %1717 }
 0x3eb   :  { %v1725_v55 = vadd.f32 %v1724_v41, %v1718_v43 }
 0x3f2   :  { %v1720_v58 = vpop.xlane.xlu1 %1719 }
 0x3f6   :  { %v1856_v15 = vpop.f32.mrf.mxu0 }
 0x3f7   :  { %v1857_v9 = vadd.f32 %v2108_v5, %v1856_v15  ;;  %v1569_v15 = vadd.f32 %v1566_v3, %v1410_v19 }
 0x3f9   :  { %v1865_v51 = vmax.f32 %v1857_v9, 0.0 }
 0x3fb   :  { %v1873_v11 = vmul.f32 %v2109_v33, %v1865_v51  ;;  %v1093_v51 = vadd.f32 %v1090_v59, %v934_v63 }
 0x3fd   :  { %1876 = vadd.xlane.f32.xlu0 %v1873_v11  ;;  %v1408_v11 = vadd.f32 %v1406_v0, %v1402_v6 }
 0x3fe   :  { %v1859_v24 = vpop.f32.mrf.mxu0 }
 0x3ff   :  { %v1860_v21 = vadd.f32 %v2108_v5, %v1859_v24  ;;  %v1728_v24 = vadd.f32 %v1725_v55, %v1569_v15 }
 0x401   :  { %v1866_v12 = vmax.f32 %v1860_v21, 0.0  ;;  %v1722_v21 = vpop.xlane.xlu2 %1721 }
 0x402   :  { %v1727_v29 = vadd.f32 %v1724_v41, %v1722_v21 }
 0x403   :  { %v1874_v28 = vmul.f32 %v2109_v33, %v1866_v12 }
 0x405   :  { %1878 = vadd.xlane.f32.xlu1 %v1874_v28 }
 0x406   :  { %v1862_v47 = vpop.f32.mrf.mxu0 }
 0x407   :  { %v1863_v42 = vadd.f32 %v2108_v5, %v1862_v47  ;;  %v1249_v5 = vadd.f32 %v1247_v62, %v1243_v50 }
 0x409   :  { %v1867_v54 = vmax.f32 %v1863_v42, 0.0  ;;  %v1252_v47 = vadd.f32 %v1249_v5, %v1093_v51  ;;  %v1567_v42 = vadd.f32 %v1565_v23, %v1561_v2 }
 0x40b   :  { %v1875_v17 = vmul.f32 %v2109_v33, %v1867_v54  ;;  %v2042_v33 = vstv %s2072_s12 }
 0x40d   :  { %1880 = vadd.xlane.f32.xlu2 %v1875_v17 }
 0x414   :  { %v2015_v30 = vpop.f32.mrf.mxu3 }
 0x415   :  { %v2016_v18 = vadd.f32 %v2110_v16, %v2015_v30  ;;  %v1411_v30 = vadd.f32 %v1408_v11, %v1252_v47 }
 0x417   :  { %v2024_v20 = vmax.f32 %v2016_v18, 0.0  ;;  %v1726_v18 = vadd.f32 %v1724_v41, %v1720_v58 }
 0x419   :  { %v2032_v37 = vmul.f32 %v2111_v39, %v2024_v20  ;;  %v1091_v20 = vadd.f32 %v1088_v31, %v1086_v27 }
 0x41b   :  { %2035 = vadd.xlane.f32.xlu0 %v2032_v37  ;;  %v1250_v37 = vadd.f32 %v1247_v62, %v1245_v1 }
 0x41c   :  { %v2018_v44 = vpop.f32.mrf.mxu3 }
 0x41d   :  { %v2019_v36 = vadd.f32 %v2110_v16, %v2018_v44  ;;  %v1570_v44 = vadd.f32 %v1567_v42, %v1411_v30 }
 0x41f   :  { %v2025_v34 = vmax.f32 %v2019_v36, 0.0 }
 0x421   :  { %v2033_v14 = vmul.f32 %v2111_v39, %v2025_v34 }
 0x423   :  { %2037 = vadd.xlane.f32.xlu1 %v2033_v14 }
 0x424   :  { %v2021_v22 = vpop.f32.mrf.mxu3 }
 0x425   :  { %v2022_v52 = vadd.f32 %v2110_v16, %v2021_v22  ;;  %v935_v16 = vadd.f32 %v932_v60, %v930_v46  ;;  %v1409_v22 = vadd.f32 %v1406_v0, %v1404_v8 }
 0x427   :  { %v2026_v57 = vmax.f32 %v2022_v52, 0.0  ;;  %v1094_v14 = vadd.f32 %v1091_v20, %v935_v16  ;;  %v1729_v52 = vadd.f32 %v1726_v18, %v1570_v44 }
 0x429   :  { %v2034_v32 = vmul.f32 %v2111_v39, %v2026_v57  ;;  %v1253_v53 = vadd.f32 %v1250_v37, %v1094_v14 }
 0x42b   :  { %2039 = vadd.xlane.f32.xlu2 %v2034_v32  ;;  %v1412_v46 = vadd.f32 %v1409_v22, %v1253_v53 }
 0x42d   :  { %v1571_v50 = vadd.f32 %v1568_v4, %v1412_v46 }
 0x42f   :  { %v1730_v6 = vadd.f32 %v1727_v29, %v1571_v50 }
 0x470   :  { %v1877_v38 = vpop.xlane.xlu0 %1876 }
 0x471   :  { %v1884_v9 = vadd.f32 %v1883_v13, %v1877_v38 }
 0x473   :  { %v1887_v54 = vadd.f32 %v1884_v9, %v1728_v24 }
 0x478   :  { %v1879_v12 = vpop.xlane.xlu1 %1878 }
 0x479   :  { %v1885_v36 = vadd.f32 %v1883_v13, %v1879_v12 }
 0x47b   :  { %v1888_v26 = vadd.f32 %v1885_v36, %v1729_v52 }
 0x480   :  { %v1881_v57 = vpop.xlane.xlu2 %1880 }
 0x481   :  { %v1886_v10 = vadd.f32 %v1883_v13, %v1881_v57 }
 0x483   :  { %v1889_v8 = vadd.f32 %v1886_v10, %v1730_v6 }
 0x48e   :  { %v2036_v28 = vpop.xlane.xlu0 %2035 }
 0x48f   :  { %v2043_v17 = vadd.f32 %v2042_v33, %v2036_v28 }
 0x491   :  { %v2046_v39 = vadd.f32 %v2043_v17, %v1887_v54 }
 0x493   :  { %v2049_v34 = vmul.f32 0.125, %v2046_v39 }
 0x495   :  { %2053 = vst.msk [vmem:[%s3434_s9] sm:$0xff] %vm2052_vm0, %v2049_v34 }
 0x496   :  { %v2038_v32 = vpop.xlane.xlu1 %2037 }
 0x497   :  { %v2044_v48 = vadd.f32 %v2042_v33, %v2038_v32 }
 0x499   :  { %v2047_v27 = vadd.f32 %v2044_v48, %v1888_v26 }
 0x49b   :  { %v2050_v1 = vmul.f32 0.125, %v2047_v27 }
 0x49d   :  { %2054 = vst.msk [vmem:[%s3434_s9 + $0x8] sm:$0xff] %vm2052_vm0, %v2050_v1 }
 0x49e   :  { %v2040_v49 = vpop.xlane.xlu2 %2039 }
 0x49f   :  { %v2045_v60 = vadd.f32 %v2042_v33, %v2040_v49 }
 0x4a1   :  { %v2048_v2 = vadd.f32 %v2045_v60, %v1889_v8 }
 0x4a3   :  { %v2051_v43 = vmul.f32 0.125, %v2048_v2 }
 0x4a5   :  { %2055 = vst.msk [vmem:[%s3434_s9 + $0x10] sm:$0xff] %vm2052_vm0, %v2051_v43 }
 0x4a6   :  { %2060 = vsyncpa [#allocation3], 1 }
 0x4a7   :  { %2061 = vsyncpa [#allocation6], 1 }
 0x4a8   :  { %2062 = vsyncpa [#allocation9], 1 }
 0x4a9   :  { %2063 = vsyncpa [#allocation12], 1 }
 0x4aa   :  { %2064 = vsyncpa [#allocation15], 1 }
 0x4ab   :  { %2065 = vsyncpa [#allocation4], 1 }

</bundles_post_ra>
